<compile_context>
chip_gen: v5e
topology: v5e:2x2
jax: 0.10.0
libtpu: 0.0.40
codegen_flags: <defaults>
</compile_context>

<pallas_src>
import jax
import jax.numpy as jnp
from jax.experimental import pallas as pl
from jax.experimental.pallas import tpu as pltpu

# ----- hyper-parameters mirroring KeyPointModel.__init__ ----------------------
NUM_VERTEBRA_POINTS = 5          # len(SPINAL_VERTEBRA_ID)
NUM_DISC_POINTS = 6              # len(SPINAL_DISC_ID)
NUM_POINTS = NUM_VERTEBRA_POINTS + NUM_DISC_POINTS   # fc out channels (11)
PIXEL_MEAN = 0.5
PIXEL_STD = 1.0
BACKBONE_OUT_CHANNELS = 32       # backbone.out_channels (stand-in)
BACKBONE_STRIDE = 4              # stride of feature_pyramids['0'] (stand-in)


# ----- kernel -----------------------------------------------------------------
def _build_kernel(emit_heat: bool):
    def kernel(x_ref, ph_ref, pwT_ref, rep_ref, w1_ref, b1_ref,
               w2big_ref, b2_ref, rwT_ref, rh_ref, *out_refs):
        """grid = (B,); one whole image (all K keypoints) per grid step.

        x_ref     : (1, H, W)       bf16  raw grayscale image
        ph_ref    : (h, H)          bf16  1-D stride-4 avg pool (rows)
        pwT_ref   : (W, w)          bf16  1-D stride-4 avg pool (cols, transposed)
        rep_ref   : (C*h, h)        bf16  vertical tiling of I_h (channel stack)
        w1_ref    : (C*h, 1)        f32   folded backbone 1x1-conv weight, per row
        b1_ref    : (C*h, 1)        f32   folded backbone 1x1-conv bias, per row
        w2big_ref : (K*h, C*h)      bf16  kron(w2^T, I_h)  (self.fc as one matmul)
        b2_ref    : (K*h, 1)        f32   self.fc bias, per row
        rwT_ref   : (w, W)          bf16  bilinear upsample cols (align_corners=True)
        rh_ref    : (H, h)          bf16  bilinear upsample rows (align_corners=True)
        outputs (emit_heat=True) : heat (1,K,H,W) f32, idx (1,K,1,1) i32,
                                   feat (1,C*h,w) f32
        outputs (emit_heat=False): idx (1,K,1,1) i32
        """
        if emit_heat:
            heat_ref, idx_ref, feat_ref = out_refs
        else:
            (idx_ref,) = out_refs

        H, W = x_ref.shape[1], x_ref.shape[2]
        hh = rh_ref.shape[1]
        K = idx_ref.shape[1]

        # --- backbone stand-in: stride-4 avg pool (separable, MXU) ------------
        # TODO(synk): the real BackboneWithFPN (ResNet + FPN level '0') is not
        # reproduced; this stand-in keeps the out_channels / stride contract.
        xb = x_ref[0]                                                   # (H, W) bf16
        t = jnp.dot(ph_ref[...], xb,
                    preferred_element_type=jnp.float32)                 # (h, W)
        pooled = jnp.dot(t.astype(jnp.bfloat16), pwT_ref[...],
                         preferred_element_type=jnp.float32)            # (h, w)

        # --- channel stacking + folded 1x1 conv + ReLU (one wide VPU op) ------
        pooled_s = jnp.dot(rep_ref[...], pooled.astype(jnp.bfloat16),
                           preferred_element_type=jnp.float32)          # (C*h, w)
        feat = jnp.maximum(w1_ref[...] * pooled_s + b1_ref[...], 0.0)   # (C*h, w)
        if emit_heat:
            feat_ref[0] = feat                                          # single wide store

        # --- self.fc for all keypoints: one MXU matmul (kron(w2^T, I_h)) ------
        # Bias is added before upsampling: bilinear (align_corners=True) weights
        # sum to 1, so a constant passes through unchanged.
        s = jnp.dot(w2big_ref[...], feat.astype(jnp.bfloat16),
                    preferred_element_type=jnp.float32) + b2_ref[...]   # (K*h, w)

        # --- separable bilinear upsample: columns for all K in one fat matmul -
        u1 = jnp.dot(s.astype(jnp.bfloat16), rwT_ref[...],
                     preferred_element_type=jnp.float32)                # (K*h, W)

        # flat row-major iota, built once per image (hoisted out of the k loop)
        flat = (jax.lax.broadcasted_iota(jnp.int32, (H, W), 0) * W
                + jax.lax.broadcasted_iota(jnp.int32, (H, W), 1))
        sentinel = jnp.int32(H * W)

        for k in range(K):                          # K = 11, unrolled at trace time
            u1k = u1[k * hh:(k + 1) * hh, :]                            # (h, W)
            u2 = jnp.dot(rh_ref[...], u1k.astype(jnp.bfloat16),
                         preferred_element_type=jnp.float32)            # (H, W) logits
            if emit_heat:
                # sigmoid in its EUP-friendly tanh form (== jax.nn.sigmoid)
                heat_ref[0, k] = 0.5 * jnp.tanh(0.5 * u2) + 0.5
            # SpinalModelBase: first row-major spatial argmax, computed on the
            # pre-sigmoid logits (sigmoid is monotonic).
            m = jnp.max(jnp.max(u2, axis=1, keepdims=True), axis=0, keepdims=True)
            cand = jnp.where(u2 >= m, flat, sentinel)
            idx = jnp.min(jnp.min(cand, axis=1, keepdims=True),
                          axis=0, keepdims=True)                        # (1, 1) i32
            idx_ref[0, k] = idx

    return kernel


# ----- glue: separable resampling weights -------------------------------------
def _avg_pool_matrix(in_size: int, factor: int) -> jnp.ndarray:
    out_size = in_size // factor
    rows = jnp.arange(out_size)[:, None]
    cols = jnp.arange(in_size)[None, :]
    return ((cols // factor) == rows).astype(jnp.float32) / float(factor)  # (out, in)


def _bilinear_matrix_align_corners(out_size: int, in_size: int) -> jnp.ndarray:
    """1-D weights matching F.interpolate(mode='bilinear', align_corners=True)."""
    if in_size == 1:
        return jnp.ones((out_size, 1), jnp.float32)
    src = jnp.arange(out_size, dtype=jnp.float32) * (in_size - 1) / (out_size - 1)
    lo = jnp.clip(jnp.floor(src).astype(jnp.int32), 0, in_size - 2)
    frac = src - lo.astype(jnp.float32)
    cols = jnp.arange(in_size)[None, :]
    w_lo = (cols == lo[:, None]).astype(jnp.float32) * (1.0 - frac)[:, None]
    w_hi = (cols == (lo + 1)[:, None]).astype(jnp.float32) * frac[:, None]
    return w_lo + w_hi                                                     # (out, in)


def init_params(key, c_feat=BACKBONE_OUT_CHANNELS, k=NUM_POINTS):
    k1, k2, k3, k4 = jax.random.split(key, 4)
    w1 = jax.random.normal(k1, (3, c_feat), jnp.float32) * 0.2   # backbone 1x1 conv
    b1 = jax.random.normal(k2, (1, c_feat), jnp.float32) * 0.05
    w2 = jax.random.normal(k3, (c_feat, k), jnp.float32) * 0.2   # self.fc (1x1 conv)
    b2 = jax.random.normal(k4, (1, k), jnp.float32) * 0.05
    return w1, b1, w2, b2


def _vmem_limit_bytes(H, W, hh, ww, C, K, emit_heat):
    """Scoped-VMEM request derived from actual block sizes and the chip's capacity."""
    def buf(r, c, itemsize):                       # (8, 128)-padded buffer bytes
        return ((r + 7) // 8 * 8) * ((c + 127) // 128 * 128) * itemsize

    blocks = (buf(H, W, 2) + buf(hh, H, 2) + buf(W, ww, 2) + buf(C * hh, hh, 2)
              + 2 * buf(C * hh, 1, 4) + buf(K * hh, C * hh, 2) + buf(K * hh, 1, 4)
              + buf(ww, W, 2) + buf(H, hh, 2) + K * buf(1, 1, 4))
    if emit_heat:
        blocks += K * buf(H, W, 4) + buf(C * hh, ww, 4)
    temps = (buf(C * hh, ww, 4) + buf(K * hh, ww, 4) + buf(K * hh, W, 4)
             + 6 * buf(H, W, 4) + (2 << 20))
    est = 2 * blocks + temps                       # blocks are double-buffered

    try:
        cap = pltpu.get_tpu_info().vmem_capacity_bytes   # 64 MiB on v7x, 128 on v5e/v6e
    except Exception:
        cap = 64 * 2 ** 20                               # v7x-safe fallback
    return int(min(int(cap * 0.9), max(32 * 2 ** 20, 2 * est)))


def keypoint_model_forward(images, params, return_more=False):
    """Eval-mode KeyPointModel.forward(images).

    images: (B, 1, H, W) float32 NCHW.
    Returns (vertebra_coords, disc_coords[, heat_maps, feature_maps]);
    coords are int32 (B, n, 2) = (x, y), heat_maps (B, K, H, W) NCHW.
    """
    w1, b1, w2, b2 = params
    B, cin, H, W = images.shape
    assert cin == 1 and H % BACKBONE_STRIDE == 0 and W % BACKBONE_STRIDE == 0
    hh, ww = H // BACKBONE_STRIDE, W // BACKBONE_STRIDE
    C, K = w2.shape

    # fold the 3-channel broadcast and (x - mean) / std into the 1x1-conv params
    w1_sum = jnp.sum(w1, axis=0)                                    # (C,)
    w1_fold = w1_sum / PIXEL_STD
    b1_fold = b1[0] - PIXEL_MEAN * w1_sum / PIXEL_STD

    # per-row replicated params for the channel-stacked (C*h, w) layout
    w1_rep = jnp.repeat(w1_fold, hh)[:, None].astype(jnp.float32)   # (C*h, 1)
    b1_rep = jnp.repeat(b1_fold, hh)[:, None].astype(jnp.float32)   # (C*h, 1)
    b2_rep = jnp.repeat(b2[0], hh)[:, None].astype(jnp.float32)     # (K*h, 1)
    # self.fc as one block-diagonal MXU matmul: kron(w2^T, I_h) -> (K*h, C*h)
    w2big = jnp.kron(w2.T, jnp.eye(hh, dtype=jnp.float32)).astype(jnp.bfloat16)
    # channel replication matrix: vertical tiling of I_h -> (C*h, h)
    rep = jnp.tile(jnp.eye(hh, dtype=jnp.float32), (C, 1)).astype(jnp.bfloat16)

    # separable resampling matrices
    ph = _avg_pool_matrix(H, BACKBONE_STRIDE).astype(jnp.bfloat16)       # (h, H)
    pwT = _avg_pool_matrix(W, BACKBONE_STRIDE).T.astype(jnp.bfloat16)    # (W, w)
    rh = _bilinear_matrix_align_corners(H, hh).astype(jnp.bfloat16)      # (H, h)
    rwT = _bilinear_matrix_align_corners(W, ww).T.astype(jnp.bfloat16)   # (w, W)

    x = images.reshape(B, H, W).astype(jnp.bfloat16)                     # lane-dense rows

    in_specs = [
        pl.BlockSpec((1, H, W), lambda b: (b, 0, 0)),          # image
        pl.BlockSpec((hh, H), lambda b: (0, 0)),               # pool rows
        pl.BlockSpec((W, ww), lambda b: (0, 0)),               # pool cols^T
        pl.BlockSpec((C * hh, hh), lambda b: (0, 0)),          # channel replication
        pl.BlockSpec((C * hh, 1), lambda b: (0, 0)),           # w1 folded (per row)
        pl.BlockSpec((C * hh, 1), lambda b: (0, 0)),           # b1 folded (per row)
        pl.BlockSpec((K * hh, C * hh), lambda b: (0, 0)),      # kron(w2^T, I_h)
        pl.BlockSpec((K * hh, 1), lambda b: (0, 0)),           # b2 (per row)
        pl.BlockSpec((ww, W), lambda b: (0, 0)),               # upsample cols^T
        pl.BlockSpec((H, hh), lambda b: (0, 0)),               # upsample rows
    ]
    args = (x, ph, pwT, rep, w1_rep, b1_rep, w2big, b2_rep, rwT, rh)

    idx_shape = jax.ShapeDtypeStruct((B, K, 1, 1), jnp.int32)
    idx_spec = pl.BlockSpec((1, K, 1, 1), lambda b: (b, 0, 0, 0))

    if return_more:
        out_shape = (jax.ShapeDtypeStruct((B, K, H, W), jnp.float32),    # heat, NCHW
                     idx_shape,                                          # flat argmax
                     jax.ShapeDtypeStruct((B, C * hh, ww), jnp.float32)) # stacked feat
        out_specs = (pl.BlockSpec((1, K, H, W), lambda b: (b, 0, 0, 0)),
                     idx_spec,
                     pl.BlockSpec((1, C * hh, ww), lambda b: (b, 0, 0)))
    else:
        out_shape = idx_shape                      # coords-only: no heat/feat writeback
        out_specs = idx_spec

    outs = pl.pallas_call(
        _build_kernel(return_more),
        grid=(B,),
        out_shape=out_shape,
        in_specs=in_specs,
        out_specs=out_specs,
        compiler_params=pltpu.CompilerParams(
            dimension_semantics=("parallel",),
            vmem_limit_bytes=_vmem_limit_bytes(H, W, hh, ww, C, K, return_more)),
    )(*args)

    if return_more:
        heat, idx4, feat_stacked = outs
        feat = feat_stacked.reshape(B, C, hh, ww)          # wrapper-side reshape (XLA)
    else:
        idx4 = outs

    # coord decode + split (glue), identical to SpinalModelBase + pred_coords
    idx = idx4.reshape(B, K)
    coords = jnp.stack([idx % W, idx // W], axis=-1).astype(jnp.int32)   # (B, K, 2) = (x, y)
    vertebra_coords = coords[:, :NUM_VERTEBRA_POINTS]
    disc_coords = coords[:, NUM_VERTEBRA_POINTS:]

    if return_more:
        # TODO(synk): training branch / KeyPointBCELoss not implemented (eval only).
        return vertebra_coords, disc_coords, heat, feat
    return vertebra_coords, disc_coords


# ----- pure-JAX f32 reference (same stand-in backbone) for correctness check ---
def _reference_heat(images, params):
    w1, b1, w2, b2 = params
    B, _, H, W = images.shape
    s = BACKBONE_STRIDE
    hh, ww = H // s, W // s
    xn = (images[:, 0] - PIXEL_MEAN) / PIXEL_STD                         # (B, H, W)
    pooled = xn.reshape(B, hh, s, ww, s).mean(axis=(2, 4))
    feat = jax.nn.relu(pooled[..., None] * jnp.sum(w1, axis=0) + b1[0])  # (B, h, w, C)
    scores = feat @ w2 + b2[0]                                           # (B, h, w, K)
    rh = _bilinear_matrix_align_corners(H, hh)
    rw = _bilinear_matrix_align_corners(W, ww)
    up = jnp.einsum('Hh,bhwk,Ww->bkHW', rh, scores, rw)
    return jax.nn.sigmoid(up)


if __name__ == "__main__":
    key = jax.random.PRNGKey(0)
    pkey, ikey = jax.random.split(key)
    params = init_params(pkey)
    images = jax.random.uniform(ikey, (2, 1, 32, 32), dtype=jnp.float32)

    # full path: coords + heat maps + feature maps
    vert, disc, heat, feat = keypoint_model_forward(images, params, return_more=True)
    jax.block_until_ready((vert, disc, heat, feat))

    # coords-only fast path (no heat / feature-map HBM writeback)
    vert2, disc2 = keypoint_model_forward(images, params, return_more=False)
    jax.block_until_ready((vert2, disc2))

    B, _, H, W = images.shape
    assert vert.shape == (B, NUM_VERTEBRA_POINTS, 2)
    assert disc.shape == (B, NUM_DISC_POINTS, 2)
    assert heat.shape == (B, NUM_POINTS, H, W)
    assert feat.shape == (B, BACKBONE_OUT_CHANNELS,
                          H // BACKBONE_STRIDE, W // BACKBONE_STRIDE)
    assert bool(jnp.all((heat >= 0.0) & (heat <= 1.0)))
    assert bool(jnp.all(vert == vert2)) and bool(jnp.all(disc == disc2))

    # numerical check vs. f32 reference (kernel uses bf16 MXU operands)
    heat_f32 = _reference_heat(images, params)
    max_err = float(jnp.max(jnp.abs(heat - heat_f32)))
    assert max_err < 3e-2, max_err

    # decoded coordinates hit the spatial maxima of the heat maps
    coords = jnp.concatenate([vert, disc], axis=1)                        # (B, K, 2)
    flat = heat.reshape(B, NUM_POINTS, -1)
    picked = jnp.take_along_axis(
        flat, (coords[..., 1] * W + coords[..., 0])[..., None], axis=-1)[..., 0]
    assert bool(jnp.all(picked >= flat.max(axis=-1) - 1e-3))
    assert bool(jnp.all(coords >= 0))
    assert bool(jnp.all(coords[..., 0] < W)) and bool(jnp.all(coords[..., 1] < H))

    print("KERNEL_OK")
</pallas_src>

<mosaic_0001>
module attributes {stable_mosaic.version = 11 : i64} {
  func.func @kernel(%arg0: i32, %arg1: memref<1x32x32xbf16, #tpu.memory_space<vmem>>, %arg2: memref<8x32xbf16, #tpu.memory_space<vmem>>, %arg3: memref<32x8xbf16, #tpu.memory_space<vmem>>, %arg4: memref<256x8xbf16, #tpu.memory_space<vmem>>, %arg5: memref<256x1xf32, #tpu.memory_space<vmem>>, %arg6: memref<256x1xf32, #tpu.memory_space<vmem>>, %arg7: memref<88x256xbf16, #tpu.memory_space<vmem>>, %arg8: memref<88x1xf32, #tpu.memory_space<vmem>>, %arg9: memref<8x32xbf16, #tpu.memory_space<vmem>>, %arg10: memref<32x8xbf16, #tpu.memory_space<vmem>>, %arg11: memref<1x11x32x32xf32, #tpu.memory_space<vmem>>, %arg12: memref<1x11x1x1xi32, #tpu.memory_space<vmem>>, %arg13: memref<1x256x8xf32, #tpu.memory_space<vmem>>) attributes {dimension_semantics = [#tpu.dimension_semantics<parallel>], iteration_bounds = array<i64: 2>, scalar_prefetch = 0 : i64, scratch_operands = 0 : i64, tpu.core_type = #tpu.core_type<tc>, window_params = [{transform_indices = @transform_0, window_bounds = array<i64: 1, 32, 32>}, {pipeline_mode = #tpu.pipeline_mode<synchronous>, transform_indices = @transform_1, window_bounds = array<i64: 8, 32>}, {pipeline_mode = #tpu.pipeline_mode<synchronous>, transform_indices = @transform_2, window_bounds = array<i64: 32, 8>}, {pipeline_mode = #tpu.pipeline_mode<synchronous>, transform_indices = @transform_3, window_bounds = array<i64: 256, 8>}, {pipeline_mode = #tpu.pipeline_mode<synchronous>, transform_indices = @transform_4, window_bounds = array<i64: 256, 1>}, {pipeline_mode = #tpu.pipeline_mode<synchronous>, transform_indices = @transform_5, window_bounds = array<i64: 256, 1>}, {pipeline_mode = #tpu.pipeline_mode<synchronous>, transform_indices = @transform_6, window_bounds = array<i64: 88, 256>}, {pipeline_mode = #tpu.pipeline_mode<synchronous>, transform_indices = @transform_7, window_bounds = array<i64: 88, 1>}, {pipeline_mode = #tpu.pipeline_mode<synchronous>, transform_indices = @transform_8, window_bounds = array<i64: 8, 32>}, {pipeline_mode = #tpu.pipeline_mode<synchronous>, transform_indices = @transform_9, window_bounds = array<i64: 32, 8>}, {transform_indices = @transform_10, window_bounds = array<i64: 1, 11, 32, 32>}, {transform_indices = @transform_11, window_bounds = array<i64: 1, 11, 1, 1>}, {transform_indices = @transform_12, window_bounds = array<i64: 1, 256, 8>}]} {
    %c0 = arith.constant 0 : index
    %c0_0 = arith.constant 0 : index
    %c0_1 = arith.constant 0 : index
    %0 = vector.load %arg1[%c0, %c0_0, %c0_1] : memref<1x32x32xbf16, #tpu.memory_space<vmem>>, vector<1x32x32xbf16>
    %1 = vector.shape_cast %0 : vector<1x32x32xbf16> to vector<32x32xbf16>
    %c0_2 = arith.constant 0 : index
    %c0_3 = arith.constant 0 : index
    %2 = vector.load %arg2[%c0_2, %c0_3] : memref<8x32xbf16, #tpu.memory_space<vmem>>, vector<8x32xbf16>
    %cst = arith.constant dense<0.000000e+00> : vector<8x32xf32>
    %3 = tpu.matmul %2, %1, %cst {dimension_numbers = #tpu.dot_dimension_numbers<[1], [0], [0], [1], [0, 0, 1, 1], [], []>} : vector<8x32xbf16>, vector<32x32xbf16>, vector<8x32xf32> -> vector<8x32xf32>
    %4 = arith.truncf %3 : vector<8x32xf32> to vector<8x32xbf16>
    %c0_4 = arith.constant 0 : index
    %c0_5 = arith.constant 0 : index
    %5 = vector.load %arg3[%c0_4, %c0_5] : memref<32x8xbf16, #tpu.memory_space<vmem>>, vector<32x8xbf16>
    %cst_6 = arith.constant dense<0.000000e+00> : vector<8x8xf32>
    %6 = tpu.matmul %4, %5, %cst_6 {dimension_numbers = #tpu.dot_dimension_numbers<[1], [0], [0], [1], [0, 0, 1, 1], [], []>} : vector<8x32xbf16>, vector<32x8xbf16>, vector<8x8xf32> -> vector<8x8xf32>
    %c0_7 = arith.constant 0 : index
    %c0_8 = arith.constant 0 : index
    %7 = vector.load %arg4[%c0_7, %c0_8] : memref<256x8xbf16, #tpu.memory_space<vmem>>, vector<256x8xbf16>
    %8 = arith.truncf %6 : vector<8x8xf32> to vector<8x8xbf16>
    %cst_9 = arith.constant dense<0.000000e+00> : vector<256x8xf32>
    %9 = tpu.matmul %7, %8, %cst_9 {dimension_numbers = #tpu.dot_dimension_numbers<[1], [0], [0], [1], [0, 0, 1, 1], [], []>} : vector<256x8xbf16>, vector<8x8xbf16>, vector<256x8xf32> -> vector<256x8xf32>
    %c0_10 = arith.constant 0 : index
    %c0_11 = arith.constant 0 : index
    %10 = vector.load %arg5[%c0_10, %c0_11] : memref<256x1xf32, #tpu.memory_space<vmem>>, vector<256x1xf32>
    %11 = vector.broadcast %10 : vector<256x1xf32> to vector<256x8xf32>
    %12 = arith.mulf %11, %9 : vector<256x8xf32>
    %c0_12 = arith.constant 0 : index
    %c0_13 = arith.constant 0 : index
    %13 = vector.load %arg6[%c0_12, %c0_13] : memref<256x1xf32, #tpu.memory_space<vmem>>, vector<256x1xf32>
    %14 = vector.broadcast %13 : vector<256x1xf32> to vector<256x8xf32>
    %15 = arith.addf %12, %14 : vector<256x8xf32>
    %cst_14 = arith.constant 0.000000e+00 : f32
    %16 = vector.broadcast %cst_14 : f32 to vector<256x8xf32>
    %17 = arith.maximumf %15, %16 : vector<256x8xf32>
    %c0_15 = arith.constant 0 : index
    %c0_16 = arith.constant 0 : index
    %c0_17 = arith.constant 0 : index
    %18 = vector.load %arg13[%c0_15, %c0_16, %c0_17] : memref<1x256x8xf32, #tpu.memory_space<vmem>>, vector<1x256x8xf32>
    %19 = vector.shape_cast %18 : vector<1x256x8xf32> to vector<256x8xf32>
    %20 = vector.shape_cast %17 : vector<256x8xf32> to vector<1x256x8xf32>
    tpu.vector_store %arg13[%c0_15, %c0_16, %c0_17], %20 {strides = array<i32>} : memref<1x256x8xf32, #tpu.memory_space<vmem>>, vector<1x256x8xf32>,
    %c0_18 = arith.constant 0 : index
    %c0_19 = arith.constant 0 : index
    %21 = vector.load %arg7[%c0_18, %c0_19] : memref<88x256xbf16, #tpu.memory_space<vmem>>, vector<88x256xbf16>
    %22 = arith.truncf %17 : vector<256x8xf32> to vector<256x8xbf16>
    %cst_20 = arith.constant dense<0.000000e+00> : vector<88x8xf32>
    %23 = tpu.matmul %21, %22, %cst_20 {dimension_numbers = #tpu.dot_dimension_numbers<[1], [0], [0], [1], [0, 0, 1, 1], [], []>} : vector<88x256xbf16>, vector<256x8xbf16>, vector<88x8xf32> -> vector<88x8xf32>
    %c0_21 = arith.constant 0 : index
    %c0_22 = arith.constant 0 : index
    %24 = vector.load %arg8[%c0_21, %c0_22] : memref<88x1xf32, #tpu.memory_space<vmem>>, vector<88x1xf32>
    %25 = vector.broadcast %24 : vector<88x1xf32> to vector<88x8xf32>
    %26 = arith.addf %23, %25 : vector<88x8xf32>
    %27 = arith.truncf %26 : vector<88x8xf32> to vector<88x8xbf16>
    %c0_23 = arith.constant 0 : index
    %c0_24 = arith.constant 0 : index
    %28 = vector.load %arg9[%c0_23, %c0_24] : memref<8x32xbf16, #tpu.memory_space<vmem>>, vector<8x32xbf16>
    %cst_25 = arith.constant dense<0.000000e+00> : vector<88x32xf32>
    %29 = tpu.matmul %27, %28, %cst_25 {dimension_numbers = #tpu.dot_dimension_numbers<[1], [0], [0], [1], [0, 0, 1, 1], [], []>} : vector<88x8xbf16>, vector<8x32xbf16>, vector<88x32xf32> -> vector<88x32xf32>
    %30 = tpu.iota {dimensions = array<i32: 0>} : vector<32x32xi32>
    %c32_i32 = arith.constant 32 : i32
    %31 = vector.broadcast %c32_i32 : i32 to vector<32x32xi32>
    %32 = arith.muli %30, %31 : vector<32x32xi32>
    %33 = tpu.iota {dimensions = array<i32: 1>} : vector<32x32xi32>
    %34 = arith.addi %32, %33 : vector<32x32xi32>
    %35 = vector.extract_strided_slice %29 {offsets = [0, 0], sizes = [8, 32], strides = [1, 1]} : vector<88x32xf32> to vector<8x32xf32>
    %c0_26 = arith.constant 0 : index
    %c0_27 = arith.constant 0 : index
    %36 = vector.load %arg10[%c0_26, %c0_27] : memref<32x8xbf16, #tpu.memory_space<vmem>>, vector<32x8xbf16>
    %37 = arith.truncf %35 : vector<8x32xf32> to vector<8x32xbf16>
    %cst_28 = arith.constant dense<0.000000e+00> : vector<32x32xf32>
    %38 = tpu.matmul %36, %37, %cst_28 {dimension_numbers = #tpu.dot_dimension_numbers<[1], [0], [0], [1], [0, 0, 1, 1], [], []>} : vector<32x8xbf16>, vector<8x32xbf16>, vector<32x32xf32> -> vector<32x32xf32>
    %cst_29 = arith.constant 5.000000e-01 : f32
    %39 = vector.broadcast %cst_29 : f32 to vector<32x32xf32>
    %40 = arith.mulf %39, %38 : vector<32x32xf32>
    %41 = math.tanh %40 : vector<32x32xf32>
    %cst_30 = arith.constant 5.000000e-01 : f32
    %42 = vector.broadcast %cst_30 : f32 to vector<32x32xf32>
    %43 = arith.mulf %42, %41 : vector<32x32xf32>
    %cst_31 = arith.constant 5.000000e-01 : f32
    %44 = vector.broadcast %cst_31 : f32 to vector<32x32xf32>
    %45 = arith.addf %43, %44 : vector<32x32xf32>
    %c0_32 = arith.constant 0 : index
    %c0_33 = arith.constant 0 : index
    %c0_34 = arith.constant 0 : index
    %c0_35 = arith.constant 0 : index
    %46 = vector.load %arg11[%c0_32, %c0_33, %c0_34, %c0_35] : memref<1x11x32x32xf32, #tpu.memory_space<vmem>>, vector<1x1x32x32xf32>
    %47 = vector.shape_cast %46 : vector<1x1x32x32xf32> to vector<32x32xf32>
    %48 = vector.shape_cast %45 : vector<32x32xf32> to vector<1x1x32x32xf32>
    tpu.vector_store %arg11[%c0_32, %c0_33, %c0_34, %c0_35], %48 {strides = array<i32>} : memref<1x11x32x32xf32, #tpu.memory_space<vmem>>, vector<1x1x32x32xf32>,
    %cst_36 = arith.constant dense<0xFF800000> : vector<32xf32>
    %49 = vector.multi_reduction <maximumf>, %38, %cst_36 [1] : vector<32x32xf32> to vector<32xf32>
    %50 = vector.shape_cast %49 : vector<32xf32> to vector<32x1xf32>
    %cst_37 = arith.constant dense<0xFF800000> : vector<1xf32>
    %51 = vector.multi_reduction <maximumf>, %50, %cst_37 [0] : vector<32x1xf32> to vector<1xf32>
    %52 = vector.shape_cast %51 : vector<1xf32> to vector<1x1xf32>
    %53 = vector.broadcast %52 : vector<1x1xf32> to vector<32x32xf32>
    %54 = arith.cmpf oge, %38, %53 : vector<32x32xf32>
    %c1024_i32 = arith.constant 1024 : i32
    %55 = vector.broadcast %c1024_i32 : i32 to vector<32x32xi32>
    %56 = arith.select %54, %34, %55 : vector<32x32xi1>, vector<32x32xi32>
    %cst_38 = arith.constant dense<2147483647> : vector<32xi32>
    %57 = vector.multi_reduction <minsi>, %56, %cst_38 [1] : vector<32x32xi32> to vector<32xi32>
    %58 = vector.shape_cast %57 : vector<32xi32> to vector<32x1xi32>
    %cst_39 = arith.constant dense<2147483647> : vector<1xi32>
    %59 = vector.multi_reduction <minsi>, %58, %cst_39 [0] : vector<32x1xi32> to vector<1xi32>
    %60 = vector.shape_cast %59 : vector<1xi32> to vector<1x1xi32>
    %c0_40 = arith.constant 0 : index
    %c0_41 = arith.constant 0 : index
    %c0_42 = arith.constant 0 : index
    %c0_43 = arith.constant 0 : index
    %61 = vector.load %arg12[%c0_40, %c0_41, %c0_42, %c0_43] : memref<1x11x1x1xi32, #tpu.memory_space<vmem>>, vector<1x1x1x1xi32>
    %62 = vector.shape_cast %61 : vector<1x1x1x1xi32> to vector<1x1xi32>
    %63 = vector.shape_cast %60 : vector<1x1xi32> to vector<1x1x1x1xi32>
    tpu.vector_store %arg12[%c0_40, %c0_41, %c0_42, %c0_43], %63 {strides = array<i32>} : memref<1x11x1x1xi32, #tpu.memory_space<vmem>>, vector<1x1x1x1xi32>,
    %64 = vector.extract_strided_slice %29 {offsets = [8, 0], sizes = [8, 32], strides = [1, 1]} : vector<88x32xf32> to vector<8x32xf32>
    %c0_44 = arith.constant 0 : index
    %c0_45 = arith.constant 0 : index
    %65 = vector.load %arg10[%c0_44, %c0_45] : memref<32x8xbf16, #tpu.memory_space<vmem>>, vector<32x8xbf16>
    %66 = arith.truncf %64 : vector<8x32xf32> to vector<8x32xbf16>
    %cst_46 = arith.constant dense<0.000000e+00> : vector<32x32xf32>
    %67 = tpu.matmul %65, %66, %cst_46 {dimension_numbers = #tpu.dot_dimension_numbers<[1], [0], [0], [1], [0, 0, 1, 1], [], []>} : vector<32x8xbf16>, vector<8x32xbf16>, vector<32x32xf32> -> vector<32x32xf32>
    %cst_47 = arith.constant 5.000000e-01 : f32
    %68 = vector.broadcast %cst_47 : f32 to vector<32x32xf32>
    %69 = arith.mulf %68, %67 : vector<32x32xf32>
    %70 = math.tanh %69 : vector<32x32xf32>
    %cst_48 = arith.constant 5.000000e-01 : f32
    %71 = vector.broadcast %cst_48 : f32 to vector<32x32xf32>
    %72 = arith.mulf %71, %70 : vector<32x32xf32>
    %cst_49 = arith.constant 5.000000e-01 : f32
    %73 = vector.broadcast %cst_49 : f32 to vector<32x32xf32>
    %74 = arith.addf %72, %73 : vector<32x32xf32>
    %c0_50 = arith.constant 0 : index
    %c1 = arith.constant 1 : index
    %c0_51 = arith.constant 0 : index
    %c0_52 = arith.constant 0 : index
    %75 = vector.load %arg11[%c0_50, %c1, %c0_51, %c0_52] : memref<1x11x32x32xf32, #tpu.memory_space<vmem>>, vector<1x1x32x32xf32>
    %76 = vector.shape_cast %75 : vector<1x1x32x32xf32> to vector<32x32xf32>
    %77 = vector.shape_cast %74 : vector<32x32xf32> to vector<1x1x32x32xf32>
    tpu.vector_store %arg11[%c0_50, %c1, %c0_51, %c0_52], %77 {strides = array<i32>} : memref<1x11x32x32xf32, #tpu.memory_space<vmem>>, vector<1x1x32x32xf32>,
    %cst_53 = arith.constant dense<0xFF800000> : vector<32xf32>
    %78 = vector.multi_reduction <maximumf>, %67, %cst_53 [1] : vector<32x32xf32> to vector<32xf32>
    %79 = vector.shape_cast %78 : vector<32xf32> to vector<32x1xf32>
    %cst_54 = arith.constant dense<0xFF800000> : vector<1xf32>
    %80 = vector.multi_reduction <maximumf>, %79, %cst_54 [0] : vector<32x1xf32> to vector<1xf32>
    %81 = vector.shape_cast %80 : vector<1xf32> to vector<1x1xf32>
    %82 = vector.broadcast %81 : vector<1x1xf32> to vector<32x32xf32>
    %83 = arith.cmpf oge, %67, %82 : vector<32x32xf32>
    %c1024_i32_55 = arith.constant 1024 : i32
    %84 = vector.broadcast %c1024_i32_55 : i32 to vector<32x32xi32>
    %85 = arith.select %83, %34, %84 : vector<32x32xi1>, vector<32x32xi32>
    %cst_56 = arith.constant dense<2147483647> : vector<32xi32>
    %86 = vector.multi_reduction <minsi>, %85, %cst_56 [1] : vector<32x32xi32> to vector<32xi32>
    %87 = vector.shape_cast %86 : vector<32xi32> to vector<32x1xi32>
    %cst_57 = arith.constant dense<2147483647> : vector<1xi32>
    %88 = vector.multi_reduction <minsi>, %87, %cst_57 [0] : vector<32x1xi32> to vector<1xi32>
    %89 = vector.shape_cast %88 : vector<1xi32> to vector<1x1xi32>
    %c0_58 = arith.constant 0 : index
    %c1_59 = arith.constant 1 : index
    %c0_60 = arith.constant 0 : index
    %c0_61 = arith.constant 0 : index
    %90 = vector.load %arg12[%c0_58, %c1_59, %c0_60, %c0_61] : memref<1x11x1x1xi32, #tpu.memory_space<vmem>>, vector<1x1x1x1xi32>
    %91 = vector.shape_cast %90 : vector<1x1x1x1xi32> to vector<1x1xi32>
    %92 = vector.shape_cast %89 : vector<1x1xi32> to vector<1x1x1x1xi32>
    tpu.vector_store %arg12[%c0_58, %c1_59, %c0_60, %c0_61], %92 {strides = array<i32>} : memref<1x11x1x1xi32, #tpu.memory_space<vmem>>, vector<1x1x1x1xi32>,
    %93 = vector.extract_strided_slice %29 {offsets = [16, 0], sizes = [8, 32], strides = [1, 1]} : vector<88x32xf32> to vector<8x32xf32>
    %c0_62 = arith.constant 0 : index
    %c0_63 = arith.constant 0 : index
    %94 = vector.load %arg10[%c0_62, %c0_63] : memref<32x8xbf16, #tpu.memory_space<vmem>>, vector<32x8xbf16>
    %95 = arith.truncf %93 : vector<8x32xf32> to vector<8x32xbf16>
    %cst_64 = arith.constant dense<0.000000e+00> : vector<32x32xf32>
    %96 = tpu.matmul %94, %95, %cst_64 {dimension_numbers = #tpu.dot_dimension_numbers<[1], [0], [0], [1], [0, 0, 1, 1], [], []>} : vector<32x8xbf16>, vector<8x32xbf16>, vector<32x32xf32> -> vector<32x32xf32>
    %cst_65 = arith.constant 5.000000e-01 : f32
    %97 = vector.broadcast %cst_65 : f32 to vector<32x32xf32>
    %98 = arith.mulf %97, %96 : vector<32x32xf32>
    %99 = math.tanh %98 : vector<32x32xf32>
    %cst_66 = arith.constant 5.000000e-01 : f32
    %100 = vector.broadcast %cst_66 : f32 to vector<32x32xf32>
    %101 = arith.mulf %100, %99 : vector<32x32xf32>
    %cst_67 = arith.constant 5.000000e-01 : f32
    %102 = vector.broadcast %cst_67 : f32 to vector<32x32xf32>
    %103 = arith.addf %101, %102 : vector<32x32xf32>
    %c0_68 = arith.constant 0 : index
    %c2 = arith.constant 2 : index
    %c0_69 = arith.constant 0 : index
    %c0_70 = arith.constant 0 : index
    %104 = vector.load %arg11[%c0_68, %c2, %c0_69, %c0_70] : memref<1x11x32x32xf32, #tpu.memory_space<vmem>>, vector<1x1x32x32xf32>
    %105 = vector.shape_cast %104 : vector<1x1x32x32xf32> to vector<32x32xf32>
    %106 = vector.shape_cast %103 : vector<32x32xf32> to vector<1x1x32x32xf32>
    tpu.vector_store %arg11[%c0_68, %c2, %c0_69, %c0_70], %106 {strides = array<i32>} : memref<1x11x32x32xf32, #tpu.memory_space<vmem>>, vector<1x1x32x32xf32>,
    %cst_71 = arith.constant dense<0xFF800000> : vector<32xf32>
    %107 = vector.multi_reduction <maximumf>, %96, %cst_71 [1] : vector<32x32xf32> to vector<32xf32>
    %108 = vector.shape_cast %107 : vector<32xf32> to vector<32x1xf32>
    %cst_72 = arith.constant dense<0xFF800000> : vector<1xf32>
    %109 = vector.multi_reduction <maximumf>, %108, %cst_72 [0] : vector<32x1xf32> to vector<1xf32>
    %110 = vector.shape_cast %109 : vector<1xf32> to vector<1x1xf32>
    %111 = vector.broadcast %110 : vector<1x1xf32> to vector<32x32xf32>
    %112 = arith.cmpf oge, %96, %111 : vector<32x32xf32>
    %c1024_i32_73 = arith.constant 1024 : i32
    %113 = vector.broadcast %c1024_i32_73 : i32 to vector<32x32xi32>
    %114 = arith.select %112, %34, %113 : vector<32x32xi1>, vector<32x32xi32>
    %cst_74 = arith.constant dense<2147483647> : vector<32xi32>
    %115 = vector.multi_reduction <minsi>, %114, %cst_74 [1] : vector<32x32xi32> to vector<32xi32>
    %116 = vector.shape_cast %115 : vector<32xi32> to vector<32x1xi32>
    %cst_75 = arith.constant dense<2147483647> : vector<1xi32>
    %117 = vector.multi_reduction <minsi>, %116, %cst_75 [0] : vector<32x1xi32> to vector<1xi32>
    %118 = vector.shape_cast %117 : vector<1xi32> to vector<1x1xi32>
    %c0_76 = arith.constant 0 : index
    %c2_77 = arith.constant 2 : index
    %c0_78 = arith.constant 0 : index
    %c0_79 = arith.constant 0 : index
    %119 = vector.load %arg12[%c0_76, %c2_77, %c0_78, %c0_79] : memref<1x11x1x1xi32, #tpu.memory_space<vmem>>, vector<1x1x1x1xi32>
    %120 = vector.shape_cast %119 : vector<1x1x1x1xi32> to vector<1x1xi32>
    %121 = vector.shape_cast %118 : vector<1x1xi32> to vector<1x1x1x1xi32>
    tpu.vector_store %arg12[%c0_76, %c2_77, %c0_78, %c0_79], %121 {strides = array<i32>} : memref<1x11x1x1xi32, #tpu.memory_space<vmem>>, vector<1x1x1x1xi32>,
    %122 = vector.extract_strided_slice %29 {offsets = [24, 0], sizes = [8, 32], strides = [1, 1]} : vector<88x32xf32> to vector<8x32xf32>
    %c0_80 = arith.constant 0 : index
    %c0_81 = arith.constant 0 : index
    %123 = vector.load %arg10[%c0_80, %c0_81] : memref<32x8xbf16, #tpu.memory_space<vmem>>, vector<32x8xbf16>
    %124 = arith.truncf %122 : vector<8x32xf32> to vector<8x32xbf16>
    %cst_82 = arith.constant dense<0.000000e+00> : vector<32x32xf32>
    %125 = tpu.matmul %123, %124, %cst_82 {dimension_numbers = #tpu.dot_dimension_numbers<[1], [0], [0], [1], [0, 0, 1, 1], [], []>} : vector<32x8xbf16>, vector<8x32xbf16>, vector<32x32xf32> -> vector<32x32xf32>
    %cst_83 = arith.constant 5.000000e-01 : f32
    %126 = vector.broadcast %cst_83 : f32 to vector<32x32xf32>
    %127 = arith.mulf %126, %125 : vector<32x32xf32>
    %128 = math.tanh %127 : vector<32x32xf32>
    %cst_84 = arith.constant 5.000000e-01 : f32
    %129 = vector.broadcast %cst_84 : f32 to vector<32x32xf32>
    %130 = arith.mulf %129, %128 : vector<32x32xf32>
    %cst_85 = arith.constant 5.000000e-01 : f32
    %131 = vector.broadcast %cst_85 : f32 to vector<32x32xf32>
    %132 = arith.addf %130, %131 : vector<32x32xf32>
    %c0_86 = arith.constant 0 : index
    %c3 = arith.constant 3 : index
    %c0_87 = arith.constant 0 : index
    %c0_88 = arith.constant 0 : index
    %133 = vector.load %arg11[%c0_86, %c3, %c0_87, %c0_88] : memref<1x11x32x32xf32, #tpu.memory_space<vmem>>, vector<1x1x32x32xf32>
    %134 = vector.shape_cast %133 : vector<1x1x32x32xf32> to vector<32x32xf32>
    %135 = vector.shape_cast %132 : vector<32x32xf32> to vector<1x1x32x32xf32>
    tpu.vector_store %arg11[%c0_86, %c3, %c0_87, %c0_88], %135 {strides = array<i32>} : memref<1x11x32x32xf32, #tpu.memory_space<vmem>>, vector<1x1x32x32xf32>,
    %cst_89 = arith.constant dense<0xFF800000> : vector<32xf32>
    %136 = vector.multi_reduction <maximumf>, %125, %cst_89 [1] : vector<32x32xf32> to vector<32xf32>
    %137 = vector.shape_cast %136 : vector<32xf32> to vector<32x1xf32>
    %cst_90 = arith.constant dense<0xFF800000> : vector<1xf32>
    %138 = vector.multi_reduction <maximumf>, %137, %cst_90 [0] : vector<32x1xf32> to vector<1xf32>
    %139 = vector.shape_cast %138 : vector<1xf32> to vector<1x1xf32>
    %140 = vector.broadcast %139 : vector<1x1xf32> to vector<32x32xf32>
    %141 = arith.cmpf oge, %125, %140 : vector<32x32xf32>
    %c1024_i32_91 = arith.constant 1024 : i32
    %142 = vector.broadcast %c1024_i32_91 : i32 to vector<32x32xi32>
    %143 = arith.select %141, %34, %142 : vector<32x32xi1>, vector<32x32xi32>
    %cst_92 = arith.constant dense<2147483647> : vector<32xi32>
    %144 = vector.multi_reduction <minsi>, %143, %cst_92 [1] : vector<32x32xi32> to vector<32xi32>
    %145 = vector.shape_cast %144 : vector<32xi32> to vector<32x1xi32>
    %cst_93 = arith.constant dense<2147483647> : vector<1xi32>
    %146 = vector.multi_reduction <minsi>, %145, %cst_93 [0] : vector<32x1xi32> to vector<1xi32>
    %147 = vector.shape_cast %146 : vector<1xi32> to vector<1x1xi32>
    %c0_94 = arith.constant 0 : index
    %c3_95 = arith.constant 3 : index
    %c0_96 = arith.constant 0 : index
    %c0_97 = arith.constant 0 : index
    %148 = vector.load %arg12[%c0_94, %c3_95, %c0_96, %c0_97] : memref<1x11x1x1xi32, #tpu.memory_space<vmem>>, vector<1x1x1x1xi32>
    %149 = vector.shape_cast %148 : vector<1x1x1x1xi32> to vector<1x1xi32>
    %150 = vector.shape_cast %147 : vector<1x1xi32> to vector<1x1x1x1xi32>
    tpu.vector_store %arg12[%c0_94, %c3_95, %c0_96, %c0_97], %150 {strides = array<i32>} : memref<1x11x1x1xi32, #tpu.memory_space<vmem>>, vector<1x1x1x1xi32>,
    %151 = vector.extract_strided_slice %29 {offsets = [32, 0], sizes = [8, 32], strides = [1, 1]} : vector<88x32xf32> to vector<8x32xf32>
    %c0_98 = arith.constant 0 : index
    %c0_99 = arith.constant 0 : index
    %152 = vector.load %arg10[%c0_98, %c0_99] : memref<32x8xbf16, #tpu.memory_space<vmem>>, vector<32x8xbf16>
    %153 = arith.truncf %151 : vector<8x32xf32> to vector<8x32xbf16>
    %cst_100 = arith.constant dense<0.000000e+00> : vector<32x32xf32>
    %154 = tpu.matmul %152, %153, %cst_100 {dimension_numbers = #tpu.dot_dimension_numbers<[1], [0], [0], [1], [0, 0, 1, 1], [], []>} : vector<32x8xbf16>, vector<8x32xbf16>, vector<32x32xf32> -> vector<32x32xf32>
    %cst_101 = arith.constant 5.000000e-01 : f32
    %155 = vector.broadcast %cst_101 : f32 to vector<32x32xf32>
    %156 = arith.mulf %155, %154 : vector<32x32xf32>
    %157 = math.tanh %156 : vector<32x32xf32>
    %cst_102 = arith.constant 5.000000e-01 : f32
    %158 = vector.broadcast %cst_102 : f32 to vector<32x32xf32>
    %159 = arith.mulf %158, %157 : vector<32x32xf32>
    %cst_103 = arith.constant 5.000000e-01 : f32
    %160 = vector.broadcast %cst_103 : f32 to vector<32x32xf32>
    %161 = arith.addf %159, %160 : vector<32x32xf32>
    %c0_104 = arith.constant 0 : index
    %c4 = arith.constant 4 : index
    %c0_105 = arith.constant 0 : index
    %c0_106 = arith.constant 0 : index
    %162 = vector.load %arg11[%c0_104, %c4, %c0_105, %c0_106] : memref<1x11x32x32xf32, #tpu.memory_space<vmem>>, vector<1x1x32x32xf32>
    %163 = vector.shape_cast %162 : vector<1x1x32x32xf32> to vector<32x32xf32>
    %164 = vector.shape_cast %161 : vector<32x32xf32> to vector<1x1x32x32xf32>
    tpu.vector_store %arg11[%c0_104, %c4, %c0_105, %c0_106], %164 {strides = array<i32>} : memref<1x11x32x32xf32, #tpu.memory_space<vmem>>, vector<1x1x32x32xf32>,
    %cst_107 = arith.constant dense<0xFF800000> : vector<32xf32>
    %165 = vector.multi_reduction <maximumf>, %154, %cst_107 [1] : vector<32x32xf32> to vector<32xf32>
    %166 = vector.shape_cast %165 : vector<32xf32> to vector<32x1xf32>
    %cst_108 = arith.constant dense<0xFF800000> : vector<1xf32>
    %167 = vector.multi_reduction <maximumf>, %166, %cst_108 [0] : vector<32x1xf32> to vector<1xf32>
    %168 = vector.shape_cast %167 : vector<1xf32> to vector<1x1xf32>
    %169 = vector.broadcast %168 : vector<1x1xf32> to vector<32x32xf32>
    %170 = arith.cmpf oge, %154, %169 : vector<32x32xf32>
    %c1024_i32_109 = arith.constant 1024 : i32
    %171 = vector.broadcast %c1024_i32_109 : i32 to vector<32x32xi32>
    %172 = arith.select %170, %34, %171 : vector<32x32xi1>, vector<32x32xi32>
    %cst_110 = arith.constant dense<2147483647> : vector<32xi32>
    %173 = vector.multi_reduction <minsi>, %172, %cst_110 [1] : vector<32x32xi32> to vector<32xi32>
    %174 = vector.shape_cast %173 : vector<32xi32> to vector<32x1xi32>
    %cst_111 = arith.constant dense<2147483647> : vector<1xi32>
    %175 = vector.multi_reduction <minsi>, %174, %cst_111 [0] : vector<32x1xi32> to vector<1xi32>
    %176 = vector.shape_cast %175 : vector<1xi32> to vector<1x1xi32>
    %c0_112 = arith.constant 0 : index
    %c4_113 = arith.constant 4 : index
    %c0_114 = arith.constant 0 : index
    %c0_115 = arith.constant 0 : index
    %177 = vector.load %arg12[%c0_112, %c4_113, %c0_114, %c0_115] : memref<1x11x1x1xi32, #tpu.memory_space<vmem>>, vector<1x1x1x1xi32>
    %178 = vector.shape_cast %177 : vector<1x1x1x1xi32> to vector<1x1xi32>
    %179 = vector.shape_cast %176 : vector<1x1xi32> to vector<1x1x1x1xi32>
    tpu.vector_store %arg12[%c0_112, %c4_113, %c0_114, %c0_115], %179 {strides = array<i32>} : memref<1x11x1x1xi32, #tpu.memory_space<vmem>>, vector<1x1x1x1xi32>,
    %180 = vector.extract_strided_slice %29 {offsets = [40, 0], sizes = [8, 32], strides = [1, 1]} : vector<88x32xf32> to vector<8x32xf32>
    %c0_116 = arith.constant 0 : index
    %c0_117 = arith.constant 0 : index
    %181 = vector.load %arg10[%c0_116, %c0_117] : memref<32x8xbf16, #tpu.memory_space<vmem>>, vector<32x8xbf16>
    %182 = arith.truncf %180 : vector<8x32xf32> to vector<8x32xbf16>
    %cst_118 = arith.constant dense<0.000000e+00> : vector<32x32xf32>
    %183 = tpu.matmul %181, %182, %cst_118 {dimension_numbers = #tpu.dot_dimension_numbers<[1], [0], [0], [1], [0, 0, 1, 1], [], []>} : vector<32x8xbf16>, vector<8x32xbf16>, vector<32x32xf32> -> vector<32x32xf32>
    %cst_119 = arith.constant 5.000000e-01 : f32
    %184 = vector.broadcast %cst_119 : f32 to vector<32x32xf32>
    %185 = arith.mulf %184, %183 : vector<32x32xf32>
    %186 = math.tanh %185 : vector<32x32xf32>
    %cst_120 = arith.constant 5.000000e-01 : f32
    %187 = vector.broadcast %cst_120 : f32 to vector<32x32xf32>
    %188 = arith.mulf %187, %186 : vector<32x32xf32>
    %cst_121 = arith.constant 5.000000e-01 : f32
    %189 = vector.broadcast %cst_121 : f32 to vector<32x32xf32>
    %190 = arith.addf %188, %189 : vector<32x32xf32>
    %c0_122 = arith.constant 0 : index
    %c5 = arith.constant 5 : index
    %c0_123 = arith.constant 0 : index
    %c0_124 = arith.constant 0 : index
    %191 = vector.load %arg11[%c0_122, %c5, %c0_123, %c0_124] : memref<1x11x32x32xf32, #tpu.memory_space<vmem>>, vector<1x1x32x32xf32>
    %192 = vector.shape_cast %191 : vector<1x1x32x32xf32> to vector<32x32xf32>
    %193 = vector.shape_cast %190 : vector<32x32xf32> to vector<1x1x32x32xf32>
    tpu.vector_store %arg11[%c0_122, %c5, %c0_123, %c0_124], %193 {strides = array<i32>} : memref<1x11x32x32xf32, #tpu.memory_space<vmem>>, vector<1x1x32x32xf32>,
    %cst_125 = arith.constant dense<0xFF800000> : vector<32xf32>
    %194 = vector.multi_reduction <maximumf>, %183, %cst_125 [1] : vector<32x32xf32> to vector<32xf32>
    %195 = vector.shape_cast %194 : vector<32xf32> to vector<32x1xf32>
    %cst_126 = arith.constant dense<0xFF800000> : vector<1xf32>
    %196 = vector.multi_reduction <maximumf>, %195, %cst_126 [0] : vector<32x1xf32> to vector<1xf32>
    %197 = vector.shape_cast %196 : vector<1xf32> to vector<1x1xf32>
    %198 = vector.broadcast %197 : vector<1x1xf32> to vector<32x32xf32>
    %199 = arith.cmpf oge, %183, %198 : vector<32x32xf32>
    %c1024_i32_127 = arith.constant 1024 : i32
    %200 = vector.broadcast %c1024_i32_127 : i32 to vector<32x32xi32>
    %201 = arith.select %199, %34, %200 : vector<32x32xi1>, vector<32x32xi32>
    %cst_128 = arith.constant dense<2147483647> : vector<32xi32>
    %202 = vector.multi_reduction <minsi>, %201, %cst_128 [1] : vector<32x32xi32> to vector<32xi32>
    %203 = vector.shape_cast %202 : vector<32xi32> to vector<32x1xi32>
    %cst_129 = arith.constant dense<2147483647> : vector<1xi32>
    %204 = vector.multi_reduction <minsi>, %203, %cst_129 [0] : vector<32x1xi32> to vector<1xi32>
    %205 = vector.shape_cast %204 : vector<1xi32> to vector<1x1xi32>
    %c0_130 = arith.constant 0 : index
    %c5_131 = arith.constant 5 : index
    %c0_132 = arith.constant 0 : index
    %c0_133 = arith.constant 0 : index
    %206 = vector.load %arg12[%c0_130, %c5_131, %c0_132, %c0_133] : memref<1x11x1x1xi32, #tpu.memory_space<vmem>>, vector<1x1x1x1xi32>
    %207 = vector.shape_cast %206 : vector<1x1x1x1xi32> to vector<1x1xi32>
    %208 = vector.shape_cast %205 : vector<1x1xi32> to vector<1x1x1x1xi32>
    tpu.vector_store %arg12[%c0_130, %c5_131, %c0_132, %c0_133], %208 {strides = array<i32>} : memref<1x11x1x1xi32, #tpu.memory_space<vmem>>, vector<1x1x1x1xi32>,
    %209 = vector.extract_strided_slice %29 {offsets = [48, 0], sizes = [8, 32], strides = [1, 1]} : vector<88x32xf32> to vector<8x32xf32>
    %c0_134 = arith.constant 0 : index
    %c0_135 = arith.constant 0 : index
    %210 = vector.load %arg10[%c0_134, %c0_135] : memref<32x8xbf16, #tpu.memory_space<vmem>>, vector<32x8xbf16>
    %211 = arith.truncf %209 : vector<8x32xf32> to vector<8x32xbf16>
    %cst_136 = arith.constant dense<0.000000e+00> : vector<32x32xf32>
    %212 = tpu.matmul %210, %211, %cst_136 {dimension_numbers = #tpu.dot_dimension_numbers<[1], [0], [0], [1], [0, 0, 1, 1], [], []>} : vector<32x8xbf16>, vector<8x32xbf16>, vector<32x32xf32> -> vector<32x32xf32>
    %cst_137 = arith.constant 5.000000e-01 : f32
    %213 = vector.broadcast %cst_137 : f32 to vector<32x32xf32>
    %214 = arith.mulf %213, %212 : vector<32x32xf32>
    %215 = math.tanh %214 : vector<32x32xf32>
    %cst_138 = arith.constant 5.000000e-01 : f32
    %216 = vector.broadcast %cst_138 : f32 to vector<32x32xf32>
    %217 = arith.mulf %216, %215 : vector<32x32xf32>
    %cst_139 = arith.constant 5.000000e-01 : f32
    %218 = vector.broadcast %cst_139 : f32 to vector<32x32xf32>
    %219 = arith.addf %217, %218 : vector<32x32xf32>
    %c0_140 = arith.constant 0 : index
    %c6 = arith.constant 6 : index
    %c0_141 = arith.constant 0 : index
    %c0_142 = arith.constant 0 : index
    %220 = vector.load %arg11[%c0_140, %c6, %c0_141, %c0_142] : memref<1x11x32x32xf32, #tpu.memory_space<vmem>>, vector<1x1x32x32xf32>
    %221 = vector.shape_cast %220 : vector<1x1x32x32xf32> to vector<32x32xf32>
    %222 = vector.shape_cast %219 : vector<32x32xf32> to vector<1x1x32x32xf32>
    tpu.vector_store %arg11[%c0_140, %c6, %c0_141, %c0_142], %222 {strides = array<i32>} : memref<1x11x32x32xf32, #tpu.memory_space<vmem>>, vector<1x1x32x32xf32>,
    %cst_143 = arith.constant dense<0xFF800000> : vector<32xf32>
    %223 = vector.multi_reduction <maximumf>, %212, %cst_143 [1] : vector<32x32xf32> to vector<32xf32>
    %224 = vector.shape_cast %223 : vector<32xf32> to vector<32x1xf32>
    %cst_144 = arith.constant dense<0xFF800000> : vector<1xf32>
    %225 = vector.multi_reduction <maximumf>, %224, %cst_144 [0] : vector<32x1xf32> to vector<1xf32>
    %226 = vector.shape_cast %225 : vector<1xf32> to vector<1x1xf32>
    %227 = vector.broadcast %226 : vector<1x1xf32> to vector<32x32xf32>
    %228 = arith.cmpf oge, %212, %227 : vector<32x32xf32>
    %c1024_i32_145 = arith.constant 1024 : i32
    %229 = vector.broadcast %c1024_i32_145 : i32 to vector<32x32xi32>
    %230 = arith.select %228, %34, %229 : vector<32x32xi1>, vector<32x32xi32>
    %cst_146 = arith.constant dense<2147483647> : vector<32xi32>
    %231 = vector.multi_reduction <minsi>, %230, %cst_146 [1] : vector<32x32xi32> to vector<32xi32>
    %232 = vector.shape_cast %231 : vector<32xi32> to vector<32x1xi32>
    %cst_147 = arith.constant dense<2147483647> : vector<1xi32>
    %233 = vector.multi_reduction <minsi>, %232, %cst_147 [0] : vector<32x1xi32> to vector<1xi32>
    %234 = vector.shape_cast %233 : vector<1xi32> to vector<1x1xi32>
    %c0_148 = arith.constant 0 : index
    %c6_149 = arith.constant 6 : index
    %c0_150 = arith.constant 0 : index
    %c0_151 = arith.constant 0 : index
    %235 = vector.load %arg12[%c0_148, %c6_149, %c0_150, %c0_151] : memref<1x11x1x1xi32, #tpu.memory_space<vmem>>, vector<1x1x1x1xi32>
    %236 = vector.shape_cast %235 : vector<1x1x1x1xi32> to vector<1x1xi32>
    %237 = vector.shape_cast %234 : vector<1x1xi32> to vector<1x1x1x1xi32>
    tpu.vector_store %arg12[%c0_148, %c6_149, %c0_150, %c0_151], %237 {strides = array<i32>} : memref<1x11x1x1xi32, #tpu.memory_space<vmem>>, vector<1x1x1x1xi32>,
    %238 = vector.extract_strided_slice %29 {offsets = [56, 0], sizes = [8, 32], strides = [1, 1]} : vector<88x32xf32> to vector<8x32xf32>
    %c0_152 = arith.constant 0 : index
    %c0_153 = arith.constant 0 : index
    %239 = vector.load %arg10[%c0_152, %c0_153] : memref<32x8xbf16, #tpu.memory_space<vmem>>, vector<32x8xbf16>
    %240 = arith.truncf %238 : vector<8x32xf32> to vector<8x32xbf16>
    %cst_154 = arith.constant dense<0.000000e+00> : vector<32x32xf32>
    %241 = tpu.matmul %239, %240, %cst_154 {dimension_numbers = #tpu.dot_dimension_numbers<[1], [0], [0], [1], [0, 0, 1, 1], [], []>} : vector<32x8xbf16>, vector<8x32xbf16>, vector<32x32xf32> -> vector<32x32xf32>
    %cst_155 = arith.constant 5.000000e-01 : f32
    %242 = vector.broadcast %cst_155 : f32 to vector<32x32xf32>
    %243 = arith.mulf %242, %241 : vector<32x32xf32>
    %244 = math.tanh %243 : vector<32x32xf32>
    %cst_156 = arith.constant 5.000000e-01 : f32
    %245 = vector.broadcast %cst_156 : f32 to vector<32x32xf32>
    %246 = arith.mulf %245, %244 : vector<32x32xf32>
    %cst_157 = arith.constant 5.000000e-01 : f32
    %247 = vector.broadcast %cst_157 : f32 to vector<32x32xf32>
    %248 = arith.addf %246, %247 : vector<32x32xf32>
    %c0_158 = arith.constant 0 : index
    %c7 = arith.constant 7 : index
    %c0_159 = arith.constant 0 : index
    %c0_160 = arith.constant 0 : index
    %249 = vector.load %arg11[%c0_158, %c7, %c0_159, %c0_160] : memref<1x11x32x32xf32, #tpu.memory_space<vmem>>, vector<1x1x32x32xf32>
    %250 = vector.shape_cast %249 : vector<1x1x32x32xf32> to vector<32x32xf32>
    %251 = vector.shape_cast %248 : vector<32x32xf32> to vector<1x1x32x32xf32>
    tpu.vector_store %arg11[%c0_158, %c7, %c0_159, %c0_160], %251 {strides = array<i32>} : memref<1x11x32x32xf32, #tpu.memory_space<vmem>>, vector<1x1x32x32xf32>,
    %cst_161 = arith.constant dense<0xFF800000> : vector<32xf32>
    %252 = vector.multi_reduction <maximumf>, %241, %cst_161 [1] : vector<32x32xf32> to vector<32xf32>
    %253 = vector.shape_cast %252 : vector<32xf32> to vector<32x1xf32>
    %cst_162 = arith.constant dense<0xFF800000> : vector<1xf32>
    %254 = vector.multi_reduction <maximumf>, %253, %cst_162 [0] : vector<32x1xf32> to vector<1xf32>
    %255 = vector.shape_cast %254 : vector<1xf32> to vector<1x1xf32>
    %256 = vector.broadcast %255 : vector<1x1xf32> to vector<32x32xf32>
    %257 = arith.cmpf oge, %241, %256 : vector<32x32xf32>
    %c1024_i32_163 = arith.constant 1024 : i32
    %258 = vector.broadcast %c1024_i32_163 : i32 to vector<32x32xi32>
    %259 = arith.select %257, %34, %258 : vector<32x32xi1>, vector<32x32xi32>
    %cst_164 = arith.constant dense<2147483647> : vector<32xi32>
    %260 = vector.multi_reduction <minsi>, %259, %cst_164 [1] : vector<32x32xi32> to vector<32xi32>
    %261 = vector.shape_cast %260 : vector<32xi32> to vector<32x1xi32>
    %cst_165 = arith.constant dense<2147483647> : vector<1xi32>
    %262 = vector.multi_reduction <minsi>, %261, %cst_165 [0] : vector<32x1xi32> to vector<1xi32>
    %263 = vector.shape_cast %262 : vector<1xi32> to vector<1x1xi32>
    %c0_166 = arith.constant 0 : index
    %c7_167 = arith.constant 7 : index
    %c0_168 = arith.constant 0 : index
    %c0_169 = arith.constant 0 : index
    %264 = vector.load %arg12[%c0_166, %c7_167, %c0_168, %c0_169] : memref<1x11x1x1xi32, #tpu.memory_space<vmem>>, vector<1x1x1x1xi32>
    %265 = vector.shape_cast %264 : vector<1x1x1x1xi32> to vector<1x1xi32>
    %266 = vector.shape_cast %263 : vector<1x1xi32> to vector<1x1x1x1xi32>
    tpu.vector_store %arg12[%c0_166, %c7_167, %c0_168, %c0_169], %266 {strides = array<i32>} : memref<1x11x1x1xi32, #tpu.memory_space<vmem>>, vector<1x1x1x1xi32>,
    %267 = vector.extract_strided_slice %29 {offsets = [64, 0], sizes = [8, 32], strides = [1, 1]} : vector<88x32xf32> to vector<8x32xf32>
    %c0_170 = arith.constant 0 : index
    %c0_171 = arith.constant 0 : index
    %268 = vector.load %arg10[%c0_170, %c0_171] : memref<32x8xbf16, #tpu.memory_space<vmem>>, vector<32x8xbf16>
    %269 = arith.truncf %267 : vector<8x32xf32> to vector<8x32xbf16>
    %cst_172 = arith.constant dense<0.000000e+00> : vector<32x32xf32>
    %270 = tpu.matmul %268, %269, %cst_172 {dimension_numbers = #tpu.dot_dimension_numbers<[1], [0], [0], [1], [0, 0, 1, 1], [], []>} : vector<32x8xbf16>, vector<8x32xbf16>, vector<32x32xf32> -> vector<32x32xf32>
    %cst_173 = arith.constant 5.000000e-01 : f32
    %271 = vector.broadcast %cst_173 : f32 to vector<32x32xf32>
    %272 = arith.mulf %271, %270 : vector<32x32xf32>
    %273 = math.tanh %272 : vector<32x32xf32>
    %cst_174 = arith.constant 5.000000e-01 : f32
    %274 = vector.broadcast %cst_174 : f32 to vector<32x32xf32>
    %275 = arith.mulf %274, %273 : vector<32x32xf32>
    %cst_175 = arith.constant 5.000000e-01 : f32
    %276 = vector.broadcast %cst_175 : f32 to vector<32x32xf32>
    %277 = arith.addf %275, %276 : vector<32x32xf32>
    %c0_176 = arith.constant 0 : index
    %c8 = arith.constant 8 : index
    %c0_177 = arith.constant 0 : index
    %c0_178 = arith.constant 0 : index
    %278 = vector.load %arg11[%c0_176, %c8, %c0_177, %c0_178] : memref<1x11x32x32xf32, #tpu.memory_space<vmem>>, vector<1x1x32x32xf32>
    %279 = vector.shape_cast %278 : vector<1x1x32x32xf32> to vector<32x32xf32>
    %280 = vector.shape_cast %277 : vector<32x32xf32> to vector<1x1x32x32xf32>
    tpu.vector_store %arg11[%c0_176, %c8, %c0_177, %c0_178], %280 {strides = array<i32>} : memref<1x11x32x32xf32, #tpu.memory_space<vmem>>, vector<1x1x32x32xf32>,
    %cst_179 = arith.constant dense<0xFF800000> : vector<32xf32>
    %281 = vector.multi_reduction <maximumf>, %270, %cst_179 [1] : vector<32x32xf32> to vector<32xf32>
    %282 = vector.shape_cast %281 : vector<32xf32> to vector<32x1xf32>
    %cst_180 = arith.constant dense<0xFF800000> : vector<1xf32>
    %283 = vector.multi_reduction <maximumf>, %282, %cst_180 [0] : vector<32x1xf32> to vector<1xf32>
    %284 = vector.shape_cast %283 : vector<1xf32> to vector<1x1xf32>
    %285 = vector.broadcast %284 : vector<1x1xf32> to vector<32x32xf32>
    %286 = arith.cmpf oge, %270, %285 : vector<32x32xf32>
    %c1024_i32_181 = arith.constant 1024 : i32
    %287 = vector.broadcast %c1024_i32_181 : i32 to vector<32x32xi32>
    %288 = arith.select %286, %34, %287 : vector<32x32xi1>, vector<32x32xi32>
    %cst_182 = arith.constant dense<2147483647> : vector<32xi32>
    %289 = vector.multi_reduction <minsi>, %288, %cst_182 [1] : vector<32x32xi32> to vector<32xi32>
    %290 = vector.shape_cast %289 : vector<32xi32> to vector<32x1xi32>
    %cst_183 = arith.constant dense<2147483647> : vector<1xi32>
    %291 = vector.multi_reduction <minsi>, %290, %cst_183 [0] : vector<32x1xi32> to vector<1xi32>
    %292 = vector.shape_cast %291 : vector<1xi32> to vector<1x1xi32>
    %c0_184 = arith.constant 0 : index
    %c8_185 = arith.constant 8 : index
    %c0_186 = arith.constant 0 : index
    %c0_187 = arith.constant 0 : index
    %293 = vector.load %arg12[%c0_184, %c8_185, %c0_186, %c0_187] : memref<1x11x1x1xi32, #tpu.memory_space<vmem>>, vector<1x1x1x1xi32>
    %294 = vector.shape_cast %293 : vector<1x1x1x1xi32> to vector<1x1xi32>
    %295 = vector.shape_cast %292 : vector<1x1xi32> to vector<1x1x1x1xi32>
    tpu.vector_store %arg12[%c0_184, %c8_185, %c0_186, %c0_187], %295 {strides = array<i32>} : memref<1x11x1x1xi32, #tpu.memory_space<vmem>>, vector<1x1x1x1xi32>,
    %296 = vector.extract_strided_slice %29 {offsets = [72, 0], sizes = [8, 32], strides = [1, 1]} : vector<88x32xf32> to vector<8x32xf32>
    %c0_188 = arith.constant 0 : index
    %c0_189 = arith.constant 0 : index
    %297 = vector.load %arg10[%c0_188, %c0_189] : memref<32x8xbf16, #tpu.memory_space<vmem>>, vector<32x8xbf16>
    %298 = arith.truncf %296 : vector<8x32xf32> to vector<8x32xbf16>
    %cst_190 = arith.constant dense<0.000000e+00> : vector<32x32xf32>
    %299 = tpu.matmul %297, %298, %cst_190 {dimension_numbers = #tpu.dot_dimension_numbers<[1], [0], [0], [1], [0, 0, 1, 1], [], []>} : vector<32x8xbf16>, vector<8x32xbf16>, vector<32x32xf32> -> vector<32x32xf32>
    %cst_191 = arith.constant 5.000000e-01 : f32
    %300 = vector.broadcast %cst_191 : f32 to vector<32x32xf32>
    %301 = arith.mulf %300, %299 : vector<32x32xf32>
    %302 = math.tanh %301 : vector<32x32xf32>
    %cst_192 = arith.constant 5.000000e-01 : f32
    %303 = vector.broadcast %cst_192 : f32 to vector<32x32xf32>
    %304 = arith.mulf %303, %302 : vector<32x32xf32>
    %cst_193 = arith.constant 5.000000e-01 : f32
    %305 = vector.broadcast %cst_193 : f32 to vector<32x32xf32>
    %306 = arith.addf %304, %305 : vector<32x32xf32>
    %c0_194 = arith.constant 0 : index
    %c9 = arith.constant 9 : index
    %c0_195 = arith.constant 0 : index
    %c0_196 = arith.constant 0 : index
    %307 = vector.load %arg11[%c0_194, %c9, %c0_195, %c0_196] : memref<1x11x32x32xf32, #tpu.memory_space<vmem>>, vector<1x1x32x32xf32>
    %308 = vector.shape_cast %307 : vector<1x1x32x32xf32> to vector<32x32xf32>
    %309 = vector.shape_cast %306 : vector<32x32xf32> to vector<1x1x32x32xf32>
    tpu.vector_store %arg11[%c0_194, %c9, %c0_195, %c0_196], %309 {strides = array<i32>} : memref<1x11x32x32xf32, #tpu.memory_space<vmem>>, vector<1x1x32x32xf32>,
    %cst_197 = arith.constant dense<0xFF800000> : vector<32xf32>
    %310 = vector.multi_reduction <maximumf>, %299, %cst_197 [1] : vector<32x32xf32> to vector<32xf32>
    %311 = vector.shape_cast %310 : vector<32xf32> to vector<32x1xf32>
    %cst_198 = arith.constant dense<0xFF800000> : vector<1xf32>
    %312 = vector.multi_reduction <maximumf>, %311, %cst_198 [0] : vector<32x1xf32> to vector<1xf32>
    %313 = vector.shape_cast %312 : vector<1xf32> to vector<1x1xf32>
    %314 = vector.broadcast %313 : vector<1x1xf32> to vector<32x32xf32>
    %315 = arith.cmpf oge, %299, %314 : vector<32x32xf32>
    %c1024_i32_199 = arith.constant 1024 : i32
    %316 = vector.broadcast %c1024_i32_199 : i32 to vector<32x32xi32>
    %317 = arith.select %315, %34, %316 : vector<32x32xi1>, vector<32x32xi32>
    %cst_200 = arith.constant dense<2147483647> : vector<32xi32>
    %318 = vector.multi_reduction <minsi>, %317, %cst_200 [1] : vector<32x32xi32> to vector<32xi32>
    %319 = vector.shape_cast %318 : vector<32xi32> to vector<32x1xi32>
    %cst_201 = arith.constant dense<2147483647> : vector<1xi32>
    %320 = vector.multi_reduction <minsi>, %319, %cst_201 [0] : vector<32x1xi32> to vector<1xi32>
    %321 = vector.shape_cast %320 : vector<1xi32> to vector<1x1xi32>
    %c0_202 = arith.constant 0 : index
    %c9_203 = arith.constant 9 : index
    %c0_204 = arith.constant 0 : index
    %c0_205 = arith.constant 0 : index
    %322 = vector.load %arg12[%c0_202, %c9_203, %c0_204, %c0_205] : memref<1x11x1x1xi32, #tpu.memory_space<vmem>>, vector<1x1x1x1xi32>
    %323 = vector.shape_cast %322 : vector<1x1x1x1xi32> to vector<1x1xi32>
    %324 = vector.shape_cast %321 : vector<1x1xi32> to vector<1x1x1x1xi32>
    tpu.vector_store %arg12[%c0_202, %c9_203, %c0_204, %c0_205], %324 {strides = array<i32>} : memref<1x11x1x1xi32, #tpu.memory_space<vmem>>, vector<1x1x1x1xi32>,
    %325 = vector.extract_strided_slice %29 {offsets = [80, 0], sizes = [8, 32], strides = [1, 1]} : vector<88x32xf32> to vector<8x32xf32>
    %c0_206 = arith.constant 0 : index
    %c0_207 = arith.constant 0 : index
    %326 = vector.load %arg10[%c0_206, %c0_207] : memref<32x8xbf16, #tpu.memory_space<vmem>>, vector<32x8xbf16>
    %327 = arith.truncf %325 : vector<8x32xf32> to vector<8x32xbf16>
    %cst_208 = arith.constant dense<0.000000e+00> : vector<32x32xf32>
    %328 = tpu.matmul %326, %327, %cst_208 {dimension_numbers = #tpu.dot_dimension_numbers<[1], [0], [0], [1], [0, 0, 1, 1], [], []>} : vector<32x8xbf16>, vector<8x32xbf16>, vector<32x32xf32> -> vector<32x32xf32>
    %cst_209 = arith.constant 5.000000e-01 : f32
    %329 = vector.broadcast %cst_209 : f32 to vector<32x32xf32>
    %330 = arith.mulf %329, %328 : vector<32x32xf32>
    %331 = math.tanh %330 : vector<32x32xf32>
    %cst_210 = arith.constant 5.000000e-01 : f32
    %332 = vector.broadcast %cst_210 : f32 to vector<32x32xf32>
    %333 = arith.mulf %332, %331 : vector<32x32xf32>
    %cst_211 = arith.constant 5.000000e-01 : f32
    %334 = vector.broadcast %cst_211 : f32 to vector<32x32xf32>
    %335 = arith.addf %333, %334 : vector<32x32xf32>
    %c0_212 = arith.constant 0 : index
    %c10 = arith.constant 10 : index
    %c0_213 = arith.constant 0 : index
    %c0_214 = arith.constant 0 : index
    %336 = vector.load %arg11[%c0_212, %c10, %c0_213, %c0_214] : memref<1x11x32x32xf32, #tpu.memory_space<vmem>>, vector<1x1x32x32xf32>
    %337 = vector.shape_cast %336 : vector<1x1x32x32xf32> to vector<32x32xf32>
    %338 = vector.shape_cast %335 : vector<32x32xf32> to vector<1x1x32x32xf32>
    tpu.vector_store %arg11[%c0_212, %c10, %c0_213, %c0_214], %338 {strides = array<i32>} : memref<1x11x32x32xf32, #tpu.memory_space<vmem>>, vector<1x1x32x32xf32>,
    %cst_215 = arith.constant dense<0xFF800000> : vector<32xf32>
    %339 = vector.multi_reduction <maximumf>, %328, %cst_215 [1] : vector<32x32xf32> to vector<32xf32>
    %340 = vector.shape_cast %339 : vector<32xf32> to vector<32x1xf32>
    %cst_216 = arith.constant dense<0xFF800000> : vector<1xf32>
    %341 = vector.multi_reduction <maximumf>, %340, %cst_216 [0] : vector<32x1xf32> to vector<1xf32>
    %342 = vector.shape_cast %341 : vector<1xf32> to vector<1x1xf32>
    %343 = vector.broadcast %342 : vector<1x1xf32> to vector<32x32xf32>
    %344 = arith.cmpf oge, %328, %343 : vector<32x32xf32>
    %c1024_i32_217 = arith.constant 1024 : i32
    %345 = vector.broadcast %c1024_i32_217 : i32 to vector<32x32xi32>
    %346 = arith.select %344, %34, %345 : vector<32x32xi1>, vector<32x32xi32>
    %cst_218 = arith.constant dense<2147483647> : vector<32xi32>
    %347 = vector.multi_reduction <minsi>, %346, %cst_218 [1] : vector<32x32xi32> to vector<32xi32>
    %348 = vector.shape_cast %347 : vector<32xi32> to vector<32x1xi32>
    %cst_219 = arith.constant dense<2147483647> : vector<1xi32>
    %349 = vector.multi_reduction <minsi>, %348, %cst_219 [0] : vector<32x1xi32> to vector<1xi32>
    %350 = vector.shape_cast %349 : vector<1xi32> to vector<1x1xi32>
    %c0_220 = arith.constant 0 : index
    %c10_221 = arith.constant 10 : index
    %c0_222 = arith.constant 0 : index
    %c0_223 = arith.constant 0 : index
    %351 = vector.load %arg12[%c0_220, %c10_221, %c0_222, %c0_223] : memref<1x11x1x1xi32, #tpu.memory_space<vmem>>, vector<1x1x1x1xi32>
    %352 = vector.shape_cast %351 : vector<1x1x1x1xi32> to vector<1x1xi32>
    %353 = vector.shape_cast %350 : vector<1x1xi32> to vector<1x1x1x1xi32>
    tpu.vector_store %arg12[%c0_220, %c10_221, %c0_222, %c0_223], %353 {strides = array<i32>} : memref<1x11x1x1xi32, #tpu.memory_space<vmem>>, vector<1x1x1x1xi32>,
    return
  }
  func.func @transform_0(%arg0: i32) -> (i32, i32, i32) {
    %c0_i32 = arith.constant 0 : i32
    %c0_i32_0 = arith.constant 0 : i32
    %c0_i32_1 = arith.constant 0 : i32
    return %arg0, %c0_i32, %c0_i32_0 : i32, i32, i32
  }
  func.func @transform_1(%arg0: i32) -> (i32, i32) {
    %c0_i32 = arith.constant 0 : i32
    %c0_i32_0 = arith.constant 0 : i32
    %c0_i32_1 = arith.constant 0 : i32
    return %c0_i32, %c0_i32_0 : i32, i32
  }
  func.func @transform_2(%arg0: i32) -> (i32, i32) {
    %c0_i32 = arith.constant 0 : i32
    %c0_i32_0 = arith.constant 0 : i32
    %c0_i32_1 = arith.constant 0 : i32
    return %c0_i32, %c0_i32_0 : i32, i32
  }
  func.func @transform_3(%arg0: i32) -> (i32, i32) {
    %c0_i32 = arith.constant 0 : i32
    %c0_i32_0 = arith.constant 0 : i32
    %c0_i32_1 = arith.constant 0 : i32
    return %c0_i32, %c0_i32_0 : i32, i32
  }
  func.func @transform_4(%arg0: i32) -> (i32, i32) {
    %c0_i32 = arith.constant 0 : i32
    %c0_i32_0 = arith.constant 0 : i32
    %c0_i32_1 = arith.constant 0 : i32
    return %c0_i32, %c0_i32_0 : i32, i32
  }
  func.func @transform_5(%arg0: i32) -> (i32, i32) {
    %c0_i32 = arith.constant 0 : i32
    %c0_i32_0 = arith.constant 0 : i32
    %c0_i32_1 = arith.constant 0 : i32
    return %c0_i32, %c0_i32_0 : i32, i32
  }
  func.func @transform_6(%arg0: i32) -> (i32, i32) {
    %c0_i32 = arith.constant 0 : i32
    %c0_i32_0 = arith.constant 0 : i32
    %c0_i32_1 = arith.constant 0 : i32
    return %c0_i32, %c0_i32_0 : i32, i32
  }
  func.func @transform_7(%arg0: i32) -> (i32, i32) {
    %c0_i32 = arith.constant 0 : i32
    %c0_i32_0 = arith.constant 0 : i32
    %c0_i32_1 = arith.constant 0 : i32
    return %c0_i32, %c0_i32_0 : i32, i32
  }
  func.func @transform_8(%arg0: i32) -> (i32, i32) {
    %c0_i32 = arith.constant 0 : i32
    %c0_i32_0 = arith.constant 0 : i32
    %c0_i32_1 = arith.constant 0 : i32
    return %c0_i32, %c0_i32_0 : i32, i32
  }
  func.func @transform_9(%arg0: i32) -> (i32, i32) {
    %c0_i32 = arith.constant 0 : i32
    %c0_i32_0 = arith.constant 0 : i32
    %c0_i32_1 = arith.constant 0 : i32
    return %c0_i32, %c0_i32_0 : i32, i32
  }
  func.func @transform_10(%arg0: i32) -> (i32, i32, i32, i32) {
    %c0_i32 = arith.constant 0 : i32
    %c0_i32_0 = arith.constant 0 : i32
    %c0_i32_1 = arith.constant 0 : i32
    %c0_i32_2 = arith.constant 0 : i32
    return %arg0, %c0_i32, %c0_i32_0, %c0_i32_1 : i32, i32, i32, i32
  }
  func.func @transform_11(%arg0: i32) -> (i32, i32, i32, i32) {
    %c0_i32 = arith.constant 0 : i32
    %c0_i32_0 = arith.constant 0 : i32
    %c0_i32_1 = arith.constant 0 : i32
    %c0_i32_2 = arith.constant 0 : i32
    return %arg0, %c0_i32, %c0_i32_0, %c0_i32_1 : i32, i32, i32, i32
  }
  func.func @transform_12(%arg0: i32) -> (i32, i32, i32) {
    %c0_i32 = arith.constant 0 : i32
    %c0_i32_0 = arith.constant 0 : i32
    %c0_i32_1 = arith.constant 0 : i32
    return %arg0, %c0_i32, %c0_i32_0 : i32, i32, i32
  }
}

</mosaic_0001>

<bundles_post_ra>
// kernel: tpu_custom_call.1
= control target key start
LH: loop header
LB: loop body
LE: loop exit
PB: predicated region body
PF: predicated region fallthrough
CT: control target
= control target key end

     0   :  { %s6140_s0 = inlined_call_operand.vmem [shape: bf16[2,32,32], index: 0, kind: input, shape index: {}]   ;;  %s6141_s1 = inlined_call_operand.vmem [shape: bf16[8,32], index: 1, kind: input, shape index: {}]   ;;  %s6142_s2 = inlined_call_operand.vmem [shape: bf16[32,8], index: 2, kind: input, shape index: {}]   ;;  %s6143_s3 = inlined_call_operand.vmem [shape: bf16[256,8], index: 3, kind: input, shape index: {}]   ;;  %s6144_s4 = inlined_call_operand.vmem [shape: f32[256,1], index: 4, kind: input, shape index: {}]   ;;  %s6145_s5 = inlined_call_operand.vmem [shape: f32[256,1], index: 5, kind: input, shape index: {}]   ;;  %s6146_s6 = inlined_call_operand.vmem [shape: bf16[88,256], index: 6, kind: input, shape index: {}]   ;;  %s6147_s7 = inlined_call_operand.vmem [shape: f32[88,1], index: 7, kind: input, shape index: {}]   ;;  %s6148_s8 = inlined_call_operand.vmem [shape: bf16[8,32], index: 8, kind: input, shape index: {}]   ;;  %s6149_s9 = inlined_call_operand.vmem [shape: bf16[32,8], index: 9, kind: input, shape index: {}]   ;;  %s6150_s10 = inlined_call_operand.hbm [shape: f32[2,11,32,32], index: 10, kind: output, shape index: {0}]   ;;  %s6151_s11 = inlined_call_operand.vmem [shape: s32[2,11,1,1], index: 11, kind: output, shape index: {1}]   ;;  %s6152_s12 = inlined_call_operand.vmem [shape: f32[2,256,8], index: 12, kind: output, shape index: {2}]  }
   0x1   :  { %6201 = sst [smem:[#allocation46_spill]] %s6140_s0 }
   0x2   :  { %18 = vsyncpa [#allocation3], 0 }
   0x3   :  { %20 = vsyncpa [#allocation3 + $0x1], 0  ;;  %s4225_s21 = smov 0   ;;  %s4227_s22 = smov 0  }
   0x4   :  { %s4229_s23 = smov 0   ;;  %s4231_s24 = smov 0  }
   0x5 LB: > { %6202 = sst [smem:[#allocation5_spill]] %s4151_s23  ;;  %s4246_s25 = sadd.s32 4294967295, %s4155_s24   ;;  %s4155_s24 = sphi %s4231_s24, %s6305_s24   ;;  %s4151_s23 = sphi %s4229_s23, %s6302_s23   ;;  %s4147_s22 = sphi %s4227_s22, %s6304_s22   ;;  %s4143_s21 = sphi %s4225_s21, %s6303_s21  }
   0x6   : > { %s3588_s26 = sadd.s32 4294967294, %s4155_s24   ;;  %s4250_s27 = sadd.s32 1, %s4155_s24  }
   0x7   : > { %s248_s28 = sadd.s32 1, %s4151_s23  ;;  %s245_s29 = ssub.s32 %s4155_s24, %s4250_s27 }
   0x8   : > { %p258_p0 = scmp.ne.s32.totalorder %s4151_s23, %s4147_s22  ;;  %p246_p1 = scmp.eq.s32.totalorder %s245_s29, 0 }
   0x9   : > { %p259_p2 = scmp.eq.s32.totalorder %s4246_s25, 1  ;;  %p264_p3 = scmp.ne.s32.totalorder %s4147_s22, %s4143_s21 }
   0xa   : > { %p265_p4 = scmp.eq.s32.totalorder %s3588_s26, 1  ;;  %p3591_p7 = scmp.ge.s32.totalorder %s4155_s24, 1 }
   0xb   : > { %s4261_s30 = scalar_select %p246_p1, %s4151_s23, %s248_s28  }
   0xc   : > { %p4263_p5 = por %p259_p2, %p258_p0  ;;  %p4267_p6 = por %p265_p4, %p264_p3 }
   0xd   : > { %6203 = sst [smem:[#allocation6_spill]] %s4261_s30  ;;  %p370_p8 = scmp.lt.s32.totalorder %s4155_s24, 3 }
   0xf   : > { %p371_p9 = pnand %p3591_p7, %p370_p8 }
  0x11   : > { %374 = sbr.rel (%p371_p9) target bundleno = 1715 (0x6b3), region = 60 }
  0x16   : > { %p421_p10 = scmp.lt.s32.totalorder %s4246_s25, 1  ;;  %v3908_v0 = vld [vmem:[%s6142_s2 + $0x8] sm:$0xff]  ;;  %s6206_s0 = sld [smem:[#allocation46_spill]]  ;;  %v440_v3 = vld [vmem:[%s6141_s1] sm:$0xf]  ;;  %vm453_vm0 = vcmask 261120  }
  0x17   : > { %496 = vmatpush.bf16.msra.mxu1 %v3908_v0  ;;  %v3907_v4 = vld [vmem:[%s6142_s2] sm:$0xff]  ;;  %v760_v5 = vld [vmem:[%s6144_s4 + $0x10] sm:$0xff]  ;;  %v4157_v6 = vmov 0   ;;  %v761_v8 = vld [vmem:[%s6144_s4 + $0x18] sm:$0xff]  ;;  %vm665_vm1 = vcmask 1043456   ;;  %vm616_vm2 = vcmask 64512  }
  0x18   : > { %s4278_s17 = scalar_select %p421_p10, %s4246_s25, 1  ;;  %4003 = vset.pattern.permute.xlu1 %v4157_v6  ;;  %4004 = vset.pattern.permute.xlu2 %v4157_v6  ;;  %v762_v7 = vld [vmem:[%s6144_s4 + $0x20] sm:$0xff]  ;;  %v763_v9 = vld [vmem:[%s6144_s4 + $0x28] sm:$0xff]  ;;  %v765_v10 = vld [vmem:[%s6144_s4 + $0x38] sm:$0xff] }
  0x19   : > { %802 = vperm.xlu1 %4003, %v760_v5   ;;  %812 = vperm.xlu2 %4004, %v762_v7   ;;  %v766_v11 = vld [vmem:[%s6144_s4 + $0x40] sm:$0xff]  ;;  %v768_v13 = vld [vmem:[%s6144_s4 + $0x50] sm:$0xff]  ;;  %v769_v14 = vld [vmem:[%s6144_s4 + $0x58] sm:$0xff]  ;;  %s405_s29 = sand.u32 1, %s4147_s22  }
  0x1a   : > { %s3903_s18 = sshll.u32 %s4278_s17, 4  ;;  %4002 = vset.pattern.permute.xlu0 %v4157_v6  ;;  %v758_v12 = vld [vmem:[%s6144_s4] sm:$0xff]  ;;  %v759_v17 = vld [vmem:[%s6144_s4 + $0x8] sm:$0xff]  ;;  %v772_v18 = vld [vmem:[%s6144_s4 + $0x70] sm:$0xff]  ;;  %s3904_s23 = sshll.u32 %s4278_s17, 8 }
  0x1b   : > { %497 = vmatpush.bf16.msra.mxu1 %v3907_v4  ;;  %792 = vperm.xlu0 %4002, %v758_v12   ;;  %v773_v19 = vld [vmem:[%s6144_s4 + $0x78] sm:$0xff]  ;;  %v764_v21 = vld [vmem:[%s6144_s4 + $0x30] sm:$0xff]  ;;  %v771_v23 = vld [vmem:[%s6144_s4 + $0x68] sm:$0xff]  ;;  %s4639_s16 = scalar_lea.vmem %s6152_s12, %s3904_s23  ;;  %s3957_s23 = smul.u32 352, %s405_s29 }
  0x1c   : > { %s425_s26 = scalar_lea.vmem %s6206_s0, %s3903_s18  ;;  %v997_v22 = vld [vmem:[%s6145_s5 + $0x78] sm:$0xff]  ;;  %v767_v24 = vld [vmem:[%s6144_s4 + $0x48] sm:$0xff]  ;;  %v788_v26 = vld [vmem:[%s6144_s4 + $0xf0] sm:$0xff]  ;;  %s3958_s15 = smul.u32 11, %s4278_s17 }
  0x1d   : > { %v3906_v1 = vld [vmem:[%s425_s26 + $0x8] sm:$0xff]  ;;  %v3905_v2 = vld [vmem:[%s425_s26] sm:$0xff]  ;;  %v992_v28 = vld [vmem:[%s6145_s5 + $0x50] sm:$0xff]  ;;  %s5029_s30 = scalar_lea.vmem [#allocation2], %s3957_s23  ;;  %s3959_s17 = smul.u32 352, %s4246_s25 }
  0x1e   : > { %463 = vmatpush.bf16.msra.mxu0 %v3906_v1  ;;  %v995_v25 = vld [vmem:[%s6145_s5 + $0x68] sm:$0xff]  ;;  %v770_v27 = vld [vmem:[%s6144_s4 + $0x60] sm:$0xff]  ;;  %v993_v29 = vld [vmem:[%s6145_s5 + $0x58] sm:$0xff]  ;;  %s6030_s20 = scalar_lea.vmem %s6151_s11, %s3958_s15  ;;  %s3468_s26 = sshll.u32 %s5029_s30, 4  ;;  %s6043_s26 = int_to_ptr.vmem [resolvable:$true] %s3468_s26 }
  0x1f   : > { %v996_v30 = vld [vmem:[%s6145_s5 + $0x70] sm:$0xff]  ;;  %v1013_v31 = vld [vmem:[%s6145_s5 + $0xf8] sm:$0xff]  ;;  %v786_v32 = vld [vmem:[%s6144_s4 + $0xe0] sm:$0xff]  ;;  %s3467_s23 = scalar_lea.hbm %s6150_s10, %s3959_s17  ;;  %s3447_s25 = scalar_lea.sflag [#allocation3], %s405_s29 }
  0x20   : > { %v994_v33 = vld [vmem:[%s6145_s5 + $0x60] sm:$0xff]  ;;  %v991_v35 = vld [vmem:[%s6145_s5 + $0x48] sm:$0xff]  ;;  %v789_v36 = vld [vmem:[%s6144_s4 + $0xf8] sm:$0xff]  ;;  %s3470_s15 = sshll.u32 %s3467_s23, 4  ;;  %s3471_s15 = int_to_ptr.hbm [resolvable:$true] %s3470_s15 }
  0x21   : > { %807 = vperm.xlu1 %4003, %v761_v8   ;;  %817 = vperm.xlu2 %4004, %v763_v9   ;;  %v990_v34 = vld [vmem:[%s6145_s5 + $0x40] sm:$0xff]  ;;  %v1011_v37 = vld [vmem:[%s6145_s5 + $0xe8] sm:$0xff]  ;;  %v988_v38 = vld [vmem:[%s6145_s5 + $0x30] sm:$0xff] }
  0x22   : > { %464 = vmatpush.bf16.msra.mxu0 %v3905_v2  ;;  %v1009_v39 = vld [vmem:[%s6145_s5 + $0xd8] sm:$0xff]  ;;  %v986_v40 = vld [vmem:[%s6145_s5 + $0x20] sm:$0xff]  ;;  %v784_v41 = vld [vmem:[%s6144_s4 + $0xd0] sm:$0xff] }
  0x23   : > { %797 = vperm.xlu0 %4002, %v759_v17   ;;  %v1007_v42 = vld [vmem:[%s6145_s5 + $0xc8] sm:$0xff]  ;;  %v1012_v44 = vld [vmem:[%s6145_s5 + $0xf0] sm:$0xff]  ;;  %v989_v45 = vld [vmem:[%s6145_s5 + $0x38] sm:$0xff] }
  0x24   : > { %v984_v46 = vld [vmem:[%s6145_s5 + $0x10] sm:$0xff]  ;;  %v787_v49 = vld [vmem:[%s6144_s4 + $0xe8] sm:$0xff]  ;;  %v782_v50 = vld [vmem:[%s6144_s4 + $0xc0] sm:$0xff] }
  0x25   : > { %3604 = vmatmul.msk.bf16.vlgmr.msra.gmra.mxu0 %vm453_vm0, %v440_v3  ;;  %v1005_v51 = vld [vmem:[%s6145_s5 + $0xb8] sm:$0xff]  ;;  %v1010_v53 = vld [vmem:[%s6145_s5 + $0xe0] sm:$0xff]  ;;  %v987_v55 = vld [vmem:[%s6145_s5 + $0x28] sm:$0xff] }
  0x26   : > { %v982_v56 = vld [vmem:[%s6145_s5] sm:$0xff]  ;;  %v785_v57 = vld [vmem:[%s6144_s4 + $0xd8] sm:$0xff]  ;;  %v780_v60 = vld [vmem:[%s6144_s4 + $0xb0] sm:$0xff] }
  0x27   : > { %v1008_v63 = vld [vmem:[%s6145_s5 + $0xd0] sm:$0xff]  ;;  %v3909_v1 = vld [vmem:[%s6143_s3] sm:$0xff]  ;;  %v985_v3 = vld [vmem:[%s6145_s5 + $0x18] sm:$0xff] }
  0x28   : > { %v783_v6 = vld [vmem:[%s6144_s4 + $0xc8] sm:$0xff]  ;;  %v778_v7 = vld [vmem:[%s6144_s4 + $0xa0] sm:$0xff]  ;;  %v3911_v17 = vld [vmem:[%s6143_s3 + $0x10] sm:$0xff] }
  0x29   : > { %827 = vperm.xlu1 %4003, %v765_v10   ;;  %832 = vperm.xlu2 %4004, %v766_v11   ;;  %v1006_v10 = vld [vmem:[%s6145_s5 + $0xc0] sm:$0xff]  ;;  %v3910_v11 = vld [vmem:[%s6143_s3 + $0x8] sm:$0xff] }
  0x2a   : > { %v983_v12 = vld [vmem:[%s6145_s5 + $0x8] sm:$0xff] }
  0x2b   : > { %822 = vperm.xlu0 %4002, %v764_v21  }
  0x31   : > { %842 = vperm.xlu1 %4003, %v768_v13   ;;  %847 = vperm.xlu2 %4004, %v769_v14   ;;  %v781_v14 = vld [vmem:[%s6144_s4 + $0xb8] sm:$0xff] }
  0x33   : > { %837 = vperm.xlu0 %4002, %v767_v24   ;;  %v3912_v24 = vld [vmem:[%s6143_s3 + $0x18] sm:$0xff] }
  0x39   : > { %862 = vperm.xlu1 %4003, %v772_v18   ;;  %867 = vperm.xlu2 %4004, %v773_v19  }
  0x3b   : > { %852 = vperm.xlu0 %4002, %v770_v27  }
  0x41   : > { %1091 = vperm.xlu1 %4003, %v997_v22   ;;  %857 = vperm.xlu2 %4004, %v771_v23   ;;  %v1002_v23 = vld [vmem:[%s6145_s5 + $0xa0] sm:$0xff] }
  0x43   : > { %1086 = vperm.xlu0 %4002, %v996_v30  }
  0x49   : > { %1081 = vperm.xlu1 %4003, %v995_v25   ;;  %942 = vperm.xlu2 %4004, %v788_v26   ;;  %v1003_v25 = vld [vmem:[%s6145_s5 + $0xa8] sm:$0xff] }
  0x4b   : > { %1076 = vperm.xlu0 %4002, %v994_v33   ;;  %v3913_v33 = vld [vmem:[%s6143_s3 + $0x20] sm:$0xff] }
  0x51   : > { %1066 = vperm.xlu1 %4003, %v992_v28   ;;  %1071 = vperm.xlu2 %4004, %v993_v29   ;;  %v777_v28 = vld [vmem:[%s6144_s4 + $0x98] sm:$0xff]  ;;  %v1000_v29 = vld [vmem:[%s6145_s5 + $0x90] sm:$0xff] }
  0x53   : > { %947 = vperm.xlu0 %4002, %v789_v36   ;;  %v776_v36 = vld [vmem:[%s6144_s4 + $0x90] sm:$0xff] }
  0x59   : > { %1171 = vperm.xlu1 %4003, %v1013_v31   ;;  %932 = vperm.xlu2 %4004, %v786_v32   ;;  %v774_v32 = vld [vmem:[%s6144_s4 + $0x80] sm:$0xff] }
  0x5b   : > { %1166 = vperm.xlu0 %4002, %v1012_v44   ;;  %v3914_v44 = vld [vmem:[%s6143_s3 + $0x28] sm:$0xff] }
  0x61   : > { %1056 = vperm.xlu1 %4003, %v990_v34   ;;  %1061 = vperm.xlu2 %4004, %v991_v35   ;;  %v775_v35 = vld [vmem:[%s6144_s4 + $0x88] sm:$0xff] }
  0x63   : > { %937 = vperm.xlu0 %4002, %v787_v49   ;;  %v1300_v49 = vld [vmem:[%s6147_s7 + $0x18] sm:$0xff] }
  0x69   : > { %1161 = vperm.xlu1 %4003, %v1011_v37   ;;  %922 = vperm.xlu2 %4004, %v784_v41   ;;  %v999_v37 = vld [vmem:[%s6145_s5 + $0x88] sm:$0xff] }
  0x6b   : > { %1156 = vperm.xlu0 %4002, %v1010_v53   ;;  %v1302_v53 = vld [vmem:[%s6147_s7 + $0x28] sm:$0xff] }
  0x71   : > { %1046 = vperm.xlu1 %4003, %v988_v38   ;;  %1051 = vperm.xlu2 %4004, %v989_v45  }
  0x73   : > { %v4405_v47 = vpop.permute.xlu2 %812  ;;  %927 = vperm.xlu0 %4002, %v785_v57  }
  0x79   : > { %1151 = vperm.xlu1 %4003, %v1009_v39   ;;  %912 = vperm.xlu2 %4004, %v782_v50   ;;  %v1001_v50 = vld [vmem:[%s6145_s5 + $0x98] sm:$0xff] }
  0x7b   : > { %v4418_v52 = vpop.permute.xlu2 %817  ;;  %1146 = vperm.xlu0 %4002, %v1008_v63   ;;  %v3915_v63 = vld [vmem:[%s6143_s3 + $0x30] sm:$0xff] }
  0x81   : > { %1036 = vperm.xlu1 %4003, %v986_v40   ;;  %1041 = vperm.xlu2 %4004, %v987_v55   ;;  %v1297_v40 = vld [vmem:[%s6147_s7] sm:$0xff]  ;;  %v1303_v55 = vld [vmem:[%s6147_s7 + $0x30] sm:$0xff] }
  0x83   : > { %v4434_v58 = vpop.permute.xlu2 %832  ;;  %917 = vperm.xlu0 %4002, %v783_v6   ;;  %v1298_v6 = vld [vmem:[%s6147_s7 + $0x8] sm:$0xff] }
  0x89   : > { %1141 = vperm.xlu1 %4003, %v1007_v42   ;;  %902 = vperm.xlu2 %4004, %v780_v60   ;;  %v1299_v42 = vld [vmem:[%s6147_s7 + $0x10] sm:$0xff] }
  0x8b   : > { %v4394_v43 = vpop.permute.xlu1 %802  ;;  %v4448_v2 = vpop.permute.xlu2 %847  ;;  %1136 = vperm.xlu0 %4002, %v1006_v10   ;;  %v3916_v10 = vld [vmem:[%s6143_s3 + $0x38] sm:$0xff] }
  0x8d   : > { %v4521_v30 = vpop.permute.xlu0 %792 }
  0x91   : > { %1026 = vperm.xlu1 %4003, %v984_v46   ;;  %1031 = vperm.xlu2 %4004, %v985_v3   ;;  %v1306_v3 = vld [vmem:[%s6147_s7 + $0x48] sm:$0xff] }
  0x93   : > { %v4407_v48 = vpop.permute.xlu1 %807  ;;  %v4462_v8 = vpop.permute.xlu2 %867  ;;  %907 = vperm.xlu0 %4002, %v781_v14  }
  0x95   : > { %v4543_v38 = vpop.permute.xlu0 %797 }
  0x99   : > { %1131 = vperm.xlu1 %4003, %v1005_v51   ;;  %892 = vperm.xlu2 %4004, %v778_v7  }
  0x9b   : > { %v4423_v54 = vpop.permute.xlu1 %827  ;;  %v4476_v13 = vpop.permute.xlu2 %857 }
  0x9d   : > { %v4558_v45 = vpop.permute.xlu0 %822 }
  0xa1   : > { %1016 = vperm.xlu1 %4003, %v982_v56   ;;  %1021 = vperm.xlu2 %4004, %v983_v12   ;;  %v998_v56 = vld [vmem:[%s6145_s5 + $0x80] sm:$0xff] }
  0xa2   : > { %v466_v15 = vpop.f32.mrf.mxu0  ;;  %v1301_v12 = vld [vmem:[%s6147_s7 + $0x20] sm:$0xff] }
  0xa3   : > { %v470_v16 = vpack.c.bf16 %v466_v15, %v466_v15  ;;  %v4436_v59 = vpop.permute.xlu1 %842  ;;  %v4489_v18 = vpop.permute.xlu2 %942 }
  0xa5   : > { %3613 = vmatmul.msk.bf16.vlgmr.msra.gmra.mxu1 %vm453_vm0, %v470_v16  ;;  %v1004_v16 = vld [vmem:[%s6145_s5 + $0xb0] sm:$0xff]  ;;  %v4580_v57 = vpop.permute.xlu0 %837 }
  0xa6   : > { %1126 = vperm.xlu0 %4002, %v1004_v16  }
  0xa9   : > { %1121 = vperm.xlu1 %4003, %v1003_v25   ;;  %882 = vperm.xlu2 %4004, %v776_v36   ;;  %v1307_v25 = vld [vmem:[%s6147_s7 + $0x50] sm:$0xff] }
  0xaa   : > { %v468_v20 = vpop.f32.mrf.mxu0 }
  0xab   : > { %v4454_v5 = vpop.permute.xlu1 %862  ;;  %v779_v20 = vld [vmem:[%s6144_s4 + $0xa8] sm:$0xff]  ;;  %v4497_v21 = vpop.permute.xlu2 %1071 }
  0xae   : > { %897 = vperm.xlu0 %4002, %v779_v20  }
  0xb1   : > { %1106 = vperm.xlu1 %4003, %v1000_v29   ;;  %1111 = vperm.xlu2 %4004, %v1001_v50  }
  0xb3   : > { %v4464_v9 = vpop.permute.xlu1 %1091  ;;  %v4511_v26 = vpop.permute.xlu2 %932 }
  0xb6   : > { %1116 = vperm.xlu0 %4002, %v1002_v23  }
  0xb9   : > { %877 = vperm.xlu1 %4003, %v775_v35   ;;  %1096 = vperm.xlu2 %4004, %v998_v56  }
  0xbb   : > { %v4481_v15 = vpop.permute.xlu1 %1081  ;;  %v4523_v31 = vpop.permute.xlu2 %1061 }
  0xbe   : > { %887 = vperm.xlu0 %4002, %v777_v28  }
  0xc1   : > { %1310 = vperm.xlu1 %4003, %v1297_v40   ;;  %1315 = vperm.xlu2 %4004, %v1298_v6  }
  0xc3   : > { %v4491_v19 = vpop.permute.xlu1 %1066  ;;  %v4545_v39 = vpop.permute.xlu2 %922 }
  0xc6   : > { %872 = vperm.xlu0 %4002, %v774_v32  }
  0xc9   : > { %1325 = vperm.xlu1 %4003, %v1300_v49   ;;  %1330 = vperm.xlu2 %4004, %v1301_v12   ;;  %v3919_v12 = vld [vmem:[%s6143_s3 + $0x50] sm:$0xff] }
  0xcb   : > { %v4499_v22 = vpop.permute.xlu1 %1171  ;;  %v4560_v46 = vpop.permute.xlu2 %1051 }
  0xce   : > { %1101 = vperm.xlu0 %4002, %v999_v37  }
  0xd1   : > { %1340 = vperm.xlu1 %4003, %v1303_v55  }
  0xd3   : > { %v4513_v27 = vpop.permute.xlu1 %1056  ;;  %v4582_v60 = vpop.permute.xlu2 %912 }
  0xd6   : > { %1320 = vperm.xlu0 %4002, %v1299_v42  }
  0xd9   : > { %1355 = vperm.xlu1 %4003, %v1306_v3  }
  0xdb   : > { %v4531_v34 = vpop.permute.xlu1 %1161 }
  0xde   : > { %1335 = vperm.xlu0 %4002, %v1302_v53  }
  0xe3   : > { %v4550_v41 = vpop.permute.xlu1 %1046 }
  0xeb   : > { %v4569_v51 = vpop.permute.xlu1 %1151 }
 0x122   : > { %v499_v61 = vpop.f32.mrf.mxu1 }
 0x123   : > { %v535_v62 = vpack.c.bf16 %v499_v61, %v499_v61  ;;  %v4584_v61 = vpop.permute.xlu1 %1036 }
 0x125   : > { %v667_v0 = vsel %vm665_vm1, %v535_v62, 0  ;;  %v1305_v62 = vld [vmem:[%s6147_s7 + $0x40] sm:$0xff] }
 0x126   : > { %676 = vmatpush.bf16.msra.mxu2 %v667_v0  ;;  %1350 = vperm.xlu0 %4002, %v1305_v62   ;;  %v4593_v0 = vpop.permute.xlu0 %852 }
 0x129   : > { %3678 = vmatmul.msk.bf16.vlgmr.msra.gmra.mxu2 %vm616_vm2, %v3909_v1  ;;  %v4595_v1 = vpop.permute.xlu2 %1041 }
 0x12a   : > { %v501_v4 = vpop.f32.mrf.mxu1 }
 0x12b   : > { %v4600_v4 = vpop.permute.xlu1 %1141 }
 0x12e   : > { %v4605_v7 = vpop.permute.xlu0 %1086 }
 0x133   : > { %v1027_v14 = vpop.permute.xlu1 %1026 }
 0x136   : > { %v4616_v16 = vpop.permute.xlu0 %1076 }
 0x139   : > { %3679 = vmatmul.msk.bf16.gmra.mxu2 %vm616_vm2, %v3910_v11  ;;  %v4610_v11 = vpop.permute.xlu2 %902 }
 0x13b   : > { %v4621_v23 = vpop.permute.xlu1 %1131 }
 0x13e   : > { %v4629_v28 = vpop.permute.xlu0 %947 }
 0x141   : > { %v1032_v20 = vpop.permute.xlu2 %1031 }
 0x146   : > { %v4641_v40 = vpop.permute.xlu0 %1166 }
 0x149   : > { %3680 = vmatmul.msk.bf16.gmra.mxu2 %vm616_vm2, %v3911_v17  ;;  %v1304_v17 = vld [vmem:[%s6147_s7 + $0x38] sm:$0xff]  ;;  %v4632_v29 = vpop.permute.xlu2 %892 }
 0x14a   : > { %1345 = vperm.xlu2 %4004, %v1304_v17  }
 0x152   : > { %1360 = vperm.xlu2 %4004, %v1307_v25  }
 0x159   : > { %3681 = vmatmul.msk.bf16.gmra.mxu2 %vm616_vm2, %v3912_v24  ;;  %v3917_v24 = vld [vmem:[%s6143_s3 + $0x40] sm:$0xff] }
 0x169   : > { %3682 = vmatmul.msk.bf16.gmra.mxu2 %vm616_vm2, %v3913_v33  ;;  %v1017_v33 = vpop.permute.xlu1 %1016 }
 0x179   : > { %3683 = vmatmul.msk.bf16.gmra.mxu2 %vm616_vm2, %v3914_v44  ;;  %v1022_v44 = vpop.permute.xlu2 %1021 }
 0x189   : > { %3684 = vmatmul.msk.bf16.gmra.mxu2 %vm616_vm2, %v3915_v63  ;;  %v4655_v63 = vpop.permute.xlu0 %937 }
 0x199   : > { %3685 = vmatmul.msk.bf16.gmra.mxu2 %vm616_vm2, %v3916_v10 }
 0x1a9   : > { %3686 = vmatmul.msk.bf16.gmra.mxu2 %vm616_vm2, %v3917_v24  ;;  %v4663_v24 = vpop.permute.xlu0 %1156 }
 0x1ac   : > { %v678_v32 = vpop.f32.mrf.mxu2 }
 0x1ad   : > { %v950_v35 = vmul.f32 %v4521_v30, %v678_v32  ;;  %v3918_v30 = vld [vmem:[%s6143_s3 + $0x48] sm:$0xff] }
 0x1af   : > { %v1174_v36 = vadd.f32 %v1017_v33, %v950_v35 }
 0x1b1   : > { %v1206_v37 = vmax.f32 %v1174_v36, 0.0  ;;  %v4672_v35 = vpop.permute.xlu0 %927 }
 0x1b3   : > { %1238 = vst.msk [vmem:[%s4639_s16] sm:$0xff] %vm616_vm2, %v1206_v37 }
 0x1b4   : > { %v680_v42 = vpop.f32.mrf.mxu2 }
 0x1b5   : > { %v951_v49 = vmul.f32 %v4543_v38, %v680_v42 }
 0x1b7   : > { %v1175_v50 = vadd.f32 %v1022_v44, %v951_v49 }
 0x1b9   : > { %v1207_v53 = vmax.f32 %v1175_v50, 0.0  ;;  %3687 = vmatmul.msk.bf16.gmra.mxu2 %vm616_vm2, %v3918_v30  ;;  %v4686_v44 = vpop.permute.xlu0 %1146 }
 0x1bb   : > { %1239 = vst.msk [vmem:[%s4639_s16 + $0x8] sm:$0xff] %vm616_vm2, %v1207_v53  ;;  %v4652_v55 = vpack.c.bf16 %v1207_v53, %v1206_v37  ;;  %v3920_v37 = vld [vmem:[%s6143_s3 + $0x58] sm:$0xff] }
 0x1bc   : > { %v683_v56 = vpop.f32.mrf.mxu2 }
 0x1bd   : > { %v952_v62 = vmul.f32 %v4394_v43, %v683_v56  ;;  %v3921_v56 = vld [vmem:[%s6143_s3 + $0x60] sm:$0xff] }
 0x1bf   : > { %v1176_v3 = vadd.f32 %v1027_v14, %v952_v62 }
 0x1c1   : > { %v1208_v38 = vmax.f32 %v1176_v3, 0.0  ;;  %v4696_v62 = vpop.permute.xlu0 %917 }
 0x1c3   : > { %1240 = vst.msk [vmem:[%s4639_s16 + $0x10] sm:$0xff] %vm616_vm2, %v1208_v38 }
 0x1c4   : > { %v685_v6 = vpop.f32.mrf.mxu2 }
 0x1c5   : > { %v953_v10 = vmul.f32 %v4407_v48, %v685_v6 }
 0x1c7   : > { %v1177_v17 = vadd.f32 %v1032_v20, %v953_v10 }
 0x1c9   : > { %3688 = vmatmul.msk.bf16.gmra.mxu2 %vm616_vm2, %v3919_v12  ;;  %v1209_v43 = vmax.f32 %v1177_v17, 0.0  ;;  %v4708_v10 = vpop.permute.xlu0 %1136 }
 0x1cb   : > { %1241 = vst.msk [vmem:[%s4639_s16 + $0x18] sm:$0xff] %vm616_vm2, %v1209_v43  ;;  %v4668_v14 = vpack.c.bf16 %v1209_v43, %v1208_v38  ;;  %v3922_v43 = vld [vmem:[%s6143_s3 + $0x68] sm:$0xff] }
 0x1cc   : > { %v688_v25 = vpop.f32.mrf.mxu2 }
 0x1cd   : > { %v954_v32 = vmul.f32 %v4405_v47, %v688_v25 }
 0x1cf   : > { %v1178_v48 = vadd.f32 %v4584_v61, %v954_v32 }
 0x1d1   : > { %v1210_v33 = vmax.f32 %v1178_v48, 0.0  ;;  %v4724_v25 = vpop.permute.xlu0 %907 }
 0x1d3   : > { %1242 = vst.msk [vmem:[%s4639_s16 + $0x20] sm:$0xff] %vm616_vm2, %v1210_v33 }
 0x1d4   : > { %v690_v20 = vpop.f32.mrf.mxu2 }
 0x1d5   : > { %v955_v36 = vmul.f32 %v4418_v52, %v690_v20 }
 0x1d7   : > { %v1179_v42 = vadd.f32 %v4595_v1, %v955_v36 }
 0x1d9   : > { %3689 = vmatmul.msk.bf16.gmra.mxu2 %vm616_vm2, %v3920_v37  ;;  %v1211_v47 = vmax.f32 %v1179_v42, 0.0  ;;  %v3923_v37 = vld [vmem:[%s6143_s3 + $0x70] sm:$0xff] }
 0x1db   : > { %1243 = vst.msk [vmem:[%s4639_s16 + $0x28] sm:$0xff] %vm616_vm2, %v1211_v47  ;;  %v4684_v61 = vpack.c.bf16 %v1211_v47, %v1210_v33 }
 0x1dc   : > { %v693_v49 = vpop.f32.mrf.mxu2 }
 0x1dd   : > { %v956_v30 = vmul.f32 %v4558_v45, %v693_v49 }
 0x1df   : > { %v1180_v52 = vadd.f32 %v4550_v41, %v956_v30 }
 0x1e1   : > { %v1212_v50 = vmax.f32 %v1180_v52, 0.0 }
 0x1e3   : > { %1244 = vst.msk [vmem:[%s4639_s16 + $0x30] sm:$0xff] %vm616_vm2, %v1212_v50 }
 0x1e4   : > { %v695_v1 = vpop.f32.mrf.mxu2 }
 0x1e5   : > { %v957_v53 = vmul.f32 %v4423_v54, %v695_v1 }
 0x1e7   : > { %v1181_v3 = vadd.f32 %v4560_v46, %v957_v53 }
 0x1e9   : > { %3690 = vmatmul.msk.bf16.gmra.mxu2 %vm616_vm2, %v3921_v56  ;;  %v1213_v45 = vmax.f32 %v1181_v3, 0.0 }
 0x1eb   : > { %1245 = vst.msk [vmem:[%s4639_s16 + $0x38] sm:$0xff] %vm616_vm2, %v1213_v45  ;;  %v4702_v41 = vpack.c.bf16 %v1213_v45, %v1212_v50  ;;  %v3924_v50 = vld [vmem:[%s6143_s3 + $0x78] sm:$0xff]  ;;  %v1122_v45 = vpop.permute.xlu1 %1121 }
 0x1ec   : > { %v698_v38 = vpop.f32.mrf.mxu2 }
 0x1ed   : > { %v958_v6 = vmul.f32 %v4434_v58, %v698_v38 }
 0x1ef   : > { %v4706_v54 = vadd.f32 %v4513_v27, %v958_v6 }
 0x1f1   : > { %v1214_v12 = vmax.f32 %v4706_v54, 0.0 }
 0x1f3   : > { %1246 = vst.msk [vmem:[%s4639_s16 + $0x40] sm:$0xff] %vm616_vm2, %v1214_v12 }
 0x1f4   : > { %v700_v46 = vpop.f32.mrf.mxu2 }
 0x1f5   : > { %v959_v17 = vmul.f32 %v4580_v57, %v700_v46 }
 0x1f7   : > { %v4720_v58 = vadd.f32 %v4523_v31, %v959_v17  ;;  %v4734_v31 = vpop.permute.xlu0 %1126 }
 0x1f9   : > { %v1215_v27 = vmax.f32 %v4720_v58, 0.0  ;;  %3691 = vmatmul.msk.bf16.gmra.mxu2 %vm616_vm2, %v3922_v43  ;;  %v3696_v58 = vld [vmem:[%s6146_s6] sm:$0xf] }
 0x1fb   : > { %1247 = vst.msk [vmem:[%s4639_s16 + $0x48] sm:$0xff] %vm616_vm2, %v1215_v27 }
 0x1fc   : > { %v703_v32 = vpop.f32.mrf.mxu2 }
 0x1fd   : > { %v960_v57 = vmul.f32 %v4436_v59, %v703_v32 }
 0x1ff   : > { %v1184_v48 = vadd.f32 %v4491_v19, %v960_v57  ;;  %v4745_v49 = vpop.permute.xlu0 %897  ;;  %v1107_v57 = vpop.permute.xlu1 %1106 }
 0x201   : > { %v1216_v33 = vmax.f32 %v1184_v48, 0.0 }
 0x203   : > { %1248 = vst.msk [vmem:[%s4639_s16 + $0x50] sm:$0xff] %vm616_vm2, %v1216_v33 }
 0x204   : > { %v705_v20 = vpop.f32.mrf.mxu2 }
 0x205   : > { %v961_v36 = vmul.f32 %v4448_v2, %v705_v20 }
 0x207   : > { %v1185_v42 = vadd.f32 %v4497_v21, %v961_v36  ;;  %v4755_v53 = vpop.permute.xlu0 %1116 }
 0x209   : > { %v1217_v47 = vmax.f32 %v1185_v42, 0.0  ;;  %3692 = vmatmul.msk.bf16.gmra.mxu2 %vm616_vm2, %v3923_v37 }
 0x20b   : > { %1249 = vst.msk [vmem:[%s4639_s16 + $0x58] sm:$0xff] %vm616_vm2, %v1217_v47 }
 0x20c   : > { %v708_v59 = vpop.f32.mrf.mxu2 }
 0x20d   : > { %v962_v19 = vmul.f32 %v4593_v0, %v708_v59 }
 0x20f   : > { %v1186_v30 = vadd.f32 %v4616_v16, %v962_v19  ;;  %v883_v16 = vpop.permute.xlu2 %882  ;;  %v888_v6 = vpop.permute.xlu0 %887 }
 0x210   : > { %v878_v19 = vpop.permute.xlu1 %877 }
 0x211   : > { %v1218_v2 = vmax.f32 %v1186_v30, 0.0 }
 0x213   : > { %1250 = vst.msk [vmem:[%s4639_s16 + $0x60] sm:$0xff] %vm616_vm2, %v1218_v2 }
 0x214   : > { %v710_v52 = vpop.f32.mrf.mxu2 }
 0x215   : > { %v963_v21 = vmul.f32 %v4476_v13, %v710_v52 }
 0x217   : > { %v1187_v1 = vadd.f32 %v4481_v15, %v963_v21  ;;  %v1112_v15 = vpop.permute.xlu2 %1111 }
 0x219   : > { %v1219_v0 = vmax.f32 %v1187_v1, 0.0  ;;  %3693 = vmatmul.msk.bf16.gmra.mxu2 %vm616_vm2, %v3924_v50  ;;  %v1285_v50 = vpack.c.bf16 %v1215_v27, %v1214_v12  ;;  %v3926_v27 = vld [vmem:[%s6146_s6 + $0x4] sm:$0xf0] }
 0x21b   : > { %1251 = vst.msk [vmem:[%s4639_s16 + $0x68] sm:$0xff] %vm616_vm2, %v1219_v0  ;;  %v1287_v42 = vpack.c.bf16 %v1219_v0, %v1218_v2 }
 0x21c   : > { %v713_v56 = vpop.f32.mrf.mxu2 }
 0x21d   : > { %v964_v3 = vmul.f32 %v4454_v5, %v713_v56  ;;  %v873_v5 = vpop.permute.xlu0 %872 }
 0x21f   : > { %v1188_v13 = vadd.f32 %v4605_v7, %v964_v3  ;;  %v1097_v36 = vpop.permute.xlu2 %1096 }
 0x221   : > { %v1220_v38 = vmax.f32 %v1188_v13, 0.0 }
 0x223   : > { %1252 = vst.msk [vmem:[%s4639_s16 + $0x70] sm:$0xff] %vm616_vm2, %v1220_v38 }
 0x224   : > { %v715_v46 = vpop.f32.mrf.mxu2 }
 0x225   : > { %v965_v17 = vmul.f32 %v4462_v8, %v715_v46  ;;  %v1286_v8 = vpack.c.bf16 %v1217_v47, %v1216_v33  ;;  %v1102_v52 = vpop.permute.xlu0 %1101 }
 0x227   : > { %v1189_v43 = vadd.f32 %v4464_v9, %v965_v17  ;;  %v3928_v17 = vld [vmem:[%s6146_s6 + $0x14] sm:$0xf0] }
 0x229   : > { %v1221_v32 = vmax.f32 %v1189_v43, 0.0 }
 0x22b   : > { %1253 = vst.msk [vmem:[%s4639_s16 + $0x78] sm:$0xff] %vm616_vm2, %v1221_v32  ;;  %v1288_v48 = vpack.c.bf16 %v1221_v32, %v1220_v38 }
 0x22c   : > { %v718_v20 = vpop.f32.mrf.mxu2 }
 0x22d   : > { %v966_v7 = vmul.f32 %v873_v5, %v718_v20  ;;  %1420 = vmatpush.bf16.msra.mxu3 %v1288_v48 }
 0x22f   : > { %v1190_v37 = vadd.f32 %v1097_v36, %v966_v7  ;;  %v3712_v7 = vld [vmem:[%s6146_s6 + $0x20] sm:$0xf]  ;;  %v3930_v36 = vld [vmem:[%s6146_s6 + $0x24] sm:$0xf0] }
 0x231   : > { %v1222_v59 = vmax.f32 %v1190_v37, 0.0  ;;  %1421 = vmatpush.bf16.msra.mxu3 %v1287_v42 }
 0x233   : > { %1254 = vst.msk [vmem:[%s4639_s16 + $0x80] sm:$0xff] %vm616_vm2, %v1222_v59 }
 0x234   : > { %v720_v9 = vpop.f32.mrf.mxu2 }
 0x235   : > { %v967_v30 = vmul.f32 %v878_v19, %v720_v9  ;;  %1422 = vmatpush.bf16.msra.mxu3 %v1286_v8 }
 0x237   : > { %v1191_v21 = vadd.f32 %v1102_v52, %v967_v30  ;;  %v3932_v52 = vld [vmem:[%s6146_s6 + $0x34] sm:$0xf0] }
 0x239   : > { %v1223_v1 = vmax.f32 %v1191_v21, 0.0  ;;  %1423 = vmatpush.bf16.msra.mxu3 %v1285_v50 }
 0x23b   : > { %1255 = vst.msk [vmem:[%s4639_s16 + $0x88] sm:$0xff] %vm616_vm2, %v1223_v1  ;;  %v4776_v2 = vpack.c.bf16 %v1223_v1, %v1222_v59 }
 0x23c   : > { %v723_v0 = vpop.f32.mrf.mxu2 }
 0x23d   : > { %v968_v33 = vmul.f32 %v883_v16, %v723_v0  ;;  %1424 = vmatpush.bf16.msra.mxu3 %v4702_v41  ;;  %v3697_v16 = vor.u32 %v3926_v27, %v3696_v58 }
 0x23f   : > { %v1192_v47 = vadd.f32 %v1107_v57, %v968_v33 }
 0x241   : > { %v1224_v56 = vmax.f32 %v1192_v47, 0.0  ;;  %1425 = vmatpush.bf16.msra.mxu3 %v4684_v61 }
 0x243   : > { %1256 = vst.msk [vmem:[%s4639_s16 + $0x90] sm:$0xff] %vm616_vm2, %v1224_v56 }
 0x244   : > { %v725_v54 = vpop.f32.mrf.mxu2 }
 0x245   : > { %v969_v12 = vmul.f32 %v888_v6, %v725_v54  ;;  %1426 = vmatpush.bf16.msra.mxu3 %v4668_v14 }
 0x247   : > { %v1193_v41 = vadd.f32 %v1112_v15, %v969_v12 }
 0x249   : > { %v1225_v3 = vmax.f32 %v1193_v41, 0.0  ;;  %1427 = vmatpush.bf16.msra.mxu3 %v4652_v55  ;;  %v3704_v55 = vld [vmem:[%s6146_s6 + $0x10] sm:$0xf] }
 0x24a   : > { %v3705_v32 = vor.u32 %v3928_v17, %v3704_v55  ;;  %v4856_v41 = vld [vmem:[%s6146_s6 + $0x50] sm:$0xff] }
 0x24b   : > { %1257 = vst.msk [vmem:[%s4639_s16 + $0x98] sm:$0xff] %vm616_vm2, %v1225_v3  ;;  %v4792_v61 = vpack.c.bf16 %v1225_v3, %v1224_v56  ;;  %v3934_v56 = vld [vmem:[%s6146_s6 + $0x44] sm:$0xf0] }
 0x24c   : > { %v728_v13 = vpop.f32.mrf.mxu2  ;;  %1428 = vmatmul.bf16.vlgmr.msra.gmra.mxu3 %v3697_v16  ;;  %v1394_v16 = vunpack.c.l.b16 %v4856_v41 }
 0x24d   : > { %v970_v14 = vmul.f32 %v4632_v29, %v728_v13 }
 0x24f   : > { %v1194_v38 = vadd.f32 %v4755_v53, %v970_v14 }
 0x251   : > { %v1226_v6 = vmax.f32 %v1194_v38, 0.0 }
 0x253   : > { %1258 = vst.msk [vmem:[%s4639_s16 + $0xa0] sm:$0xff] %vm616_vm2, %v1226_v6 }
 0x254   : > { %v730_v15 = vpop.f32.mrf.mxu2 }
 0x255   : > { %v971_v46 = vmul.f32 %v4745_v49, %v730_v15 }
 0x257   : > { %v1195_v43 = vadd.f32 %v1122_v45, %v971_v46 }
 0x259   : > { %v1227_v29 = vmax.f32 %v1195_v43, 0.0 }
 0x25b   : > { %1259 = vst.msk [vmem:[%s4639_s16 + $0xa8] sm:$0xff] %vm616_vm2, %v1227_v29  ;;  %v4807_v53 = vpack.c.bf16 %v1227_v29, %v1226_v6 }
 0x25c   : > { %v733_v57 = vpop.f32.mrf.mxu2  ;;  %1433 = vmatmul.bf16.gmra.mxu3 %v3705_v32 }
 0x25d   : > { %v972_v49 = vmul.f32 %v4610_v11, %v733_v57  ;;  %v3713_v11 = vor.u32 %v3930_v36, %v3712_v7  ;;  %v3927_v57 = vld [vmem:[%s6146_s6 + $0x14] sm:$0xf] }
 0x25e   : > { %v3931_v36 = vld [vmem:[%s6146_s6 + $0x34] sm:$0xf] }
 0x25f   : > { %v1196_v48 = vadd.f32 %v4734_v31, %v972_v49 }
 0x261   : > { %v1228_v5 = vmax.f32 %v1196_v48, 0.0 }
 0x263   : > { %1260 = vst.msk [vmem:[%s4639_s16 + $0xb0] sm:$0xff] %vm616_vm2, %v1228_v5 }
 0x264   : > { %v735_v20 = vpop.f32.mrf.mxu2 }
 0x265   : > { %v973_v45 = vmul.f32 %v4724_v25, %v735_v20 }
 0x267   : > { %v1197_v37 = vadd.f32 %v4621_v23, %v973_v45  ;;  %v3720_v23 = vld [vmem:[%s6146_s6 + $0x30] sm:$0xf] }
 0x269   : > { %v1229_v42 = vmax.f32 %v1197_v37, 0.0  ;;  %v3722_v37 = vld [vmem:[%s6146_s6 + $0x38] sm:$0xf0] }
 0x26b   : > { %1261 = vst.msk [vmem:[%s4639_s16 + $0xb8] sm:$0xff] %vm616_vm2, %v1229_v42  ;;  %v1292_v31 = vpack.c.bf16 %v1229_v42, %v1228_v5  ;;  %v3929_v5 = vld [vmem:[%s6146_s6 + $0x24] sm:$0xf]  ;;  %v3725_v42 = vor.u32 %v3931_v36, %v3722_v37 }
 0x26c   : > { %v738_v59 = vpop.f32.mrf.mxu2  ;;  %1438 = vmatmul.bf16.gmra.mxu3 %v3713_v11 }
 0x26d   : > { %v974_v25 = vmul.f32 %v4582_v60, %v738_v59  ;;  %v3721_v60 = vor.u32 %v3932_v52, %v3720_v23  ;;  %v3933_v59 = vld [vmem:[%s6146_s6 + $0x44] sm:$0xf] }
 0x26f   : > { %v1198_v8 = vadd.f32 %v4708_v10, %v974_v25  ;;  %v3730_v25 = vld [vmem:[%s6146_s6 + $0x48] sm:$0xf0] }
 0x271   : > { %v1230_v19 = vmax.f32 %v1198_v8, 0.0 }
 0x273   : > { %1262 = vst.msk [vmem:[%s4639_s16 + $0xc0] sm:$0xff] %vm616_vm2, %v1230_v19 }
 0x274   : > { %v740_v9 = vpop.f32.mrf.mxu2 }
 0x275   : > { %v975_v30 = vmul.f32 %v4696_v62, %v740_v9 }
 0x277   : > { %v1199_v21 = vadd.f32 %v4600_v4, %v975_v30  ;;  %v3728_v4 = vld [vmem:[%s6146_s6 + $0x40] sm:$0xf]  ;;  %v1395_v30 = vunpack.c.h.b16 %v4856_v41 }
 0x279   : > { %v1231_v10 = vmax.f32 %v1199_v21, 0.0  ;;  %v1407_v52 = vpack.c.b16 %v1395_v30, %v1395_v30 }
 0x27b   : > { %1263 = vst.msk [vmem:[%s4639_s16 + $0xc8] sm:$0xff] %vm616_vm2, %v1231_v10 }
 0x27c   : > { %v743_v50 = vpop.f32.mrf.mxu2  ;;  %1443 = vmatmul.bf16.gmra.mxu3 %v3721_v60 }
 0x27d   : > { %v976_v1 = vmul.f32 %v4545_v39, %v743_v50  ;;  %v3729_v39 = vor.u32 %v3934_v56, %v3728_v4 }
 0x27f   : > { %v1200_v62 = vadd.f32 %v4686_v44, %v976_v1 }
 0x281   : > { %v1232_v0 = vmax.f32 %v1200_v62, 0.0  ;;  %v1311_v62 = vpop.permute.xlu1 %1310 }
 0x283   : > { %1264 = vst.msk [vmem:[%s4639_s16 + $0xd0] sm:$0xff] %vm616_vm2, %v1232_v0 }
 0x284   : > { %v745_v33 = vpop.f32.mrf.mxu2 }
 0x285   : > { %v977_v47 = vmul.f32 %v4672_v35, %v745_v33 }
 0x287   : > { %v1201_v54 = vadd.f32 %v4569_v51, %v977_v47 }
 0x289   : > { %v1233_v44 = vmax.f32 %v1201_v54, 0.0 }
 0x28b   : > { %1265 = vst.msk [vmem:[%s4639_s16 + $0xd8] sm:$0xff] %vm616_vm2, %v1233_v44  ;;  %v1294_v32 = vpack.c.bf16 %v1233_v44, %v1232_v0  ;;  %v1316_v0 = vpop.permute.xlu2 %1315 }
 0x28c   : > { %v748_v12 = vpop.f32.mrf.mxu2  ;;  %1448 = vmatmul.bf16.gmra.mxu3 %v3729_v39 }
 0x28d   : > { %v978_v58 = vmul.f32 %v4511_v26, %v748_v12  ;;  %v1406_v26 = vpack.c.b16 %v1394_v16, %v1394_v16  ;;  %v1321_v12 = vpop.permute.xlu0 %1320 }
 0x28f   : > { %v1202_v35 = vadd.f32 %v4663_v24, %v978_v58  ;;  %v1326_v58 = vpop.permute.xlu1 %1325 }
 0x291   : > { %v1234_v27 = vmax.f32 %v1202_v35, 0.0 }
 0x293   : > { %1266 = vst.msk [vmem:[%s4639_s16 + $0xe0] sm:$0xff] %vm616_vm2, %v1234_v27 }
 0x294   : > { %v750_v51 = vpop.f32.mrf.mxu2 }
 0x295   : > { %v979_v3 = vmul.f32 %v4655_v63, %v750_v51 }
 0x297   : > { %v1203_v13 = vadd.f32 %v4531_v34, %v979_v3 }
 0x299   : > { %v1235_v14 = vmax.f32 %v1203_v13, 0.0 }
 0x29b   : > { %1267 = vst.msk [vmem:[%s4639_s16 + $0xe8] sm:$0xff] %vm616_vm2, %v1235_v14  ;;  %v1295_v43 = vpack.c.bf16 %v1235_v14, %v1234_v27  ;;  %v1336_v14 = vpop.permute.xlu0 %1335 }
 0x29c   : > { %v753_v24 = vpop.f32.mrf.mxu2  ;;  %1453 = vmatmul.bf16.gmra.mxu3 %v1406_v26  ;;  %v1331_v26 = vpop.permute.xlu2 %1330 }
 0x29d   : > { %v980_v38 = vmul.f32 %v4489_v18, %v753_v24  ;;  %v1293_v18 = vpack.c.bf16 %v1231_v10, %v1230_v19  ;;  %v3733_v19 = vor.u32 %v3933_v59, %v3730_v25  ;;  %v1502_v10 = vld [vmem:[%s6148_s8] sm:$0xf] }
 0x29e   : > { %v1522_v50 = vsel %vm665_vm1, %v1502_v10, 0  ;;  %v3936_v10 = vld [vmem:[%s6149_s9 + $0x8] sm:$0xff] }
 0x29f   : > { %v1204_v6 = vadd.f32 %v4641_v40, %v980_v38  ;;  %1531 = vmatpush.bf16.msrb.mxu1 %v1522_v50  ;;  %v3939_v50 = vld [vmem:[%s6149_s9] sm:$0xff] }
 0x2a1   : > { %v1236_v15 = vmax.f32 %v1204_v6, 0.0 }
 0x2a3   : > { %1268 = vst.msk [vmem:[%s4639_s16 + $0xf0] sm:$0xff] %vm616_vm2, %v1236_v15 }
 0x2a4   : > { %v755_v46 = vpop.f32.mrf.mxu2 }
 0x2a5   : > { %v981_v55 = vmul.f32 %v4629_v28, %v755_v46  ;;  %v3698_v28 = vld [vmem:[%s6146_s6 + $0x8] sm:$0xf0] }
 0x2a7   : > { %v1205_v63 = vadd.f32 %v4499_v22, %v981_v55  ;;  %v3925_v22 = vld [vmem:[%s6146_s6 + $0x4] sm:$0xf] }
 0x2a8   : > { %v3701_v40 = vor.u32 %v3925_v22, %v3698_v28 }
 0x2a9   : > { %v1237_v17 = vmax.f32 %v1205_v63, 0.0 }
 0x2ab   : > { %1269 = vst.msk [vmem:[%s4639_s16 + $0xf8] sm:$0xff] %vm616_vm2, %v1237_v17  ;;  %v1296_v34 = vpack.c.bf16 %v1237_v17, %v1236_v15  ;;  %v1341_v17 = vpop.permute.xlu1 %1340  ;;  %s4113_s16 = scalar_lea.hbm %s6150_s10, 704 }
 0x2ad   : > { %1458 = vmatpush.bf16.msrb.mxu0 %v1296_v34  ;;  %v1346_v34 = vpop.permute.xlu2 %1345 }
 0x2b1   : > { %1459 = vmatpush.bf16.msrb.mxu0 %v1295_v43 }
 0x2b5   : > { %1460 = vmatpush.bf16.msrb.mxu0 %v1294_v32 }
 0x2b9   : > { %1461 = vmatpush.bf16.msrb.mxu0 %v1293_v18 }
 0x2bd   : > { %1462 = vmatpush.bf16.msrb.mxu0 %v1292_v31 }
 0x2c1   : > { %1463 = vmatpush.bf16.msrb.mxu0 %v4807_v53 }
 0x2c5   : > { %1464 = vmatpush.bf16.msrb.mxu0 %v4792_v61  ;;  %v3706_v61 = vld [vmem:[%s6146_s6 + $0x18] sm:$0xf0] }
 0x2c6   : > { %v3709_v49 = vor.u32 %v3927_v57, %v3706_v61  ;;  %v1351_v57 = vpop.permute.xlu0 %1350  ;;  %v1356_v61 = vpop.permute.xlu1 %1355 }
 0x2c9   : > { %1465 = vmatpush.bf16.msrb.mxu0 %v4776_v2  ;;  %v3714_v2 = vld [vmem:[%s6146_s6 + $0x28] sm:$0xf0] }
 0x2ca   : > { %v3717_v45 = vor.u32 %v3929_v5, %v3714_v2 }
 0x2cc   : > { %1466 = vmatmul.bf16.vlgmr.msrb.gmra.mxu0 %v3701_v40 }
 0x2cf   : > { %v1429_v29 = vpop.f32.mrf.mxu3 }
 0x2d0   : > { %v1430_v33 = vadd.f32 %v1429_v29, %v1311_v62 }
 0x2d7   : > { %v1431_v53 = vpop.f32.mrf.mxu3 }
 0x2d8   : > { %v1432_v47 = vadd.f32 %v1431_v53, %v1316_v0 }
 0x2dc   : > { %1471 = vmatmul.bf16.gmra.mxu0 %v3709_v49 }
 0x2df   : > { %v1434_v48 = vpop.f32.mrf.mxu3 }
 0x2e0   : > { %v1435_v35 = vadd.f32 %v1434_v48, %v1321_v12 }
 0x2e7   : > { %v1436_v20 = vpop.f32.mrf.mxu3 }
 0x2e8   : > { %v1437_v27 = vadd.f32 %v1436_v20, %v1326_v58 }
 0x2ec   : > { %1476 = vmatmul.bf16.gmra.mxu0 %v3717_v45 }
 0x2ef   : > { %v1439_v7 = vpop.f32.mrf.mxu3 }
 0x2f0   : > { %v1440_v24 = vadd.f32 %v1439_v7, %v1331_v26  ;;  %v1361_v7 = vpop.permute.xlu2 %1360 }
 0x2f7   : > { %v1441_v11 = vpop.f32.mrf.mxu3 }
 0x2f8   : > { %v1442_v38 = vadd.f32 %v1441_v11, %v1336_v14 }
 0x2fc   : > { %1481 = vmatmul.bf16.gmra.mxu0 %v3725_v42 }
 0x2ff   : > { %v1444_v31 = vpop.f32.mrf.mxu3 }
 0x300   : > { %v1445_v43 = vadd.f32 %v1444_v31, %v1341_v17 }
 0x307   : > { %v1446_v8 = vpop.f32.mrf.mxu3 }
 0x308   : > { %v1447_v32 = vadd.f32 %v1446_v8, %v1346_v34  ;;  %v3935_v8 = vld [vmem:[%s6149_s9] sm:$0xff] }
 0x30c   : > { %1486 = vmatmul.bf16.gmra.mxu0 %v3733_v19 }
 0x30f   : > { %v1449_v9 = vpop.f32.mrf.mxu3 }
 0x310   : > { %v1450_v53 = vadd.f32 %v1449_v9, %v1351_v57  ;;  %v3950_v57 = vld [vmem:[%s6149_s9 + $0x8] sm:$0xff] }
 0x317   : > { %v1451_v23 = vpop.f32.mrf.mxu3 }
 0x318   : > { %v1452_v49 = vadd.f32 %v1451_v23, %v1356_v61  ;;  %v3937_v23 = vld [vmem:[%s6149_s9] sm:$0xff]  ;;  %v3952_v61 = vld [vmem:[%s6149_s9 + $0x8] sm:$0xff] }
 0x31c   : > { %1491 = vmatmul.bf16.gmra.mxu0 %v1407_v52 }
 0x31f   : > { %v1454_v21 = vpop.f32.mrf.mxu3 }
 0x320   : > { %v1455_v36 = vadd.f32 %v1454_v21, %v1361_v7 }
 0x327   : > { %v1456_v60 = vpop.f32.mrf.mxu3 }
 0x349   : > { %v1467_v1 = vpop.f32.mrf.mxu0 }
 0x34a   : > { %v1468_v56 = vadd.f32 %v1467_v1, %v1430_v33  ;;  %v3938_v33 = vld [vmem:[%s6149_s9 + $0x8] sm:$0xff] }
 0x351   : > { %v1469_v4 = vpop.f32.mrf.mxu0 }
 0x352   : > { %v1470_v54 = vadd.f32 %v1469_v4, %v1432_v47 }
 0x354   : > { %v1496_v39 = vpack.c.bf16 %v1470_v54, %v1468_v56  ;;  %v3941_v54 = vld [vmem:[%s6149_s9] sm:$0xff] }
 0x356   : > { %3734 = vmatmul.msk.bf16.vlgmr.msrb.gmra.mxu1 %vm616_vm2, %v1496_v39  ;;  %v3940_v39 = vld [vmem:[%s6149_s9 + $0x8] sm:$0xff] }
 0x359   : > { %v1472_v44 = vpop.f32.mrf.mxu0 }
 0x35a   : > { %v1473_v51 = vadd.f32 %v1472_v44, %v1435_v35  ;;  %v3943_v35 = vld [vmem:[%s6149_s9] sm:$0xff] }
 0x361   : > { %v1474_v41 = vpop.f32.mrf.mxu0 }
 0x362   : > { %v1475_v16 = vadd.f32 %v1474_v41, %v1437_v27 }
 0x364   : > { %v1497_v3 = vpack.c.bf16 %v1475_v16, %v1473_v51  ;;  %v3945_v16 = vld [vmem:[%s6149_s9] sm:$0xff] }
 0x366   : > { %3735 = vmatmul.msk.bf16.gmra.mxu1 %vm616_vm2, %v1497_v3  ;;  %v3942_v3 = vld [vmem:[%s6149_s9 + $0x8] sm:$0xff] }
 0x369   : > { %v1477_v13 = vpop.f32.mrf.mxu0 }
 0x36a   : > { %v1478_v15 = vadd.f32 %v1477_v13, %v1440_v24  ;;  %v3944_v24 = vld [vmem:[%s6149_s9 + $0x8] sm:$0xff] }
 0x371   : > { %v1479_v6 = vpop.f32.mrf.mxu0 }
 0x372   : > { %v1480_v46 = vadd.f32 %v1479_v6, %v1442_v38 }
 0x374   : > { %v1498_v55 = vpack.c.bf16 %v1480_v46, %v1478_v15  ;;  %v3946_v46 = vld [vmem:[%s6149_s9 + $0x8] sm:$0xff] }
 0x376   : > { %3736 = vmatmul.msk.bf16.gmra.mxu1 %vm616_vm2, %v1498_v55  ;;  %v3947_v55 = vld [vmem:[%s6149_s9] sm:$0xff] }
 0x379   : > { %v1482_v63 = vpop.f32.mrf.mxu0 }
 0x37a   : > { %v1483_v22 = vadd.f32 %v1482_v63, %v1445_v43  ;;  %v3949_v43 = vld [vmem:[%s6149_s9] sm:$0xff] }
 0x381   : > { %v1484_v18 = vpop.f32.mrf.mxu0 }
 0x382   : > { %v1485_v28 = vadd.f32 %v1484_v18, %v1447_v32 }
 0x384   : > { %v1499_v40 = vpack.c.bf16 %v1485_v28, %v1483_v22  ;;  %v3951_v28 = vld [vmem:[%s6149_s9] sm:$0xff] }
 0x386   : > { %3737 = vmatmul.msk.bf16.gmra.mxu1 %vm616_vm2, %v1499_v40  ;;  %v3948_v40 = vld [vmem:[%s6149_s9 + $0x8] sm:$0xff] }
 0x389   : > { %v1487_v29 = vpop.f32.mrf.mxu0 }
 0x38a   : > { %v1488_v5 = vadd.f32 %v1487_v29, %v1450_v53  ;;  %v3953_v53 = vld [vmem:[%s6149_s9] sm:$0xff] }
 0x391   : > { %v1489_v48 = vpop.f32.mrf.mxu0 }
 0x392   : > { %v1490_v2 = vadd.f32 %v1489_v48, %v1452_v49  ;;  %v3955_v49 = vld [vmem:[%s6149_s9] sm:$0xff]  ;;  %v3954_v48 = vld [vmem:[%s6149_s9 + $0x8] sm:$0xff] }
 0x394   : > { %v1500_v20 = vpack.c.bf16 %v1490_v2, %v1488_v5  ;;  %v3956_v5 = vld [vmem:[%s6149_s9 + $0x8] sm:$0xff] }
 0x396   : > { %3738 = vmatmul.msk.bf16.gmra.mxu1 %vm616_vm2, %v1500_v20 }
 0x399   : > { %v1492_v45 = vpop.f32.mrf.mxu0 }
 0x39a   : > { %v1493_v37 = vadd.f32 %v1492_v45, %v1455_v36 }
 0x39c   : > { %v1501_v42 = vpack.c.bf16 %v1493_v37, %v1493_v37 }
 0x3a1   : > { %v1494_v11 = vpop.f32.mrf.mxu0 }
 0x3a6   : > { %3739 = vmatmul.msk.bf16.gmra.mxu1 %vm616_vm2, %v1501_v42 }
 0x3d3   : > { %v1533_v31 = vpop.f32.mrf.mxu1 }
 0x3d4   : > { %v1581_v59 = vpack.c.bf16 %v1533_v31, %v1533_v31 }
 0x3d6   : > { %v1599_v25 = vsel %vm665_vm1, %v1581_v59, 0 }
 0x3d7   : > { %1608 = vmatpush.bf16.msra.mxu1 %v1599_v25 }
 0x3da   : > { %3748 = vmatmul.msk.bf16.vlgmr.msra.gmra.mxu1 %vm616_vm2, %v3935_v8 }
 0x3db   : > { %v1535_v19 = vpop.f32.mrf.mxu1 }
 0x3dc   : > { %v1750_v9 = vpack.c.bf16 %v1535_v19, %v1535_v19 }
 0x3de   : > { %v1768_v30 = vsel %vm665_vm1, %v1750_v9, 0 }
 0x3df   : > { %1777 = vmatpush.bf16.msrb.mxu3 %v1768_v30 }
 0x3e2   : > { %3758 = vmatmul.msk.bf16.vlgmr.msrb.gmra.mxu3 %vm616_vm2, %v3937_v23 }
 0x3e3   : > { %v1538_v52 = vpop.f32.mrf.mxu1 }
 0x3e4   : > { %v1920_v21 = vpack.c.bf16 %v1538_v52, %v1538_v52 }
 0x3e6   : > { %v1938_v60 = vsel %vm665_vm1, %v1920_v21, 0 }
 0x3e7   : > { %1947 = vmatpush.bf16.msra.mxu0 %v1938_v60 }
 0x3ea   : > { %3749 = vmatmul.msk.bf16.gmra.mxu1 %vm616_vm2, %v3936_v10  ;;  %3773 = vmatmul.msk.bf16.vlgmr.msra.gmra.mxu0 %vm616_vm2, %v3939_v50 }
 0x3eb   : > { %v1540_v1 = vpop.f32.mrf.mxu1 }
 0x3ec   : > { %v2090_v62 = vpack.c.bf16 %v1540_v1, %v1540_v1 }
 0x3ee   : > { %v2108_v0 = vsel %vm665_vm1, %v2090_v62, 0 }
 0x3ef   : > { %2117 = vmatpush.bf16.msrb.mxu1 %v2108_v0 }
 0x3f2   : > { %3759 = vmatmul.msk.bf16.gmra.mxu3 %vm616_vm2, %v3938_v33 }
 0x3f3   : > { %v1543_v47 = vpop.f32.mrf.mxu1 }
 0x3f4   : > { %v2260_v4 = vpack.c.bf16 %v1543_v47, %v1543_v47 }
 0x3f6   : > { %v2278_v56 = vsel %vm665_vm1, %v2260_v4, 0 }
 0x3f7   : > { %2287 = vmatpush.bf16.msra.mxu3 %v2278_v56 }
 0x3fa   : > { %3788 = vmatmul.msk.bf16.vlgmr.msrb.gmra.mxu1 %vm616_vm2, %v3941_v54  ;;  %3774 = vmatmul.msk.bf16.gmra.mxu0 %vm616_vm2, %v3940_v39 }
 0x3fb   : > { %v1545_v44 = vpop.f32.mrf.mxu1 }
 0x3fc   : > { %v2430_v12 = vpack.c.bf16 %v1545_v44, %v1545_v44 }
 0x3fe   : > { %v2448_v58 = vsel %vm665_vm1, %v2430_v12, 0 }
 0x3ff   : > { %2457 = vmatpush.bf16.msrb.mxu0 %v2448_v58 }
 0x402   : > { %3803 = vmatmul.msk.bf16.vlgmr.msra.gmra.mxu3 %vm616_vm2, %v3943_v35 }
 0x403   : > { %v1548_v27 = vpop.f32.mrf.mxu1 }
 0x404   : > { %v2600_v41 = vpack.c.bf16 %v1548_v27, %v1548_v27 }
 0x406   : > { %v2618_v51 = vsel %vm665_vm1, %v2600_v41, 0 }
 0x407   : > { %2627 = vmatpush.bf16.msra.mxu1 %v2618_v51 }
 0x40a   : > { %3818 = vmatmul.msk.bf16.vlgmr.msrb.gmra.mxu0 %vm616_vm2, %v3945_v16  ;;  %3789 = vmatmul.msk.bf16.gmra.mxu1 %vm616_vm2, %v3942_v3 }
 0x40b   : > { %v1550_v13 = vpop.f32.mrf.mxu1 }
 0x40c   : > { %v2770_v26 = vpack.c.bf16 %v1550_v13, %v1550_v13 }
 0x40e   : > { %v2788_v14 = vsel %vm665_vm1, %v2770_v26, 0 }
 0x40f   : > { %2797 = vmatpush.bf16.msrb.mxu3 %v2788_v14 }
 0x412   : > { %3804 = vmatmul.msk.bf16.gmra.mxu3 %vm616_vm2, %v3944_v24 }
 0x413   : > { %v1553_v38 = vpop.f32.mrf.mxu1 }
 0x414   : > { %v2940_v6 = vpack.c.bf16 %v1553_v38, %v1553_v38 }
 0x416   : > { %v2958_v15 = vsel %vm665_vm1, %v2940_v6, 0 }
 0x417   : > { %2967 = vmatpush.bf16.msra.mxu0 %v2958_v15 }
 0x41a   : > { %3819 = vmatmul.msk.bf16.gmra.mxu0 %vm616_vm2, %v3946_v46  ;;  %3833 = vmatmul.msk.bf16.vlgmr.msra.gmra.mxu1 %vm616_vm2, %v3947_v55 }
 0x41b   : > { %v1555_v63 = vpop.f32.mrf.mxu1 }
 0x41c   : > { %v3110_v17 = vpack.c.bf16 %v1555_v63, %v1555_v63 }
 0x41e   : > { %v3128_v34 = vsel %vm665_vm1, %v3110_v17, 0 }
 0x41f   : > { %3137 = vmatpush.bf16.msrb.mxu1 %v3128_v34 }
 0x422   : > { %3848 = vmatmul.msk.bf16.vlgmr.msrb.gmra.mxu3 %vm616_vm2, %v3949_v43 }
 0x423   : > { %v1558_v32 = vpop.f32.mrf.mxu1 }
 0x424   : > { %v3280_v18 = vpack.c.bf16 %v1558_v32, %v1558_v32 }
 0x426   : > { %v3298_v22 = vsel %vm665_vm1, %v3280_v18, 0 }
 0x427   : > { %3307 = vmatpush.bf16.msra.mxu3 %v3298_v22 }
 0x42a   : > { %3863 = vmatmul.msk.bf16.vlgmr.msra.gmra.mxu0 %vm616_vm2, %v3951_v28  ;;  %3834 = vmatmul.msk.bf16.gmra.mxu1 %vm616_vm2, %v3948_v40 }
 0x42b   : > { %v1560_v29 = vpop.f32.mrf.mxu1 }
 0x432   : > { %3849 = vmatmul.msk.bf16.gmra.mxu3 %vm616_vm2, %v3950_v57 }
 0x43a   : > { %3864 = vmatmul.msk.bf16.gmra.mxu0 %vm616_vm2, %v3952_v61  ;;  %3878 = vmatmul.msk.bf16.vlgmr.msrb.gmra.mxu1 %vm616_vm2, %v3953_v53 }
 0x442   : > { %3893 = vmatmul.msk.bf16.vlgmr.msra.gmra.mxu3 %vm616_vm2, %v3955_v49 }
 0x44a   : > { %3879 = vmatmul.msk.bf16.gmra.mxu1 %vm616_vm2, %v3954_v48 }
 0x452   : > { %3894 = vmatmul.msk.bf16.gmra.mxu3 %vm616_vm2, %v3956_v5 }
 0x457   : > { %v5016_v2 = vpop.f32.mrf.mxu1 }
 0x458   : > { %v1620_v20 = vmul.f32 0.5, %v5016_v2  ;;  %v1640_v45 = vsel %vm453_vm0, %v5016_v2, -inf }
 0x459   : > { %1641 = vmax.xlane.f32.xlu0 %v1640_v45 }
 0x45a   : > { %4005 = vtanh.f32 %v1620_v20 }
 0x45f   : > { %v5024_v7 = vpop.f32.mrf.mxu1 }
 0x460   : > { %v4006_v36 = vpop.eup %4005  ;;  %v1621_v37 = vmul.f32 0.5, %v5024_v7  ;;  %v1643_v11 = vsel %vm453_vm0, %v5024_v7, -inf }
 0x461   : > { %v1628_v42 = vmul.f32 0.5, %v4006_v36  ;;  %1644 = vmax.xlane.f32.xlu1 %v1643_v11 }
 0x462   : > { %4007 = vtanh.f32 %v1621_v37 }
 0x463   : > { %v1632_v31 = vadd.f32 0.5, %v1628_v42 }
 0x465   : > { %1636 = vst.msk [vmem:[%s5029_s30] sm:$0xff] %vm453_vm0, %v1632_v31  ;;  %v5033_v59 = vpop.f32.mrf.mxu3 }
 0x466   : > { %v1789_v25 = vmul.f32 0.5, %v5033_v59  ;;  %v1810_v8 = vsel %vm453_vm0, %v5033_v59, -inf }
 0x467   : > { %1811 = vmax.xlane.f32.xlu2 %v1810_v8  ;;  %v5038_v19 = vpop.f32.mrf.mxu1  ;;  %v5040_v9 = vpop.f32.mrf.mxu0 }
 0x468   : > { %v4008_v30 = vpop.eup %4007  ;;  %4009 = vtanh.f32 %v1789_v25  ;;  %v1622_v23 = vmul.f32 0.5, %v5038_v19  ;;  %v1959_v52 = vmul.f32 0.5, %v5040_v9  ;;  %v1646_v10 = vsel %vm453_vm0, %v5038_v19, -inf }
 0x469   : > { %v1629_v21 = vmul.f32 0.5, %v4008_v30  ;;  %v1980_v51 = vsel %vm453_vm0, %v5040_v9, -inf }
 0x46a   : > { %4011 = vtanh.f32 %v1622_v23 }
 0x46b   : > { %v1633_v60 = vadd.f32 0.5, %v1629_v21  ;;  %4013 = vtanh.f32 %v1959_v52 }
 0x46d   : > { %1637 = vst.msk [vmem:[%s5029_s30 + $0x8] sm:$0xff] %vm453_vm0, %v1633_v60  ;;  %v5048_v50 = vpop.f32.mrf.mxu3 }
 0x46e   : > { %v4010_v1 = vpop.eup %4009  ;;  %v1790_v62 = vmul.f32 0.5, %v5048_v50  ;;  %v1813_v0 = vsel %vm453_vm0, %v5048_v50, -inf }
 0x46f   : > { %v1797_v33 = vmul.f32 0.5, %v4010_v1  ;;  %1647 = vmax.xlane.f32.xlu2 %v1646_v10  ;;  %v5053_v47 = vpop.f32.mrf.mxu1  ;;  %v5055_v4 = vpop.f32.mrf.mxu0  ;;  %1814 = vmax.xlane.f32.xlu0 %v1813_v0 }
 0x470   : > { %v4012_v56 = vpop.eup %4011  ;;  %v1623_v54 = vmul.f32 0.5, %v5053_v47  ;;  %4015 = vtanh.f32 %v1790_v62  ;;  %v1960_v39 = vmul.f32 0.5, %v5055_v4  ;;  %v1983_v3 = vsel %vm453_vm0, %v5055_v4, -inf }
 0x471   : > { %v4014_v44 = vpop.eup %4013  ;;  %v1801_v12 = vadd.f32 0.5, %v1797_v33  ;;  %v1630_v58 = vmul.f32 0.5, %v4012_v56  ;;  %v1649_v29 = vsel %vm453_vm0, %v5053_v47, -inf }
 0x472   : > { %v1967_v35 = vmul.f32 0.5, %v4014_v44  ;;  %4017 = vtanh.f32 %v1623_v54 }
 0x473   : > { %3760 = vst.msk [vmem:[%s5029_s30 + $0x20] sm:$0xff] %vm453_vm0, %v1801_v12  ;;  %v1634_v27 = vadd.f32 0.5, %v1630_v58  ;;  %4019 = vtanh.f32 %v1960_v39 }
 0x474   : > { %v1971_v41 = vadd.f32 0.5, %v1967_v35 }
 0x475   : > { %1638 = vst.msk [vmem:[%s5029_s30 + $0x10] sm:$0xff] %vm453_vm0, %v1634_v27  ;;  %v5065_v16 = vpop.f32.mrf.mxu3 }
 0x476   : > { %v4016_v13 = vpop.eup %4015  ;;  %3775 = vst.msk [vmem:[%s5029_s30 + $0x40] sm:$0xff] %vm453_vm0, %v1971_v41  ;;  %v1791_v26 = vmul.f32 0.5, %v5065_v16  ;;  %v1816_v14 = vsel %vm453_vm0, %v5065_v16, -inf }
 0x477   : > { %1981 = vmax.xlane.f32.xlu2 %v1980_v51  ;;  %v1798_v24 = vmul.f32 0.5, %v4016_v13  ;;  %v5074_v38 = vpop.f32.mrf.mxu1  ;;  %v5076_v6 = vpop.f32.mrf.mxu0  ;;  %1817 = vmax.xlane.f32.xlu1 %v1816_v14 }
 0x478   : > { %v4018_v15 = vpop.eup %4017  ;;  %4021 = vtanh.f32 %v1791_v26  ;;  %v2129_v46 = vmul.f32 0.5, %v5074_v38  ;;  %v1961_v55 = vmul.f32 0.5, %v5076_v6  ;;  %1984 = vmax.xlane.f32.xlu0 %v1983_v3  ;;  %v1986_v22 = vsel %vm453_vm0, %v5076_v6, -inf }
 0x479   : > { %v4020_v63 = vpop.eup %4019  ;;  %v1631_v17 = vmul.f32 0.5, %v4018_v15  ;;  %v1802_v34 = vadd.f32 0.5, %v1798_v24  ;;  %v2150_v25 = vsel %vm453_vm0, %v5074_v38, -inf }
 0x47a   : > { %v1968_v43 = vmul.f32 0.5, %v4020_v63  ;;  %4023 = vtanh.f32 %v2129_v46 }
 0x47b   : > { %v1635_v32 = vadd.f32 0.5, %v1631_v17  ;;  %3761 = vst.msk [vmem:[%s5029_s30 + $0x28] sm:$0xff] %vm453_vm0, %v1802_v34  ;;  %4025 = vtanh.f32 %v1961_v55 }
 0x47c   : > { %v1972_v18 = vadd.f32 0.5, %v1968_v43 }
 0x47d   : > { %1639 = vst.msk [vmem:[%s5029_s30 + $0x18] sm:$0xff] %vm453_vm0, %v1635_v32  ;;  %v5086_v28 = vpop.f32.mrf.mxu3 }
 0x47e   : > { %v4022_v40 = vpop.eup %4021  ;;  %3776 = vst.msk [vmem:[%s5029_s30 + $0x48] sm:$0xff] %vm453_vm0, %v1972_v18  ;;  %v1792_v57 = vmul.f32 0.5, %v5086_v28  ;;  %v1819_v41 = vsel %vm453_vm0, %v5086_v28, -inf }
 0x47f   : > { %1650 = vmax.xlane.f32.xlu2 %v1649_v29  ;;  %v1799_v61 = vmul.f32 0.5, %v4022_v40  ;;  %v5093_v53 = vpop.f32.mrf.mxu0  ;;  %1987 = vmax.xlane.f32.xlu1 %v1986_v22  ;;  %v5095_v49 = vpop.f32.mrf.mxu1 }
 0x480   : > { %v4024_v48 = vpop.eup %4023  ;;  %4027 = vtanh.f32 %v1792_v57  ;;  %v1962_v5 = vmul.f32 0.5, %v5093_v53  ;;  %v2130_v20 = vmul.f32 0.5, %v5095_v49  ;;  %v2153_v11 = vsel %vm453_vm0, %v5095_v49, -inf }
 0x481   : > { %v4026_v45 = vpop.eup %4025  ;;  %v1803_v36 = vadd.f32 0.5, %v1799_v61  ;;  %v2137_v37 = vmul.f32 0.5, %v4024_v48  ;;  %2154 = vmax.xlane.f32.xlu0 %v2153_v11  ;;  %v1989_v29 = vsel %vm453_vm0, %v5093_v53, -inf }
 0x482   : > { %v1969_v42 = vmul.f32 0.5, %v4026_v45  ;;  %4029 = vtanh.f32 %v1962_v5 }
 0x483   : > { %3762 = vst.msk [vmem:[%s5029_s30 + $0x30] sm:$0xff] %vm453_vm0, %v1803_v36  ;;  %v2141_v31 = vadd.f32 0.5, %v2137_v37  ;;  %4031 = vtanh.f32 %v2130_v20 }
 0x484   : > { %v1973_v8 = vadd.f32 0.5, %v1969_v42 }
 0x485   : > { %3790 = vst.msk [vmem:[%s5029_s30 + $0x60] sm:$0xff] %vm453_vm0, %v2141_v31  ;;  %v5107_v30 = vpop.f32.mrf.mxu3 }
 0x486   : > { %v4028_v23 = vpop.eup %4027  ;;  %3777 = vst.msk [vmem:[%s5029_s30 + $0x50] sm:$0xff] %vm453_vm0, %v1973_v8  ;;  %v2299_v52 = vmul.f32 0.5, %v5107_v30 }
 0x487   : > { %2151 = vmax.xlane.f32.xlu2 %v2150_v25  ;;  %v1800_v21 = vmul.f32 0.5, %v4028_v23  ;;  %v5112_v60 = vpop.f32.mrf.mxu0  ;;  %v5114_v10 = vpop.f32.mrf.mxu1  ;;  %v2320_v23 = vsel %vm453_vm0, %v5107_v30, -inf }
 0x488   : > { %v4030_v1 = vpop.eup %4029  ;;  %4033 = vtanh.f32 %v2299_v52  ;;  %v2469_v62 = vmul.f32 0.5, %v5112_v60  ;;  %v2131_v0 = vmul.f32 0.5, %v5114_v10  ;;  %v2156_v33 = vsel %vm453_vm0, %v5114_v10, -inf }
 0x489   : > { %v4032_v56 = vpop.eup %4031  ;;  %v1804_v54 = vadd.f32 0.5, %v1800_v21  ;;  %v1970_v39 = vmul.f32 0.5, %v4030_v1  ;;  %2157 = vmax.xlane.f32.xlu1 %v2156_v33 }
 0x48a   : > { %v2138_v44 = vmul.f32 0.5, %v4032_v56  ;;  %4035 = vtanh.f32 %v2469_v62 }
 0x48b   : > { %3763 = vst.msk [vmem:[%s5029_s30 + $0x38] sm:$0xff] %vm453_vm0, %v1804_v54  ;;  %v1974_v12 = vadd.f32 0.5, %v1970_v39  ;;  %4037 = vtanh.f32 %v2131_v0 }
 0x48c   : > { %v2142_v58 = vadd.f32 0.5, %v2138_v44 }
 0x48d   : > { %3778 = vst.msk [vmem:[%s5029_s30 + $0x58] sm:$0xff] %vm453_vm0, %v1974_v12  ;;  %v5124_v35 = vpop.f32.mrf.mxu3 }
 0x48e   : > { %v4034_v27 = vpop.eup %4033  ;;  %3791 = vst.msk [vmem:[%s5029_s30 + $0x68] sm:$0xff] %vm453_vm0, %v2142_v58  ;;  %v2300_v51 = vmul.f32 0.5, %v5124_v35  ;;  %v2323_v3 = vsel %vm453_vm0, %v5124_v35, -inf }
 0x48f   : > { %1820 = vmax.xlane.f32.xlu2 %v1819_v41  ;;  %v2307_v13 = vmul.f32 0.5, %v4034_v27  ;;  %v5133_v26 = vpop.f32.mrf.mxu0  ;;  %v5135_v14 = vpop.f32.mrf.mxu1  ;;  %2324 = vmax.xlane.f32.xlu0 %v2323_v3 }
 0x490   : > { %v4036_v24 = vpop.eup %4035  ;;  %4039 = vtanh.f32 %v2300_v51  ;;  %v2470_v15 = vmul.f32 0.5, %v5133_v26  ;;  %v2132_v46 = vmul.f32 0.5, %v5135_v14  ;;  %v2493_v22 = vsel %vm453_vm0, %v5133_v26, -inf }
 0x491   : > { %v4038_v55 = vpop.eup %4037  ;;  %v2311_v63 = vadd.f32 0.5, %v2307_v13  ;;  %v2477_v17 = vmul.f32 0.5, %v4036_v24  ;;  %v2490_v24 = vsel %vm453_vm0, %v5112_v60, -inf }
 0x492   : > { %v2139_v34 = vmul.f32 0.5, %v4038_v55  ;;  %4041 = vtanh.f32 %v2470_v15 }
 0x493   : > { %3805 = vst.msk [vmem:[%s5029_s30 + $0x80] sm:$0xff] %vm453_vm0, %v2311_v63  ;;  %v2481_v43 = vadd.f32 0.5, %v2477_v17  ;;  %4043 = vtanh.f32 %v2132_v46 }
 0x494   : > { %v2143_v32 = vadd.f32 0.5, %v2139_v34 }
 0x495   : > { %3820 = vst.msk [vmem:[%s5029_s30 + $0xa0] sm:$0xff] %vm453_vm0, %v2481_v43  ;;  %v5143_v18 = vpop.f32.mrf.mxu3 }
 0x496   : > { %v4040_v40 = vpop.eup %4039  ;;  %3792 = vst.msk [vmem:[%s5029_s30 + $0x70] sm:$0xff] %vm453_vm0, %v2143_v32  ;;  %v2301_v57 = vmul.f32 0.5, %v5143_v18  ;;  %v2326_v61 = vsel %vm453_vm0, %v5143_v18, -inf }
 0x497   : > { %1990 = vmax.xlane.f32.xlu2 %v1989_v29  ;;  %v2308_v48 = vmul.f32 0.5, %v4040_v40  ;;  %v5154_v5 = vpop.f32.mrf.mxu0  ;;  %2327 = vmax.xlane.f32.xlu1 %v2326_v61  ;;  %v5156_v20 = vpop.f32.mrf.mxu1 }
 0x498   : > { %v4042_v45 = vpop.eup %4041  ;;  %4045 = vtanh.f32 %v2301_v57  ;;  %v2471_v36 = vmul.f32 0.5, %v5154_v5  ;;  %v2639_v37 = vmul.f32 0.5, %v5156_v20  ;;  %2494 = vmax.xlane.f32.xlu0 %v2493_v22  ;;  %v2496_v21 = vsel %vm453_vm0, %v5154_v5, -inf }
 0x499   : > { %v4044_v11 = vpop.eup %4043  ;;  %v2312_v42 = vadd.f32 0.5, %v2308_v48  ;;  %v2478_v31 = vmul.f32 0.5, %v4042_v45 }
 0x49a   : > { %v2140_v25 = vmul.f32 0.5, %v4044_v11  ;;  %4047 = vtanh.f32 %v2471_v36 }
 0x49b   : > { %3806 = vst.msk [vmem:[%s5029_s30 + $0x88] sm:$0xff] %vm453_vm0, %v2312_v42  ;;  %v2482_v8 = vadd.f32 0.5, %v2478_v31  ;;  %4049 = vtanh.f32 %v2639_v37 }
 0x49c   : > { %v2144_v52 = vadd.f32 0.5, %v2140_v25  ;;  %v2159_v25 = vsel %vm453_vm0, %v5135_v14, -inf }
 0x49d   : > { %3821 = vst.msk [vmem:[%s5029_s30 + $0xa8] sm:$0xff] %vm453_vm0, %v2482_v8  ;;  %v5168_v1 = vpop.f32.mrf.mxu3 }
 0x49e   : > { %v4046_v62 = vpop.eup %4045  ;;  %3793 = vst.msk [vmem:[%s5029_s30 + $0x78] sm:$0xff] %vm453_vm0, %v2144_v52  ;;  %v2302_v0 = vmul.f32 0.5, %v5168_v1 }
 0x49f   : > { %2321 = vmax.xlane.f32.xlu2 %v2320_v23  ;;  %v2309_v33 = vmul.f32 0.5, %v4046_v62  ;;  %v5173_v56 = vpop.f32.mrf.mxu0  ;;  %2497 = vmax.xlane.f32.xlu1 %v2496_v21  ;;  %v5175_v54 = vpop.f32.mrf.mxu1 }
 0x4a0   : > { %v4048_v39 = vpop.eup %4047  ;;  %4051 = vtanh.f32 %v2302_v0  ;;  %v2472_v44 = vmul.f32 0.5, %v5173_v56  ;;  %v2640_v12 = vmul.f32 0.5, %v5175_v54  ;;  %v2663_v58 = vsel %vm453_vm0, %v5175_v54, -inf }
 0x4a1   : > { %v4050_v27 = vpop.eup %4049  ;;  %v2313_v41 = vadd.f32 0.5, %v2309_v33  ;;  %v2479_v51 = vmul.f32 0.5, %v4048_v39  ;;  %2664 = vmax.xlane.f32.xlu0 %v2663_v58 }
 0x4a2   : > { %4053 = vtanh.f32 %v2472_v44  ;;  %v2647_v3 = vmul.f32 0.5, %v4050_v27 }
 0x4a3   : > { %3807 = vst.msk [vmem:[%s5029_s30 + $0x90] sm:$0xff] %vm453_vm0, %v2313_v41  ;;  %v2483_v13 = vadd.f32 0.5, %v2479_v51  ;;  %4055 = vtanh.f32 %v2640_v12  ;;  %v2660_v51 = vsel %vm453_vm0, %v5156_v20, -inf }
 0x4a4   : > { %v2651_v15 = vadd.f32 0.5, %v2647_v3 }
 0x4a5   : > { %3822 = vst.msk [vmem:[%s5029_s30 + $0xb0] sm:$0xff] %vm453_vm0, %v2483_v13  ;;  %v5187_v46 = vpop.f32.mrf.mxu3 }
 0x4a6   : > { %v4052_v55 = vpop.eup %4051  ;;  %3835 = vst.msk [vmem:[%s5029_s30 + $0xc0] sm:$0xff] %vm453_vm0, %v2651_v15  ;;  %v2809_v63 = vmul.f32 0.5, %v5187_v46  ;;  %v2830_v17 = vsel %vm453_vm0, %v5187_v46, -inf }
 0x4a7   : > { %2491 = vmax.xlane.f32.xlu2 %v2490_v24  ;;  %v2310_v34 = vmul.f32 0.5, %v4052_v55  ;;  %v5194_v43 = vpop.f32.mrf.mxu0  ;;  %2831 = vmax.xlane.f32.xlu1 %v2830_v17  ;;  %v5196_v32 = vpop.f32.mrf.mxu1 }
 0x4a8   : > { %v4054_v22 = vpop.eup %4053  ;;  %4057 = vtanh.f32 %v2809_v63  ;;  %v2979_v40 = vmul.f32 0.5, %v5194_v43  ;;  %v2641_v29 = vmul.f32 0.5, %v5196_v32  ;;  %v2666_v11 = vsel %vm453_vm0, %v5196_v32, -inf }
 0x4a9   : > { %v4056_v57 = vpop.eup %4055  ;;  %v2314_v61 = vadd.f32 0.5, %v2310_v34  ;;  %v2480_v48 = vmul.f32 0.5, %v4054_v22 }
 0x4aa   : > { %v2648_v45 = vmul.f32 0.5, %v4056_v57  ;;  %4059 = vtanh.f32 %v2979_v40 }
 0x4ab   : > { %3808 = vst.msk [vmem:[%s5029_s30 + $0x98] sm:$0xff] %vm453_vm0, %v2314_v61  ;;  %v2484_v36 = vadd.f32 0.5, %v2480_v48  ;;  %4061 = vtanh.f32 %v2641_v29 }
 0x4ac   : > { %v2652_v37 = vadd.f32 0.5, %v2648_v45 }
 0x4ad   : > { %3823 = vst.msk [vmem:[%s5029_s30 + $0xb8] sm:$0xff] %vm453_vm0, %v2484_v36  ;;  %v5206_v42 = vpop.f32.mrf.mxu3 }
 0x4ae   : > { %v4058_v31 = vpop.eup %4057  ;;  %3836 = vst.msk [vmem:[%s5029_s30 + $0xc8] sm:$0xff] %vm453_vm0, %v2652_v37  ;;  %v2810_v8 = vmul.f32 0.5, %v5206_v42 }
 0x4af   : > { %2160 = vmax.xlane.f32.xlu2 %v2159_v25  ;;  %v2817_v23 = vmul.f32 0.5, %v4058_v31  ;;  %v5213_v52 = vpop.f32.mrf.mxu0  ;;  %2667 = vmax.xlane.f32.xlu1 %v2666_v11  ;;  %v5215_v21 = vpop.f32.mrf.mxu1 }
 0x4b0   : > { %v4060_v62 = vpop.eup %4059  ;;  %4063 = vtanh.f32 %v2810_v8  ;;  %v2980_v0 = vmul.f32 0.5, %v5213_v52  ;;  %v2642_v33 = vmul.f32 0.5, %v5215_v21  ;;  %v3003_v39 = vsel %vm453_vm0, %v5213_v52, -inf }
 0x4b1   : > { %v4062_v44 = vpop.eup %4061  ;;  %v2821_v12 = vadd.f32 0.5, %v2817_v23  ;;  %v2987_v58 = vmul.f32 0.5, %v4060_v62  ;;  %3004 = vmax.xlane.f32.xlu0 %v3003_v39  ;;  %v2329_v8 = vsel %vm453_vm0, %v5168_v1, -inf }
 0x4b2   : > { %v2649_v27 = vmul.f32 0.5, %v4062_v44  ;;  %4065 = vtanh.f32 %v2980_v0 }
 0x4b3   : > { %3850 = vst.msk [vmem:[%s5029_s30 + $0xe0] sm:$0xff] %vm453_vm0, %v2821_v12  ;;  %v2991_v41 = vadd.f32 0.5, %v2987_v58  ;;  %4067 = vtanh.f32 %v2642_v33 }
 0x4b4   : > { %v2653_v3 = vadd.f32 0.5, %v2649_v27 }
 0x4b5   : > { %3865 = vst.msk [vmem:[%s5029_s30 + $0x100] sm:$0xff] %vm453_vm0, %v2991_v41  ;;  %v5227_v13 = vpop.f32.mrf.mxu3 }
 0x4b6   : > { %v4064_v24 = vpop.eup %4063  ;;  %3837 = vst.msk [vmem:[%s5029_s30 + $0xd0] sm:$0xff] %vm453_vm0, %v2653_v3  ;;  %v2811_v15 = vmul.f32 0.5, %v5227_v13  ;;  %v2836_v55 = vsel %vm453_vm0, %v5227_v13, -inf }
 0x4b7   : > { %2661 = vmax.xlane.f32.xlu2 %v2660_v51  ;;  %v2818_v63 = vmul.f32 0.5, %v4064_v24  ;;  %v5234_v17 = vpop.f32.mrf.mxu0  ;;  %v5236_v34 = vpop.f32.mrf.mxu1 }
 0x4b8   : > { %v4066_v22 = vpop.eup %4065  ;;  %4069 = vtanh.f32 %v2811_v15  ;;  %v2981_v40 = vmul.f32 0.5, %v5234_v17  ;;  %v3006_v29 = vsel %vm453_vm0, %v5234_v17, -inf  ;;  %v3149_v57 = vmul.f32 0.5, %v5236_v34 }
 0x4b9   : > { %v4068_v61 = vpop.eup %4067  ;;  %v2822_v48 = vadd.f32 0.5, %v2818_v63  ;;  %v2988_v45 = vmul.f32 0.5, %v4066_v22  ;;  %3007 = vmax.xlane.f32.xlu1 %v3006_v29  ;;  %2837 = vmax.xlane.f32.xlu0 %v2836_v55  ;;  %v3170_v44 = vsel %vm453_vm0, %v5236_v34, -inf }
 0x4ba   : > { %v2650_v36 = vmul.f32 0.5, %v4068_v61  ;;  %4071 = vtanh.f32 %v2981_v40  ;;  %v2499_v40 = vsel %vm453_vm0, %v5173_v56, -inf }
 0x4bb   : > { %3851 = vst.msk [vmem:[%s5029_s30 + $0xe8] sm:$0xff] %vm453_vm0, %v2822_v48  ;;  %v2992_v37 = vadd.f32 0.5, %v2988_v45  ;;  %4073 = vtanh.f32 %v3149_v57 }
 0x4bc   : > { %v2654_v11 = vadd.f32 0.5, %v2650_v36 }
 0x4bd   : > { %3866 = vst.msk [vmem:[%s5029_s30 + $0x108] sm:$0xff] %vm453_vm0, %v2992_v37  ;;  %v5246_v31 = vpop.f32.mrf.mxu3 }
 0x4be   : > { %v4070_v25 = vpop.eup %4069  ;;  %3838 = vst.msk [vmem:[%s5029_s30 + $0xd8] sm:$0xff] %vm453_vm0, %v2654_v11  ;;  %v2812_v23 = vmul.f32 0.5, %v5246_v31  ;;  %v2839_v62 = vsel %vm453_vm0, %v5246_v31, -inf }
 0x4bf   : > { %2330 = vmax.xlane.f32.xlu2 %v2329_v8  ;;  %v2819_v0 = vmul.f32 0.5, %v4070_v25  ;;  %v5255_v33 = vpop.f32.mrf.mxu1  ;;  %v5257_v39 = vpop.f32.mrf.mxu0 }
 0x4c0   : > { %6207 = vst [vmem:[#allocation7_spill] sm:$0xff] %v5257_v39  ;;  %v4072_v12 = vpop.eup %4071  ;;  %4075 = vtanh.f32 %v2812_v23  ;;  %v3150_v58 = vmul.f32 0.5, %v5255_v33  ;;  %v2982_v27 = vmul.f32 0.5, %v5257_v39  ;;  %v3173_v57 = vsel %vm453_vm0, %v5255_v33, -inf }
 0x4c1   : > { %v4074_v41 = vpop.eup %4073  ;;  %v2823_v51 = vadd.f32 0.5, %v2819_v0  ;;  %v2989_v3 = vmul.f32 0.5, %v4072_v12  ;;  %2840 = vmax.xlane.f32.xlu1 %v2839_v62  ;;  %3171 = vmax.xlane.f32.xlu0 %v3170_v44  ;;  %v3000_v62 = vsel %vm453_vm0, %v5194_v43, -inf }
 0x4c2   : > { %v3157_v24 = vmul.f32 0.5, %v4074_v41  ;;  %4077 = vtanh.f32 %v3150_v58 }
 0x4c3   : > { %3852 = vst.msk [vmem:[%s5029_s30 + $0xf0] sm:$0xff] %vm453_vm0, %v2823_v51  ;;  %v2993_v15 = vadd.f32 0.5, %v2989_v3  ;;  %4079 = vtanh.f32 %v2982_v27 }
 0x4c4   : > { %v3161_v55 = vadd.f32 0.5, %v3157_v24 }
 0x4c5   : > { %3867 = vst.msk [vmem:[%s5029_s30 + $0x110] sm:$0xff] %vm453_vm0, %v2993_v15  ;;  %v5267_v63 = vpop.f32.mrf.mxu3 }
 0x4c6   : > { %6208 = vst [vmem:[#allocation8_spill] sm:$0xff] %v5267_v63  ;;  %v4076_v22 = vpop.eup %4075  ;;  %v3319_v29 = vmul.f32 0.5, %v5267_v63  ;;  %v3340_v27 = vsel %vm453_vm0, %v5267_v63, -inf }
 0x4c7   : > { %3880 = vst.msk [vmem:[%s5029_s30 + $0x120] sm:$0xff] %vm453_vm0, %v3161_v55  ;;  %2500 = vmax.xlane.f32.xlu2 %v2499_v40  ;;  %v2820_v61 = vmul.f32 0.5, %v4076_v22  ;;  %v5276_v48 = vpop.f32.mrf.mxu1 }
 0x4c8   : > { %6209 = vst [vmem:[#allocation9_spill] sm:$0xff] %v5276_v48  ;;  %v4078_v45 = vpop.eup %4077  ;;  %4081 = vtanh.f32 %v3319_v29  ;;  %v3151_v36 = vmul.f32 0.5, %v5276_v48 }
 0x4c9   : > { %v4080_v37 = vpop.eup %4079  ;;  %v2824_v11 = vadd.f32 0.5, %v2820_v61  ;;  %v3158_v25 = vmul.f32 0.5, %v4078_v45  ;;  %3174 = vmax.xlane.f32.xlu1 %v3173_v57  ;;  %v2833_v61 = vsel %vm453_vm0, %v5206_v42, -inf }
 0x4ca   : > { %v2990_v8 = vmul.f32 0.5, %v4080_v37  ;;  %4083 = vtanh.f32 %v3151_v36 }
 0x4cb   : > { %3853 = vst.msk [vmem:[%s5029_s30 + $0xf8] sm:$0xff] %vm453_vm0, %v2824_v11  ;;  %v3162_v23 = vadd.f32 0.5, %v3158_v25 }
 0x4cc   : > { %v2994_v0 = vadd.f32 0.5, %v2990_v8 }
 0x4cd   : > { %3881 = vst.msk [vmem:[%s5029_s30 + $0x128] sm:$0xff] %vm453_vm0, %v3162_v23  ;;  %v5285_v44 = vpop.f32.mrf.mxu3 }
 0x4ce   : > { %6210 = vst [vmem:[#allocation10_spill] sm:$0xff] %v5285_v44  ;;  %v4082_v12 = vpop.eup %4081  ;;  %v3320_v58 = vmul.f32 0.5, %v5285_v44 }
 0x4cf   : > { %3868 = vst.msk [vmem:[%s5029_s30 + $0x118] sm:$0xff] %vm453_vm0, %v2994_v0  ;;  %3001 = vmax.xlane.f32.xlu2 %v3000_v62  ;;  %v3327_v41 = vmul.f32 0.5, %v4082_v12  ;;  %v5292_v51 = vpop.f32.mrf.mxu1 }
 0x4d0   : > { %6211 = vst [vmem:[#allocation11_spill] sm:$0xff] %v5292_v51  ;;  %v4084_v3 = vpop.eup %4083  ;;  %4085 = vtanh.f32 %v3320_v58  ;;  %v3152_v24 = vmul.f32 0.5, %v5292_v51  ;;  %v3179_v15 = vsel %vm453_vm0, %v5292_v51, -inf  ;;  %v2669_v58 = vsel %vm453_vm0, %v5215_v21, -inf }
 0x4d1   : > { %v3331_v55 = vadd.f32 0.5, %v3327_v41  ;;  %v3159_v22 = vmul.f32 0.5, %v4084_v3  ;;  %3341 = vmax.xlane.f32.xlu1 %v3340_v27  ;;  %3180 = vmax.xlane.f32.xlu0 %v3179_v15 }
 0x4d2   : > { %4087 = vtanh.f32 %v3152_v24 }
 0x4d3   : > { %3895 = vst.msk [vmem:[%s5029_s30 + $0x140] sm:$0xff] %vm453_vm0, %v3331_v55  ;;  %v3163_v40 = vadd.f32 0.5, %v3159_v22  ;;  %v3009_v55 = vsel %vm453_vm0, %v5257_v39, -inf }
 0x4d5   : > { %3882 = vst.msk [vmem:[%s5029_s30 + $0x130] sm:$0xff] %vm453_vm0, %v3163_v40  ;;  %v5301_v29 = vpop.f32.mrf.mxu3 }
 0x4d6   : > { %6212 = vst [vmem:[#allocation12_spill] sm:$0xff] %v5301_v29  ;;  %v4086_v57 = vpop.eup %4085  ;;  %v3321_v45 = vmul.f32 0.5, %v5301_v29  ;;  %v3346_v37 = vsel %vm453_vm0, %v5301_v29, -inf }
 0x4d7   : > { %2834 = vmax.xlane.f32.xlu2 %v2833_v61  ;;  %v3328_v36 = vmul.f32 0.5, %v4086_v57 }
 0x4d8   : > { %v4088_v11 = vpop.eup %4087  ;;  %4089 = vtanh.f32 %v3321_v45  ;;  %v3176_v45 = vsel %vm453_vm0, %v5276_v48, -inf }
 0x4d9   : > { %v3332_v25 = vadd.f32 0.5, %v3328_v36  ;;  %v3160_v8 = vmul.f32 0.5, %v4088_v11  ;;  %3347 = vmax.xlane.f32.xlu0 %v3346_v37  ;;  %v1645_v36 = vpop.xlane.xlu1 %1644  ;;  %v1562_v37 = vlaneseq  ;;  %v1642_v11 = vpop.xlane.xlu0 %1641 }
 0x4da   : > { %v5308_v23 = vpop.xlane.xlu2 %1811 }
 0x4db   : > { %3896 = vst.msk [vmem:[%s5029_s30 + $0x148] sm:$0xff] %vm453_vm0, %v3332_v25  ;;  %v3164_v62 = vadd.f32 0.5, %v3160_v8  ;;  %v1652_v8 = vmax.f32 %v1642_v11, %v1645_v36  ;;  %v1572_v48 = vand.u32 127, %v1562_v37 }
 0x4dd   : > { %3883 = vst.msk [vmem:[%s5029_s30 + $0x138] sm:$0xff] %vm453_vm0, %v3164_v62  ;;  %v5314_v0 = vpop.f32.mrf.mxu3 }
 0x4de   : > { %6213 = vst [vmem:[#allocation13_spill] sm:$0xff] %v5314_v0  ;;  %v4090_v12 = vpop.eup %4089  ;;  %v3349_v27 = vsel %vm453_vm0, %v5314_v0, -inf  ;;  %v3322_v3 = vmul.f32 0.5, %v5314_v0 }
 0x4df   : > { %2670 = vmax.xlane.f32.xlu2 %v2669_v58  ;;  %v3329_v41 = vmul.f32 0.5, %v4090_v12  ;;  %3350 = vmax.xlane.f32.xlu1 %v3349_v27  ;;  %v1563_v12 = vshrl.u32 %v1562_v37, 7  ;;  %v3343_v27 = vsel %vm453_vm0, %v5285_v44, -inf }
 0x4e0   : > { %4091 = vtanh.f32 %v3322_v3 }
 0x4e1   : > { %v3333_v24 = vadd.f32 0.5, %v3329_v41  ;;  %v1567_v36 = vmul.u32 32, %v1563_v12 }
 0x4e2   : > { %v1648_v15 = vpop.xlane.xlu2 %1647  ;;  %v1815_v11 = vpop.xlane.xlu0 %1814 }
 0x4e3   : > { %3897 = vst.msk [vmem:[%s5029_s30 + $0x150] sm:$0xff] %vm453_vm0, %v3333_v24  ;;  %v1565_v24 = vadd.s32 16, %v1563_v12 }
 0x4e5   : > { %v1569_v0 = vmul.u32 32, %v1565_v24 }
 0x4e6   : > { %v4092_v22 = vpop.eup %4091 }
 0x4e7   : > { %3010 = vmax.xlane.f32.xlu2 %v3009_v55  ;;  %v3330_v40 = vmul.f32 0.5, %v4092_v22  ;;  %v1564_v55 = vadd.s32 8, %v1563_v12 }
 0x4e9   : > { %v3334_v61 = vadd.f32 0.5, %v3330_v40  ;;  %v1568_v63 = vmul.u32 32, %v1564_v55 }
 0x4ea   : > { %v5325_v57 = vpop.xlane.xlu2 %1981  ;;  %v1818_v3 = vpop.xlane.xlu1 %1817 }
 0x4eb   : > { %3898 = vst.msk [vmem:[%s5029_s30 + $0x158] sm:$0xff] %vm453_vm0, %v3334_v61  ;;  %v1566_v61 = vadd.s32 24, %v1563_v12  ;;  %v5337_v44 = vadd.s32 %v1572_v48, %v1568_v63  ;;  %s4107_s30 = sshra.s32 %s3471_s15, 4  ;;  %s4108_s30 = int_to_ptr.hbm [resolvable:$true] %s4107_s30 }
 0x4ec   : > { %s4109_s18 = scalar_lea.hbm %s4108_s30, 352  ;;  %p4114_p0 = scmp.lt.s32.totalorder %s4108_s30, %s6150_s10 }
 0x4ed   : > { %p4110_p11 = scmp.ne.s32.totalorder %s4108_s30, %s4109_s18  ;;  %p4115_p1 = scmp.lt.s32.totalorder %s4113_s16, %s4109_s18 }
 0x4ef   : > { %3177 = vmax.xlane.f32.xlu2 %v3176_v45  ;;  %p4111_p12 = pnand %p4110_p11, %p4263_p5  ;;  %p4116_p2 = por %p4115_p1, %p4114_p0 }
 0x4f1   : > { %p4112_p13 = pneg %p4111_p12 }
 0x4f2   : > { %v1651_v25 = vpop.xlane.xlu2 %1650  ;;  %v1988_v39 = vpop.xlane.xlu1 %1987 }
 0x4f3   : > { %v1653_v62 = vmax.f32 %v1648_v15, %v1651_v25  ;;  %v1570_v25 = vmul.u32 32, %v1566_v61  ;;  %p4117_p3 = pnand %p4116_p2, %p4112_p13 }
 0x4f5   : > { %v1654_v58 = vmax.f32 %v1652_v8, %v1653_v62  ;;  %v5335_v62 = vadd.s32 %v1572_v48, %v1569_v0  ;;  %v5342_v51 = vadd.s32 %v1572_v48, %v1570_v25 }
 0x4f7   : > { %v1655_v41 = vrot.slane %v1654_v58, 4  ;;  %3344 = vmax.xlane.f32.xlu2 %v3343_v27  ;;  %v5339_v27 = vadd.s32 %v1572_v48, %v1567_v36 }
 0x4f9   : > { %v1656_v22 = vmax.f32 %v1654_v58, %v1655_v41  ;;  %v1822_v58 = vmax.f32 %v5308_v23, %v1815_v11 }
 0x4fa   : > { %v5333_v40 = vpop.xlane.xlu2 %2151 }
 0x4fb   : > { %v1657_v45 = vrot.slane %v1656_v22, 2 }
 0x4fc   : > { %v5375_v25 = vpop.xlane.xlu1 %2157 }
 0x4fd   : > { %v1658_v15 = vmax.f32 %v1656_v22, %v1657_v45 }
 0x4ff   : > { %v1659_v8 = vrot.slane %v1658_v15, 1 }
 0x501   : > { %v1660_v29 = vmax.f32 %v1658_v15, %v1659_v8 }
 0x502   : > { %v1821_v41 = vpop.xlane.xlu2 %1820 }
 0x503   : > { %v1823_v37 = vmax.f32 %v1818_v3, %v1821_v41  ;;  %vm1663_vm3 = vcmp.ge.f32.partialorder %v5038_v19, %v1660_v29  ;;  %vm1662_vm4 = vcmp.ge.f32.partialorder %v5024_v7, %v1660_v29  ;;  %vm1661_vm5 = vcmp.ge.f32.partialorder %v5016_v2, %v1660_v29 }
 0x504   : > { %v1667_v0 = vsel %vm1663_vm3, %v5335_v62, 1024  ;;  %v1666_v63 = vsel %vm1662_vm4, %v5337_v44, 1024  ;;  %v1665_v12 = vsel %vm1661_vm5, %v5339_v27, 1024  ;;  %vm1664_vm6 = vcmp.ge.f32.partialorder %v5053_v47, %v1660_v29  ;;  %v1985_v47 = vpop.xlane.xlu0 %1984 }
 0x505   : > { %v1824_v23 = vmax.f32 %v1822_v58, %v1823_v37  ;;  %v5352_v24 = vsel %vm453_vm0, %v1667_v0, 2147483647  ;;  %v5355_v48 = vsel %vm453_vm0, %v1666_v63, 2147483647  ;;  %v5358_v19 = vsel %vm453_vm0, %v1665_v12, 2147483647 }
 0x506   : > { %v1701_v2 = vshra.s32 %v5352_v24, 16  ;;  %v1686_v7 = vshra.s32 %v5355_v48, 16  ;;  %v1671_v55 = vshra.s32 %v5358_v19, 16  ;;  %v1668_v22 = vsel %vm1664_vm6, %v5342_v51, 1024 }
 0x507   : > { %v1825_v3 = vrot.slane %v1824_v23, 4  ;;  %v5373_v11 = vsel %vm453_vm0, %v1668_v22, 2147483647  ;;  %v1992_v58 = vmax.f32 %v5325_v57, %v1985_v47 }
 0x508   : > { %v5364_v29 = vcvt.s32.f32 %v1701_v2  ;;  %v5366_v61 = vcvt.s32.f32 %v1686_v7  ;;  %v5368_v36 = vcvt.s32.f32 %v1671_v55  ;;  %v1716_v63 = vshra.s32 %v5373_v11, 16 }
 0x509   : > { %v1826_v45 = vmax.f32 %v1824_v23, %v1825_v3 }
 0x50a   : > { %1704 = vmin.xlane.f32.xlu1 %v5364_v29  ;;  %1689 = vmin.xlane.f32.xlu2 %v5366_v61  ;;  %v1991_v15 = vpop.xlane.xlu2 %1990  ;;  %v5380_v3 = vcvt.s32.f32 %v1716_v63 }
 0x50b   : > { %v1827_v8 = vrot.slane %v1826_v45, 2  ;;  %1674 = vmin.xlane.f32.xlu0 %v5368_v36  ;;  %v1993_v41 = vmax.f32 %v1988_v39, %v1991_v15 }
 0x50d   : > { %v1828_v37 = vmax.f32 %v1826_v45, %v1827_v8  ;;  %v1994_v0 = vmax.f32 %v1992_v58, %v1993_v41  ;;  %v5391_v45 = vpop.xlane.xlu1 %2327 }
 0x50f   : > { %v1829_v12 = vrot.slane %v1828_v37, 1  ;;  %v1995_v23 = vrot.slane %v1994_v0, 4 }
 0x511   : > { %v1830_v2 = vmax.f32 %v1828_v37, %v1829_v12  ;;  %v1996_v7 = vmax.f32 %v1994_v0, %v1995_v23 }
 0x512   : > { %v5382_v55 = vpop.xlane.xlu2 %2321 }
 0x513   : > { %v1997_v22 = vrot.slane %v1996_v7, 2  ;;  %1719 = vmin.xlane.f32.xlu0 %v5380_v3  ;;  %vm1833_vm7 = vcmp.ge.f32.partialorder %v5065_v16, %v1830_v2  ;;  %vm1832_vm8 = vcmp.ge.f32.partialorder %v5048_v50, %v1830_v2  ;;  %vm1831_vm9 = vcmp.ge.f32.partialorder %v5033_v59, %v1830_v2 }
 0x514   : > { %v1837_v39 = vsel %vm1833_vm7, %v5335_v62, 1024  ;;  %v1836_v57 = vsel %vm1832_vm8, %v5337_v44, 1024  ;;  %v1835_v47 = vsel %vm1831_vm9, %v5339_v27, 1024  ;;  %vm1834_vm10 = vcmp.ge.f32.partialorder %v5086_v28, %v1830_v2 }
 0x515   : > { %v1998_v15 = vmax.f32 %v1996_v7, %v1997_v22  ;;  %v5395_v8 = vsel %vm453_vm0, %v1837_v39, 2147483647  ;;  %v5398_v16 = vsel %vm453_vm0, %v1836_v57, 2147483647  ;;  %v5401_v50 = vsel %vm453_vm0, %v1835_v47, 2147483647  ;;  %v2155_v7 = vpop.xlane.xlu0 %2154 }
 0x516   : > { %v1871_v59 = vshra.s32 %v5395_v8, 16  ;;  %v1856_v58 = vshra.s32 %v5398_v16, 16  ;;  %v1841_v37 = vshra.s32 %v5401_v50, 16  ;;  %v1838_v0 = vsel %vm1834_vm10, %v5342_v51, 1024 }
 0x517   : > { %v1999_v41 = vrot.slane %v1998_v15, 1  ;;  %v5418_v22 = vsel %vm453_vm0, %v1838_v0, 2147483647 }
 0x518   : > { %v5407_v28 = vcvt.s32.f32 %v1871_v59  ;;  %v5409_v63 = vcvt.s32.f32 %v1856_v58  ;;  %v5411_v23 = vcvt.s32.f32 %v1841_v37  ;;  %6216 = vst [vmem:[#allocation16_spill] sm:$0xff] %v5418_v22  ;;  %v1886_v47 = vshra.s32 %v5418_v22, 16 }
 0x519   : > { %v2000_v12 = vmax.f32 %v1998_v15, %v1999_v41  ;;  %v5435_v41 = vpop.xlane.xlu1 %2497 }
 0x51a   : > { %6214 = vst [vmem:[#allocation14_spill] sm:$0xff] %v5409_v63  ;;  %1874 = vmin.xlane.f32.xlu1 %v5407_v28  ;;  %1859 = vmin.xlane.f32.xlu2 %v5409_v63  ;;  %v5415_v2 = vpop.xlane.xlu2 %2491 }
 0x51b   : > { %6215 = vst [vmem:[#allocation15_spill] sm:$0xff] %v5411_v23  ;;  %1844 = vmin.xlane.f32.xlu0 %v5411_v23  ;;  %vm2003_vm11 = vcmp.ge.f32.partialorder %v5076_v6, %v2000_v12  ;;  %vm2002_vm12 = vcmp.ge.f32.partialorder %v5055_v4, %v2000_v12  ;;  %vm2001_vm13 = vcmp.ge.f32.partialorder %v5040_v9, %v2000_v12  ;;  %v5442_v9 = vcvt.s32.f32 %v1886_v47 }
 0x51c   : > { %v2007_v39 = vsel %vm2003_vm11, %v5335_v62, 1024  ;;  %v2006_v57 = vsel %vm2002_vm12, %v5337_v44, 1024  ;;  %v2005_v4 = vsel %vm2001_vm13, %v5339_v27, 1024  ;;  %vm2004_vm14 = vcmp.ge.f32.partialorder %v5093_v53, %v2000_v12 }
 0x51d   : > { %v5428_v15 = vsel %vm453_vm0, %v2007_v39, 2147483647  ;;  %v5431_v59 = vsel %vm453_vm0, %v2006_v57, 2147483647  ;;  %v2325_v57 = vpop.xlane.xlu0 %2324 }
 0x51e   : > { %6217 = vst [vmem:[#allocation17_spill] sm:$0xff] %v5428_v15  ;;  %v2041_v58 = vshra.s32 %v5428_v15, 16  ;;  %v2026_v6 = vshra.s32 %v5431_v59, 16  ;;  %v5447_v15 = vsel %vm453_vm0, %v2005_v4, 2147483647 }
 0x51f   : > { %6218 = vst [vmem:[#allocation18_spill] sm:$0xff] %v5431_v59  ;;  %v2162_v59 = vmax.f32 %v5333_v40, %v2155_v7  ;;  %v2011_v47 = vshra.s32 %v5447_v15, 16 }
 0x520   : > { %v5438_v37 = vcvt.s32.f32 %v2041_v58  ;;  %v5440_v0 = vcvt.s32.f32 %v2026_v6 }
 0x521   : > { %v5457_v23 = vcvt.s32.f32 %v2011_v47 }
 0x522   : > { %6219 = vst [vmem:[#allocation19_spill] sm:$0xff] %v5438_v37  ;;  %2044 = vmin.xlane.f32.xlu1 %v5438_v37  ;;  %2029 = vmin.xlane.f32.xlu2 %v5440_v0  ;;  %v2161_v39 = vpop.xlane.xlu2 %2160  ;;  %v2008_v37 = vsel %vm2004_vm14, %v5342_v51, 1024 }
 0x523   : > { %6220 = vst [vmem:[#allocation20_spill] sm:$0xff] %v5440_v0  ;;  %1889 = vmin.xlane.f32.xlu0 %v5442_v9  ;;  %v2163_v58 = vmax.f32 %v5375_v25, %v2161_v39  ;;  %v5455_v0 = vpop.xlane.xlu1 %2831  ;;  %v5462_v40 = vsel %vm453_vm0, %v2008_v37, 2147483647 }
 0x524   : > { %6221 = vst [vmem:[#allocation21_spill] sm:$0xff] %v5457_v23  ;;  %v2056_v12 = vshra.s32 %v5462_v40, 16 }
 0x525   : > { %v2164_v6 = vmax.f32 %v2162_v59, %v2163_v58  ;;  %6222 = vst [vmem:[#allocation22_spill] sm:$0xff] %v5462_v40  ;;  %v2495_v53 = vpop.xlane.xlu0 %2494 }
 0x526   : > { %v5466_v58 = vcvt.s32.f32 %v2056_v12 }
 0x527   : > { %v2165_v22 = vrot.slane %v2164_v6, 4 }
 0x528   : > { %6223 = vst [vmem:[#allocation23_spill] sm:$0xff] %v5466_v58 }
 0x529   : > { %v2166_v63 = vmax.f32 %v2164_v6, %v2165_v22  ;;  %v2332_v22 = vmax.f32 %v5382_v55, %v2325_v57 }
 0x52a   : > { %v5459_v4 = vpop.xlane.xlu2 %2661 }
 0x52b   : > { %v2167_v7 = vrot.slane %v2166_v63, 2  ;;  %2014 = vmin.xlane.f32.xlu0 %v5457_v23  ;;  %v5469_v47 = vpop.xlane.xlu1 %2667 }
 0x52d   : > { %v2168_v25 = vmax.f32 %v2166_v63, %v2167_v7  ;;  %v5476_v63 = vpop.xlane.xlu0 %2664 }
 0x52f   : > { %v2169_v59 = vrot.slane %v2168_v25, 1 }
 0x531   : > { %v2170_v39 = vmax.f32 %v2168_v25, %v2169_v59 }
 0x532   : > { %v2331_v6 = vpop.xlane.xlu2 %2330 }
 0x533   : > { %2059 = vmin.xlane.f32.xlu0 %v5466_v58  ;;  %v2333_v37 = vmax.f32 %v5391_v45, %v2331_v6  ;;  %vm2173_vm15 = vcmp.ge.f32.partialorder %v5114_v10, %v2170_v39  ;;  %vm2172_vm1 = vcmp.ge.f32.partialorder %v5095_v49, %v2170_v39  ;;  %vm2171_vm2 = vcmp.ge.f32.partialorder %v5074_v38, %v2170_v39 }
 0x534   : > { %v2177_v7 = vsel %vm2173_vm15, %v5335_v62, 1024  ;;  %v2176_v25 = vsel %vm2172_vm1, %v5337_v44, 1024  ;;  %v2175_v55 = vsel %vm2171_vm2, %v5339_v27, 1024  ;;  %vm2174_vm3 = vcmp.ge.f32.partialorder %v5135_v14, %v2170_v39 }
 0x535   : > { %v2334_v57 = vmax.f32 %v2332_v22, %v2333_v37  ;;  %v5483_v12 = vsel %vm453_vm0, %v2177_v7, 2147483647  ;;  %v5486_v10 = vsel %vm453_vm0, %v2176_v25, 2147483647  ;;  %v5489_v49 = vsel %vm453_vm0, %v2175_v55, 2147483647 }
 0x536   : > { %6224 = vst [vmem:[#allocation24_spill] sm:$0xff] %v5486_v10  ;;  %v2211_v38 = vshra.s32 %v5483_v12, 16  ;;  %v2196_v45 = vshra.s32 %v5486_v10, 16  ;;  %v2181_v6 = vshra.s32 %v5489_v49, 16  ;;  %v2178_v58 = vsel %vm2174_vm3, %v5342_v51, 1024 }
 0x537   : > { %6225 = vst [vmem:[#allocation25_spill] sm:$0xff] %v5489_v49  ;;  %v2335_v59 = vrot.slane %v2334_v57, 4  ;;  %v5504_v25 = vsel %vm453_vm0, %v2178_v58, 2147483647  ;;  %v2502_v55 = vmax.f32 %v5415_v2, %v2495_v53 }
 0x538   : > { %v5495_v14 = vcvt.s32.f32 %v2211_v38  ;;  %v5497_v39 = vcvt.s32.f32 %v2196_v45  ;;  %v5499_v37 = vcvt.s32.f32 %v2181_v6  ;;  %6228 = vst [vmem:[#allocation28_spill] sm:$0xff] %v5504_v25  ;;  %v5509_v45 = vpop.xlane.xlu0 %3004  ;;  %v2226_v40 = vshra.s32 %v5504_v25, 16 }
 0x539   : > { %v2336_v22 = vmax.f32 %v2334_v57, %v2335_v59  ;;  %v5511_v57 = vpop.xlane.xlu1 %3007 }
 0x53a   : > { %6226 = vst [vmem:[#allocation26_spill] sm:$0xff] %v5495_v14  ;;  %2214 = vmin.xlane.f32.xlu1 %v5495_v14  ;;  %2199 = vmin.xlane.f32.xlu2 %v5497_v39  ;;  %v2501_v7 = vpop.xlane.xlu2 %2500  ;;  %v5514_v10 = vcvt.s32.f32 %v2226_v40 }
 0x53b   : > { %6227 = vst [vmem:[#allocation27_spill] sm:$0xff] %v5497_v39  ;;  %v2337_v49 = vrot.slane %v2336_v22, 2  ;;  %2184 = vmin.xlane.f32.xlu0 %v5499_v37  ;;  %v2503_v38 = vmax.f32 %v5435_v41, %v2501_v7 }
 0x53c   : > { %6229 = vst [vmem:[#allocation29_spill] sm:$0xff] %v5514_v10 }
 0x53d   : > { %v2338_v59 = vmax.f32 %v2336_v22, %v2337_v49  ;;  %v2504_v6 = vmax.f32 %v2502_v55, %v2503_v38 }
 0x53f   : > { %v2339_v39 = vrot.slane %v2338_v59, 1  ;;  %v2505_v14 = vrot.slane %v2504_v6, 4 }
 0x541   : > { %v2340_v23 = vmax.f32 %v2338_v59, %v2339_v39  ;;  %v2506_v58 = vmax.f32 %v2504_v6, %v2505_v14  ;;  %v2841_v7 = vpop.xlane.xlu1 %2840 }
 0x542   : > { %v5516_v2 = vpop.xlane.xlu2 %3001 }
 0x543   : > { %v2507_v53 = vrot.slane %v2506_v58, 2  ;;  %2229 = vmin.xlane.f32.xlu0 %v5514_v10  ;;  %vm2343_vm4 = vcmp.ge.f32.partialorder %v5143_v18, %v2340_v23  ;;  %vm2342_vm5 = vcmp.ge.f32.partialorder %v5124_v35, %v2340_v23  ;;  %vm2341_vm6 = vcmp.ge.f32.partialorder %v5107_v30, %v2340_v23  ;;  %v2838_v18 = vpop.xlane.xlu0 %2837 }
 0x544   : > { %v2347_v41 = vsel %vm2343_vm4, %v5335_v62, 1024  ;;  %v2346_v49 = vsel %vm2342_vm5, %v5337_v44, 1024  ;;  %vm2344_vm7 = vcmp.ge.f32.partialorder %v5168_v1, %v2340_v23  ;;  %v2345_v22 = vsel %vm2341_vm6, %v5339_v27, 1024 }
 0x545   : > { %v2508_v14 = vmax.f32 %v2506_v58, %v2507_v53  ;;  %v5526_v40 = vsel %vm453_vm0, %v2347_v41, 2147483647  ;;  %v5529_v39 = vsel %vm453_vm0, %v2346_v49, 2147483647  ;;  %v5535_v30 = vsel %vm453_vm0, %v2345_v22, 2147483647 }
 0x546   : > { %v2381_v35 = vshra.s32 %v5526_v40, 16  ;;  %v2366_v55 = vshra.s32 %v5529_v39, 16  ;;  %6230 = vst [vmem:[#allocation30_spill] sm:$0xff] %v5535_v30  ;;  %v2351_v59 = vshra.s32 %v5535_v30, 16  ;;  %v2348_v6 = vsel %vm2344_vm7, %v5342_v51, 1024 }
 0x547   : > { %v2509_v38 = vrot.slane %v2508_v14, 1  ;;  %v2843_v53 = vmax.f32 %v2838_v18, %v2841_v7 }
 0x548   : > { %v5537_v1 = vcvt.s32.f32 %v2381_v35  ;;  %v5539_v23 = vcvt.s32.f32 %v2366_v55  ;;  %v5545_v41 = vcvt.s32.f32 %v2351_v59  ;;  %v5549_v35 = vsel %vm453_vm0, %v2348_v6, 2147483647 }
 0x549   : > { %v2510_v58 = vmax.f32 %v2508_v14, %v2509_v38  ;;  %6232 = vst [vmem:[#allocation32_spill] sm:$0xff] %v5549_v35 }
 0x54a   : > { %2384 = vmin.xlane.f32.xlu1 %v5537_v1  ;;  %2369 = vmin.xlane.f32.xlu2 %v5539_v23  ;;  %6231 = vst [vmem:[#allocation31_spill] sm:$0xff] %v5545_v41  ;;  %v2835_v49 = vpop.xlane.xlu2 %2834 }
 0x54b   : > { %v2842_v22 = vmax.f32 %v5455_v0, %v2835_v49  ;;  %vm2513_vm8 = vcmp.ge.f32.partialorder %v5154_v5, %v2510_v58  ;;  %vm2512_vm9 = vcmp.ge.f32.partialorder %v5133_v26, %v2510_v58  ;;  %2354 = vmin.xlane.f32.xlu0 %v5545_v41  ;;  %vm2511_vm10 = vcmp.ge.f32.partialorder %v5112_v60, %v2510_v58 }
 0x54c   : > { %v2517_v14 = vsel %vm2513_vm8, %v5335_v62, 1024  ;;  %v2516_v18 = vsel %vm2512_vm9, %v5337_v44, 1024  ;;  %v2396_v0 = vshra.s32 %v5549_v35, 16  ;;  %v2672_v35 = vmax.f32 %v5459_v4, %v5476_v63 }
 0x54d   : > { %v2844_v7 = vmax.f32 %v2842_v22, %v2843_v53  ;;  %v5557_v55 = vsel %vm453_vm0, %v2517_v14, 2147483647  ;;  %v5560_v38 = vsel %vm453_vm0, %v2516_v18, 2147483647  ;;  %v2515_v53 = vsel %vm2511_vm10, %v5339_v27, 1024  ;;  %v3175_v14 = vpop.xlane.xlu1 %3174  ;;  %v3172_v18 = vpop.xlane.xlu0 %3171 }
 0x54e   : > { %v2551_v5 = vshra.s32 %v5557_v55, 16  ;;  %v2536_v26 = vshra.s32 %v5560_v38, 16  ;;  %v5571_v41 = vcvt.s32.f32 %v2396_v0  ;;  %vm2514_vm11 = vcmp.ge.f32.partialorder %v5173_v56, %v2510_v58 }
 0x54f   : > { %v2845_v59 = vrot.slane %v2844_v7, 4 }
 0x550   : > { %v5566_v6 = vcvt.s32.f32 %v2551_v5  ;;  %v5568_v49 = vcvt.s32.f32 %v2536_v26  ;;  %v5579_v26 = vsel %vm453_vm0, %v2515_v53, 2147483647 }
 0x551   : > { %v2846_v22 = vmax.f32 %v2844_v7, %v2845_v59  ;;  %v2521_v59 = vshra.s32 %v5579_v26, 16 }
 0x552   : > { %6233 = vst [vmem:[#allocation33_spill] sm:$0xff] %v5566_v6  ;;  %2554 = vmin.xlane.f32.xlu1 %v5566_v6  ;;  %2539 = vmin.xlane.f32.xlu2 %v5568_v49  ;;  %v2671_v60 = vpop.xlane.xlu2 %2670 }
 0x553   : > { %6234 = vst [vmem:[#allocation34_spill] sm:$0xff] %v5568_v49  ;;  %v2847_v30 = vrot.slane %v2846_v22, 2  ;;  %v2673_v5 = vmax.f32 %v5469_v47, %v2671_v60  ;;  %2399 = vmin.xlane.f32.xlu0 %v5571_v41  ;;  %v2518_v49 = vsel %vm2514_vm11, %v5342_v51, 1024  ;;  %v3012_v47 = vmax.f32 %v5516_v2, %v5509_v45 }
 0x554   : > { %v5589_v63 = vcvt.s32.f32 %v2521_v59  ;;  %v5595_v58 = vsel %vm453_vm0, %v2518_v49, 2147483647 }
 0x555   : > { %v2848_v7 = vmax.f32 %v2846_v22, %v2847_v30  ;;  %v2674_v0 = vmax.f32 %v2672_v35, %v2673_v5  ;;  %v5585_v4 = vpop.xlane.xlu1 %3341  ;;  %v3181_v60 = vpop.xlane.xlu0 %3180  ;;  %v2566_v5 = vshra.s32 %v5595_v58, 16 }
 0x557   : > { %v2849_v10 = vrot.slane %v2848_v7, 1  ;;  %v2675_v25 = vrot.slane %v2674_v0, 4  ;;  %v5601_v59 = vcvt.s32.f32 %v2566_v5 }
 0x559   : > { %v2676_v6 = vmax.f32 %v2674_v0, %v2675_v25  ;;  %v5591_v30 = vmax.f32 %v2848_v7, %v2849_v10  ;;  %v3182_v7 = vmax.f32 %v3172_v18, %v3175_v14 }
 0x55a   : > { %v3011_v53 = vpop.xlane.xlu2 %3010 }
 0x55b   : > { %v2677_v35 = vrot.slane %v2676_v6, 2  ;;  %v3013_v56 = vmax.f32 %v5511_v57, %v3011_v53  ;;  %2524 = vmin.xlane.f32.xlu0 %v5589_v63  ;;  %vm2853_vm12 = vcmp.ge.f32.partialorder %v5227_v13, %v5591_v30  ;;  %vm2851_vm13 = vcmp.ge.f32.partialorder %v5187_v46, %v5591_v30 }
 0x55c   : > { %v2857_v49 = vsel %vm2853_vm12, %v5335_v62, 1024  ;;  %vm2854_vm3 = vcmp.ge.f32.partialorder %v5246_v31, %v5591_v30  ;;  %vm2852_vm5 = vcmp.ge.f32.partialorder %v5206_v42, %v5591_v30 }
 0x55d   : > { %v2678_v25 = vmax.f32 %v2676_v6, %v2677_v35  ;;  %v3014_v22 = vmax.f32 %v3012_v47, %v3013_v56  ;;  %v3351_v13 = vpop.xlane.xlu1 %3350  ;;  %v3348_v53 = vpop.xlane.xlu0 %3347 }
 0x55f   : > { %v2679_v0 = vrot.slane %v2678_v25, 1  ;;  %v3015_v45 = vrot.slane %v3014_v22, 4 }
 0x561   : > { %v2680_v2 = vmax.f32 %v2678_v25, %v2679_v0  ;;  %v3016_v10 = vmax.f32 %v3014_v22, %v3015_v45  ;;  %v3353_v45 = vmax.f32 %v3348_v53, %v3351_v13 }
 0x562   : > { %v3178_v57 = vpop.xlane.xlu2 %3177 }
 0x563   : > { %v3017_v6 = vrot.slane %v3016_v10, 2  ;;  %v3183_v47 = vmax.f32 %v3178_v57, %v3181_v60  ;;  %vm2684_vm14 = vcmp.ge.f32.partialorder %v5215_v21, %v2680_v2  ;;  %vm2683_vm15 = vcmp.ge.f32.partialorder %v5196_v32, %v2680_v2  ;;  %2569 = vmin.xlane.f32.xlu0 %v5601_v59 }
 0x564   : > { %v2688_v14 = vsel %vm2684_vm14, %v5342_v51, 1024  ;;  %v2687_v18 = vsel %vm2683_vm15, %v5335_v62, 1024  ;;  %vm2681_vm1 = vcmp.ge.f32.partialorder %v5156_v20, %v2680_v2  ;;  %vm2682_vm2 = vcmp.ge.f32.partialorder %v5175_v54, %v2680_v2 }
 0x565   : > { %v3018_v35 = vmax.f32 %v3016_v10, %v3017_v6  ;;  %v3184_v56 = vmax.f32 %v3182_v7, %v3183_v47  ;;  %v5614_v60 = vsel %vm453_vm0, %v2688_v14, 2147483647  ;;  %v5617_v21 = vsel %vm453_vm0, %v2687_v18, 2147483647 }
 0x566   : > { %v2736_v32 = vshra.s32 %v5614_v60, 16  ;;  %v2721_v25 = vshra.s32 %v5617_v21, 16  ;;  %v2685_v22 = vsel %vm2681_vm1, %v5339_v27, 1024  ;;  %v2855_v20 = vsel %vm2851_vm13, %v5339_v27, 1024 }
 0x567   : > { %v3019_v5 = vrot.slane %v3018_v35, 1  ;;  %v3185_v0 = vrot.slane %v3184_v56, 4  ;;  %v5627_v10 = vsel %vm453_vm0, %v2685_v22, 2147483647  ;;  %v2686_v47 = vsel %vm2682_vm2, %v5337_v44, 1024 }
 0x568   : > { %v5629_v7 = vcvt.s32.f32 %v2736_v32  ;;  %v5631_v57 = vcvt.s32.f32 %v2721_v25  ;;  %v2691_v6 = vshra.s32 %v5627_v10, 16  ;;  %v5640_v18 = vsel %vm453_vm0, %v2857_v49, 2147483647 }
 0x569   : > { %v5637_v14 = vmax.f32 %v3018_v35, %v3019_v5  ;;  %v3186_v46 = vmax.f32 %v3184_v56, %v3185_v0  ;;  %v5643_v13 = vsel %vm453_vm0, %v2855_v20, 2147483647  ;;  %v5653_v35 = vsel %vm453_vm0, %v2686_v47, 2147483647 }
 0x56a   : > { %6235 = vst [vmem:[#allocation35_spill] sm:$0xff] %v5643_v13  ;;  %2739 = vmin.xlane.f32.xlu1 %v5629_v7  ;;  %2724 = vmin.xlane.f32.xlu2 %v5631_v57  ;;  %v5647_v53 = vcvt.s32.f32 %v2691_v6  ;;  %v3345_v32 = vpop.xlane.xlu2 %3344  ;;  %v2891_v49 = vshra.s32 %v5640_v18, 16  ;;  %v2861_v56 = vshra.s32 %v5643_v13, 16  ;;  %v2706_v31 = vshra.s32 %v5653_v35, 16 }
 0x56b   : > { %v3187_v54 = vrot.slane %v3186_v46, 2  ;;  %v3352_v2 = vmax.f32 %v5585_v4, %v3345_v32  ;;  %vm3022_vm4 = vcmp.ge.f32.partialorder %v5213_v52, %v5637_v14  ;;  %v2858_v4 = vsel %vm2854_vm3, %v5342_v51, 1024 }
 0x56c   : > { %2694 = vmin.xlane.f32.xlu0 %v5647_v53  ;;  %v3026_v20 = vsel %vm3022_vm4, %v5337_v44, 1024  ;;  %v5665_v52 = vcvt.s32.f32 %v2891_v49  ;;  %v5667_v6 = vcvt.s32.f32 %v2861_v56  ;;  %v2856_v47 = vsel %vm2852_vm5, %v5337_v44, 1024 }
 0x56d   : > { %v3188_v25 = vmax.f32 %v3186_v46, %v3187_v54  ;;  %v3354_v22 = vmax.f32 %v3352_v2, %v3353_v45  ;;  %v5671_v45 = vsel %vm453_vm0, %v2858_v4, 2147483647  ;;  %v5674_v42 = vsel %vm453_vm0, %v3026_v20, 2147483647 }
 0x56e   : > { %6236 = vst [vmem:[#allocation36_spill] sm:$0xff] %v5667_v6  ;;  %v5678_v30 = vcvt.s32.f32 %v2706_v31  ;;  %v5681_v2 = vsel %vm453_vm0, %v2856_v47, 2147483647  ;;  %vm3023_vm6 = vcmp.ge.f32.partialorder %v5234_v17, %v5637_v14  ;;  %v2906_v49 = vshra.s32 %v5671_v45, 16 }
 0x56f   : > { %v3189_v5 = vrot.slane %v3188_v25, 1  ;;  %v3355_v0 = vrot.slane %v3354_v22, 4  ;;  %6237 = vst [vmem:[#allocation37_spill] sm:$0xff] %v5671_v45  ;;  %v3046_v56 = vshra.s32 %v5674_v42, 16  ;;  %vm3021_vm8 = vcmp.ge.f32.partialorder %v5194_v43, %v5637_v14 }
 0x570   : > { %v5694_v20 = vcvt.s32.f32 %v2906_v49 }
 0x571   : > { %v3190_v32 = vmax.f32 %v3188_v25, %v3189_v5  ;;  %v3356_v46 = vmax.f32 %v3354_v22, %v3355_v0  ;;  %v2876_v25 = vshra.s32 %v5681_v2, 16  ;;  %v3027_v22 = vsel %vm3023_vm6, %v5335_v62, 1024 }
 0x572   : > { %2894 = vmin.xlane.f32.xlu1 %v5665_v52  ;;  %2864 = vmin.xlane.f32.xlu2 %v5667_v6  ;;  %6238 = vst [vmem:[#allocation38_spill] sm:$0xff] %v5694_v20  ;;  %v5696_v17 = vcvt.s32.f32 %v3046_v56  ;;  %v5700_v5 = vsel %vm453_vm0, %v3027_v22, 2147483647  ;;  %v6241_v22 = vld [vmem:[#allocation7_spill] sm:$0xff] }
 0x573   : > { %v3357_v54 = vrot.slane %v3356_v46, 2  ;;  %vm3191_vm7 = vcmp.ge.f32.partialorder %v5236_v34, %v3190_v32  ;;  %v3025_v34 = vsel %vm3021_vm8, %v5339_v27, 1024  ;;  %6239 = vst [vmem:[#allocation39_spill] sm:$0xff] %v5700_v5  ;;  %v5706_v43 = vcvt.s32.f32 %v2876_v25 }
 0x574   : > { %2709 = vmin.xlane.f32.xlu0 %v5678_v30  ;;  %v3195_v31 = vsel %vm3191_vm7, %v5339_v27, 1024  ;;  %vm3192_vm9 = vcmp.ge.f32.partialorder %v5255_v33, %v3190_v32  ;;  %v3061_v49 = vshra.s32 %v5700_v5, 16  ;;  %vm3024_vm11 = vcmp.ge.f32.partialorder %v6241_v22, %v5637_v14 }
 0x575   : > { %v3358_v4 = vmax.f32 %v3356_v46, %v3357_v54  ;;  %v5703_v0 = vsel %vm453_vm0, %v3195_v31, 2147483647  ;;  %v5710_v46 = vsel %vm453_vm0, %v3025_v34, 2147483647  ;;  %v6240_v54 = vld [vmem:[#allocation11_spill] sm:$0xff]  ;;  %v3196_v34 = vsel %vm3192_vm9, %v5337_v44, 1024 }
 0x576   : > { %vm3194_vm10 = vcmp.ge.f32.partialorder %v6240_v54, %v3190_v32  ;;  %v3201_v56 = vshra.s32 %v5703_v0, 16  ;;  %v3031_v31 = vshra.s32 %v5710_v46, 16  ;;  %v5724_v45 = vcvt.s32.f32 %v3061_v49  ;;  %v6247_v49 = vld [vmem:[#allocation8_spill] sm:$0xff] }
 0x577   : > { %v3359_v47 = vrot.slane %v3358_v4, 1  ;;  %v3028_v5 = vsel %vm3024_vm11, %v5342_v51, 1024  ;;  %v5730_v6 = vsel %vm453_vm0, %v3196_v34, 2147483647  ;;  %v6248_v34 = vld [vmem:[#allocation9_spill] sm:$0xff] }
 0x578   : > { %6242 = vst [vmem:[#allocation11_spill] sm:$0xff] %v5724_v45  ;;  %v5726_v54 = vcvt.s32.f32 %v3201_v56  ;;  %v5736_v22 = vcvt.s32.f32 %v3031_v31  ;;  %v3216_v56 = vshra.s32 %v5730_v6, 16  ;;  %vm3193_vm14 = vcmp.ge.f32.partialorder %v6248_v34, %v3190_v32 }
 0x579   : > { %v3360_v33 = vmax.f32 %v3358_v4, %v3359_v47  ;;  %6244 = vst [vmem:[#allocation40_spill] sm:$0xff] %v5730_v6  ;;  %v5740_v4 = vsel %vm453_vm0, %v3028_v5, 2147483647  ;;  %v6246_v47 = vld [vmem:[#allocation12_spill] sm:$0xff] }
 0x57a   : > { %2909 = vmin.xlane.f32.xlu2 %v5694_v20  ;;  %3049 = vmin.xlane.f32.xlu1 %v5696_v17  ;;  %v3198_v20 = vsel %vm3194_vm10, %v5342_v51, 1024  ;;  %6243 = vst [vmem:[#allocation7_spill] sm:$0xff] %v5726_v54  ;;  %v3076_v31 = vshra.s32 %v5740_v4, 16  ;;  %v5753_v13 = vcvt.s32.f32 %v3216_v56  ;;  %v6253_v56 = vld [vmem:[#allocation13_spill] sm:$0xff] }
 0x57b   : > { %v5733_v14 = vsel %vm453_vm0, %v3198_v20, 2147483647  ;;  %vm3363_vm12 = vcmp.ge.f32.partialorder %v6246_v47, %v3360_v33  ;;  %vm3361_vm13 = vcmp.ge.f32.partialorder %v6247_v49, %v3360_v33  ;;  %v3197_v49 = vsel %vm3193_vm14, %v5335_v62, 1024 }
 0x57c   : > { %2879 = vmin.xlane.f32.xlu0 %v5706_v43  ;;  %6245 = vst [vmem:[#allocation41_spill] sm:$0xff] %v5733_v14  ;;  %v3246_v20 = vshra.s32 %v5733_v14, 16  ;;  %v3365_v5 = vsel %vm3361_vm13, %v5339_v27, 1024  ;;  %v5764_v32 = vcvt.s32.f32 %v3076_v31  ;;  %v5769_v27 = vsel %vm453_vm0, %v3197_v49, 2147483647 }
 0x57d   : > { %6249 = vst [vmem:[#allocation12_spill] sm:$0xff] %v5753_v13  ;;  %v5762_v14 = vsel %vm453_vm0, %v3365_v5, 2147483647  ;;  %vm3364_vm15 = vcmp.ge.f32.partialorder %v6253_v56, %v3360_v33  ;;  %v3231_v31 = vshra.s32 %v5769_v27, 16 }
 0x57e   : > { %v5719_v25 = vpop.xlane.xlu0 %1674  ;;  %v5755_v47 = vcvt.s32.f32 %v3246_v20  ;;  %6252 = vst [vmem:[#allocation42_spill] sm:$0xff] %v5762_v14  ;;  %v6254_v20 = vld [vmem:[#allocation10_spill] sm:$0xff]  ;;  %v3368_v5 = vsel %vm3364_vm15, %v5342_v51, 1024 }
 0x57f   : > { %vm3362_vm1 = vcmp.ge.f32.partialorder %v6254_v20, %v3360_v33  ;;  %v1670_v33 = vand.u32 65535, %v5358_v19  ;;  %vm1676_vm2 = vcmp.eq.f32.partialorder %v5368_v36, %v5719_v25  ;;  %v5812_v36 = vpop.xlane.xlu2 %1689 }
 0x580   : > { %6250 = vst [vmem:[#allocation8_spill] sm:$0xff] %v5755_v47  ;;  %v3366_v56 = vsel %vm3362_vm1, %v5337_v44, 1024  ;;  %vm1691_vm4 = vcmp.eq.f32.partialorder %v5366_v61, %v5812_v36  ;;  %v6260_v61 = vld [vmem:[#allocation15_spill] sm:$0xff] }
 0x581   : > { %v5794_v20 = vsel %vm453_vm0, %v3366_v56, 2147483647 }
 0x582   : > { %3064 = vmin.xlane.f32.xlu2 %v5724_v45  ;;  %3204 = vmin.xlane.f32.xlu1 %v5726_v54  ;;  %v3367_v54 = vsel %vm3363_vm12, %v5335_v62, 1024 }
 0x583   : > { %v5759_v6 = vsel %vm453_vm0, %v3367_v54, 2147483647  ;;  %v3371_v54 = vshra.s32 %v5762_v14, 16 }
 0x584   : > { %3034 = vmin.xlane.f32.xlu0 %v5736_v22  ;;  %6251 = vst [vmem:[#allocation9_spill] sm:$0xff] %v5759_v6  ;;  %v3401_v62 = vshra.s32 %v5759_v6, 16  ;;  %v5788_v6 = vcvt.s32.f32 %v3231_v31 }
 0x585   : > { %v5782_v49 = vcvt.s32.f32 %v3371_v54  ;;  %v1672_v54 = vcvt.s32.f32 %v1670_v33  ;;  %v1685_v33 = vand.u32 65535, %v5355_v48  ;;  %v1870_v48 = vand.u32 65535, %v5395_v8  ;;  %v6261_v8 = vld [vmem:[#allocation14_spill] sm:$0xff] }
 0x586   : > { %v5748_v45 = vpop.xlane.xlu0 %1719 }
 0x587   : > { %6256 = vst [vmem:[#allocation10_spill] sm:$0xff] %v5782_v49  ;;  %v1677_v19 = vsel %vm1676_vm2, %v1672_v54, inf  ;;  %vm1721_vm3 = vcmp.eq.f32.partialorder %v5380_v3, %v5748_v45 }
 0x58a   : > { %3219 = vmin.xlane.f32.xlu2 %v5753_v13  ;;  %3249 = vmin.xlane.f32.xlu1 %v5755_v47  ;;  %v5780_v13 = vcvt.s32.f32 %v3401_v62  ;;  %v5786_v47 = vsel %vm453_vm0, %v3368_v5, 2147483647  ;;  %v3386_v62 = vshra.s32 %v5794_v20, 16  ;;  %v5805_v5 = vpop.xlane.xlu1 %1704 }
 0x58b   : > { %6257 = vst [vmem:[#allocation43_spill] sm:$0xff] %v5786_v47  ;;  %v3416_v51 = vshra.s32 %v5786_v47, 16  ;;  %v1700_v47 = vand.u32 65535, %v5352_v24  ;;  %vm1706_vm0 = vcmp.eq.f32.partialorder %v5364_v29, %v5805_v5  ;;  %v1840_v29 = vand.u32 65535, %v5401_v50 }
 0x58c   : > { %3079 = vmin.xlane.f32.xlu0 %v5764_v32  ;;  %v5807_v56 = vcvt.s32.f32 %v3386_v62 }
 0x58d   : > { %v5803_v31 = vcvt.s32.f32 %v3416_v51  ;;  %v1702_v54 = vcvt.s32.f32 %v1700_v47  ;;  %v5828_v14 = vpop.xlane.xlu2 %1859  ;;  %v1855_v47 = vand.u32 65535, %v5398_v16 }
 0x58e   : > { %v5776_v34 = vpop.xlane.xlu0 %1844  ;;  %vm1861_vm7 = vcmp.eq.f32.partialorder %v6261_v8, %v5828_v14  ;;  %v6266_v8 = vld [vmem:[#allocation20_spill] sm:$0xff] }
 0x58f   : > { %6255 = vst [vmem:[#allocation13_spill] sm:$0xff] %v5776_v34  ;;  %vm1846_vm6 = vcmp.eq.f32.partialorder %v6260_v61, %v5776_v34  ;;  %v6264_v61 = vld [vmem:[#allocation18_spill] sm:$0xff] }
 0x590   : > { %6258 = vst [vmem:[#allocation44_spill] sm:$0xff] %v5803_v31  ;;  %v2025_v34 = vand.u32 65535, %v6264_v61  ;;  %v6268_v61 = vld [vmem:[#allocation24_spill] sm:$0xff] }
 0x592   : > { %3404 = vmin.xlane.f32.xlu1 %v5780_v13  ;;  %3374 = vmin.xlane.f32.xlu2 %v5782_v49  ;;  %v1715_v49 = vand.u32 65535, %v5373_v11  ;;  %v5824_v24 = vpop.xlane.xlu1 %1874 }
 0x593   : > { %6259 = vst [vmem:[#allocation45_spill] sm:$0xff] %v5824_v24  ;;  %vm1876_vm5 = vcmp.eq.f32.partialorder %v5407_v28, %v5824_v24 }
 0x594   : > { %3234 = vmin.xlane.f32.xlu0 %v5788_v6  ;;  %v1717_v62 = vcvt.s32.f32 %v1715_v49 }
 0x596   : > { %v5800_v44 = vpop.xlane.xlu0 %1889  ;;  %v1722_v11 = vsel %vm1721_vm3, %v1717_v62, inf  ;;  %v1872_v62 = vcvt.s32.f32 %v1870_v48  ;;  %v6265_v48 = vld [vmem:[#allocation19_spill] sm:$0xff] }
 0x597   : > { %vm1891_vm8 = vcmp.eq.f32.partialorder %v5442_v9, %v5800_v44 }
 0x59a   : > { %1678 = vmin.xlane.f32.xlu1 %v1677_v19  ;;  %3419 = vmin.xlane.f32.xlu2 %v5803_v31  ;;  %v1707_v19 = vsel %vm1706_vm0, %v1702_v54, inf  ;;  %v1687_v31 = vcvt.s32.f32 %v1685_v33  ;;  %v1842_v33 = vcvt.s32.f32 %v1840_v29  ;;  %v1877_v54 = vsel %vm1876_vm5, %v1872_v62, inf  ;;  %v5841_v28 = vpop.xlane.xlu1 %2044  ;;  %v5844_v29 = vpop.xlane.xlu2 %2029 }
 0x59b   : > { %vm2046_vm9 = vcmp.eq.f32.partialorder %v6265_v48, %v5841_v28  ;;  %vm2031_vm10 = vcmp.eq.f32.partialorder %v6266_v8, %v5844_v29  ;;  %v2195_v48 = vand.u32 65535, %v6268_v61  ;;  %v2380_v61 = vand.u32 65535, %v5526_v40 }
 0x59c   : > { %3389 = vmin.xlane.f32.xlu0 %v5807_v56  ;;  %v1692_v3 = vsel %vm1691_vm4, %v1687_v31, inf  ;;  %v1847_v50 = vsel %vm1846_vm6, %v1842_v33, inf  ;;  %v6262_v31 = vld [vmem:[#allocation16_spill] sm:$0xff] }
 0x59d   : > { %v1885_v16 = vand.u32 65535, %v6262_v31  ;;  %v2210_v31 = vand.u32 65535, %v5483_v12  ;;  %v6271_v12 = vld [vmem:[#allocation27_spill] sm:$0xff] }
 0x59e   : > { %v5820_v51 = vpop.xlane.xlu0 %2014 }
 0x59f   : > { %v1887_v33 = vcvt.s32.f32 %v1885_v16 }
 0x5a2   : > { %1723 = vmin.xlane.f32.xlu1 %v1722_v11  ;;  %1708 = vmin.xlane.f32.xlu2 %v1707_v19  ;;  %v1857_v11 = vcvt.s32.f32 %v1855_v47  ;;  %v6263_v19 = vld [vmem:[#allocation17_spill] sm:$0xff] }
 0x5a4   : > { %1693 = vmin.xlane.f32.xlu0 %v1692_v3  ;;  %v2040_v3 = vand.u32 65535, %v6263_v19  ;;  %v1862_v24 = vsel %vm1861_vm7, %v1857_v11, inf  ;;  %v2010_v11 = vand.u32 65535, %v5447_v15  ;;  %v2212_v15 = vcvt.s32.f32 %v2210_v31  ;;  %v6273_v31 = vld [vmem:[#allocation23_spill] sm:$0xff] }
 0x5a6   : > { %v5835_v49 = vpop.xlane.xlu0 %2059  ;;  %v2042_v62 = vcvt.s32.f32 %v2040_v3  ;;  %v6269_v3 = vld [vmem:[#allocation21_spill] sm:$0xff] }
 0x5a7   : > { %vm2016_vm11 = vcmp.eq.f32.partialorder %v6269_v3, %v5820_v51  ;;  %vm2061_vm14 = vcmp.eq.f32.partialorder %v6273_v31, %v5835_v49 }
 0x5aa   : > { %1848 = vmin.xlane.f32.xlu1 %v1847_v50  ;;  %1878 = vmin.xlane.f32.xlu2 %v1877_v54  ;;  %v1892_v50 = vsel %vm1891_vm8, %v1887_v33, inf  ;;  %v2047_v54 = vsel %vm2046_vm9, %v2042_v62, inf  ;;  %v6270_v33 = vld [vmem:[#allocation26_spill] sm:$0xff]  ;;  %v2012_v62 = vcvt.s32.f32 %v2010_v11 }
 0x5ac   : > { %1863 = vmin.xlane.f32.xlu0 %v1862_v24  ;;  %v2027_v24 = vcvt.s32.f32 %v2025_v34  ;;  %v2017_v8 = vsel %vm2016_vm11, %v2012_v62, inf }
 0x5ad   : > { %v5856_v9 = vpop.xlane.xlu1 %2214  ;;  %v5859_v16 = vpop.xlane.xlu2 %2199 }
 0x5ae   : > { %v5850_v47 = vpop.xlane.xlu0 %2184  ;;  %6267 = vst [vmem:[#allocation15_spill] sm:$0xff] %v5856_v9  ;;  %v2032_v19 = vsel %vm2031_vm10, %v2027_v24, inf  ;;  %vm2216_vm12 = vcmp.eq.f32.partialorder %v6270_v33, %v5856_v9  ;;  %vm2201_vm13 = vcmp.eq.f32.partialorder %v6271_v12, %v5859_v16  ;;  %v6272_v24 = vld [vmem:[#allocation22_spill] sm:$0xff]  ;;  %v2365_v33 = vand.u32 65535, %v5529_v39 }
 0x5af   : > { %vm2186_vm2 = vcmp.eq.f32.partialorder %v5499_v37, %v5850_v47  ;;  %v6278_v37 = vld [vmem:[#allocation29_spill] sm:$0xff] }
 0x5b0   : > { %v2367_v39 = vcvt.s32.f32 %v2365_v33 }
 0x5b2   : > { %1893 = vmin.xlane.f32.xlu1 %v1892_v50  ;;  %2048 = vmin.xlane.f32.xlu2 %v2047_v54  ;;  %v2217_v50 = vsel %vm2216_vm12, %v2212_v15, inf  ;;  %v2197_v54 = vcvt.s32.f32 %v2195_v48  ;;  %v2382_v15 = vcvt.s32.f32 %v2380_v61 }
 0x5b4   : > { %2033 = vmin.xlane.f32.xlu0 %v2032_v19  ;;  %v2055_v19 = vand.u32 65535, %v6272_v24  ;;  %v2202_v3 = vsel %vm2201_vm13, %v2197_v54, inf  ;;  %v2550_v54 = vand.u32 65535, %v5557_v55  ;;  %v6276_v55 = vld [vmem:[#allocation34_spill] sm:$0xff] }
 0x5b6   : > { %v5865_v34 = vpop.xlane.xlu0 %2229  ;;  %v2057_v62 = vcvt.s32.f32 %v2055_v19  ;;  %v2535_v19 = vand.u32 65535, %v5560_v38  ;;  %v2552_v31 = vcvt.s32.f32 %v2550_v54  ;;  %v6279_v54 = vld [vmem:[#allocation30_spill] sm:$0xff] }
 0x5b7   : > { %vm2231_vm4 = vcmp.eq.f32.partialorder %v6278_v37, %v5865_v34 }
 0x5b8   : > { %v2062_v40 = vsel %vm2061_vm14, %v2057_v62, inf }
 0x5ba   : > { %2018 = vmin.xlane.f32.xlu1 %v2017_v8  ;;  %2218 = vmin.xlane.f32.xlu2 %v2217_v50  ;;  %v6274_v8 = vld [vmem:[#allocation25_spill] sm:$0xff] }
 0x5bb   : > { %v2180_v50 = vand.u32 65535, %v6274_v8 }
 0x5bc   : > { %2203 = vmin.xlane.f32.xlu0 %v2202_v3 }
 0x5bd   : > { %v5872_v9 = vpop.xlane.xlu1 %2384  ;;  %v5874_v11 = vpop.xlane.xlu2 %2369  ;;  %v2182_v33 = vcvt.s32.f32 %v2180_v50 }
 0x5be   : > { %vm2386_vm15 = vcmp.eq.f32.partialorder %v5537_v1, %v5872_v9  ;;  %v5880_v48 = vpop.xlane.xlu0 %2354  ;;  %vm2371_vm1 = vcmp.eq.f32.partialorder %v5539_v23, %v5874_v11  ;;  %v6275_v23 = vld [vmem:[#allocation33_spill] sm:$0xff] }
 0x5bf   : > { %v2387_v12 = vsel %vm2386_vm15, %v2382_v15, inf  ;;  %v2372_v24 = vsel %vm2371_vm1, %v2367_v39, inf  ;;  %v2187_v62 = vsel %vm2186_vm2, %v2182_v33, inf  ;;  %v6280_v33 = vld [vmem:[#allocation31_spill] sm:$0xff] }
 0x5c0   : > { %vm2356_vm5 = vcmp.eq.f32.partialorder %v6280_v33, %v5880_v48 }
 0x5c2   : > { %2063 = vmin.xlane.f32.xlu1 %v2062_v40  ;;  %2388 = vmin.xlane.f32.xlu2 %v2387_v12  ;;  %v2537_v40 = vcvt.s32.f32 %v2535_v19  ;;  %v6277_v12 = vld [vmem:[#allocation28_spill] sm:$0xff] }
 0x5c3   : > { %v2225_v38 = vand.u32 65535, %v6277_v12  ;;  %v2690_v12 = vand.u32 65535, %v5627_v10  ;;  %v2735_v10 = vand.u32 65535, %v5614_v60 }
 0x5c4   : > { %2373 = vmin.xlane.f32.xlu0 %v2372_v24 }
 0x5c5   : > { %v5886_v3 = vpop.xlane.xlu1 %2554  ;;  %v5888_v1 = vpop.xlane.xlu2 %2539  ;;  %v2227_v24 = vcvt.s32.f32 %v2225_v38 }
 0x5c6   : > { %vm2556_vm0 = vcmp.eq.f32.partialorder %v6275_v23, %v5886_v3  ;;  %v5895_v61 = vpop.xlane.xlu0 %2399  ;;  %vm2541_vm3 = vcmp.eq.f32.partialorder %v6276_v55, %v5888_v1  ;;  %v2350_v23 = vand.u32 65535, %v6279_v54 }
 0x5c7   : > { %v2557_v15 = vsel %vm2556_vm0, %v2552_v31, inf  ;;  %v2542_v39 = vsel %vm2541_vm3, %v2537_v40, inf  ;;  %v2232_v50 = vsel %vm2231_vm4, %v2227_v24, inf  ;;  %vm2401_vm6 = vcmp.eq.f32.partialorder %v5571_v41, %v5895_v61 }
 0x5c8   : > { %v2352_v31 = vcvt.s32.f32 %v2350_v23  ;;  %v2520_v41 = vand.u32 65535, %v5579_v26  ;;  %v2565_v26 = vand.u32 65535, %v5595_v58  ;;  %v3045_v58 = vand.u32 65535, %v5674_v42 }
 0x5ca   : > { %2188 = vmin.xlane.f32.xlu1 %v2187_v62  ;;  %2558 = vmin.xlane.f32.xlu2 %v2557_v15  ;;  %v2357_v55 = vsel %vm2356_vm5, %v2352_v31, inf  ;;  %v2720_v62 = vand.u32 65535, %v5617_v21  ;;  %v6281_v15 = vld [vmem:[#allocation32_spill] sm:$0xff] }
 0x5cb   : > { %v2395_v40 = vand.u32 65535, %v6281_v15  ;;  %v2890_v15 = vand.u32 65535, %v5640_v18 }
 0x5cc   : > { %2543 = vmin.xlane.f32.xlu0 %v2542_v39  ;;  %v2722_v37 = vcvt.s32.f32 %v2720_v62  ;;  %v2522_v62 = vcvt.s32.f32 %v2520_v41  ;;  %v3047_v41 = vcvt.s32.f32 %v3045_v58 }
 0x5cd   : > { %v2397_v54 = vcvt.s32.f32 %v2395_v40 }
 0x5ce   : > { %v5902_v8 = vpop.xlane.xlu0 %2524 }
 0x5cf   : > { %v2402_v33 = vsel %vm2401_vm6, %v2397_v54, inf  ;;  %vm2526_vm10 = vcmp.eq.f32.partialorder %v5589_v63, %v5902_v8  ;;  %v2892_v63 = vcvt.s32.f32 %v2890_v15  ;;  %v2567_v54 = vcvt.s32.f32 %v2565_v26  ;;  %v6282_v15 = vld [vmem:[#allocation35_spill] sm:$0xff] }
 0x5d0   : > { %v2527_v40 = vsel %vm2526_vm10, %v2522_v62, inf  ;;  %v3075_v62 = vand.u32 65535, %v5740_v4  ;;  %v6285_v4 = vld [vmem:[#allocation41_spill] sm:$0xff] }
 0x5d1   : > { %v3245_v58 = vand.u32 65535, %v6285_v4 }
 0x5d2   : > { %2233 = vmin.xlane.f32.xlu1 %v2232_v50  ;;  %v2692_v50 = vcvt.s32.f32 %v2690_v12 }
 0x5d6   : > { %v5907_v19 = vpop.xlane.xlu0 %2569 }
 0x5d7   : > { %vm2571_vm12 = vcmp.eq.f32.partialorder %v5601_v59, %v5907_v19 }
 0x5da   : > { %2358 = vmin.xlane.f32.xlu1 %v2357_v55  ;;  %v2737_v55 = vcvt.s32.f32 %v2735_v10  ;;  %v3030_v10 = vand.u32 65535, %v5710_v46 }
 0x5dd   : > { %v5912_v39 = vpop.xlane.xlu1 %2739  ;;  %v5914_v38 = vpop.xlane.xlu2 %2724 }
 0x5de   : > { %vm2726_vm7 = vcmp.eq.f32.partialorder %v5631_v57, %v5914_v38  ;;  %vm2741_vm9 = vcmp.eq.f32.partialorder %v5629_v7, %v5912_v39  ;;  %v2875_v7 = vand.u32 65535, %v5681_v2  ;;  %v2572_v2 = vsel %vm2571_vm12, %v2567_v54, inf }
 0x5df   : > { %v5920_v24 = vpop.xlane.xlu0 %2694  ;;  %v2727_v21 = vsel %vm2726_vm7, %v2722_v37, inf  ;;  %v2742_v60 = vsel %vm2741_vm9, %v2737_v55, inf }
 0x5e0   : > { %vm2696_vm8 = vcmp.eq.f32.partialorder %v5647_v53, %v5920_v24  ;;  %2728 = vmin.xlane.f32.xlu0 %v2727_v21  ;;  %v2877_v18 = vcvt.s32.f32 %v2875_v7 }
 0x5e1   : > { %v2697_v23 = vsel %vm2696_vm8, %v2692_v50, inf }
 0x5e2   : > { %2698 = vmin.xlane.f32.xlu2 %v2697_v23  ;;  %2403 = vmin.xlane.f32.xlu1 %v2402_v33  ;;  %v2705_v23 = vand.u32 65535, %v5653_v35  ;;  %v3200_v35 = vand.u32 65535, %v5703_v0 }
 0x5e5   : > { %v5928_v57 = vpop.xlane.xlu1 %2894  ;;  %v5930_v31 = vpop.xlane.xlu2 %2864 }
 0x5e6   : > { %vm2896_vm11 = vcmp.eq.f32.partialorder %v5665_v52, %v5928_v57 }
 0x5e7   : > { %v5934_v53 = vpop.xlane.xlu0 %2709  ;;  %v2897_v21 = vsel %vm2896_vm11, %v2892_v63, inf  ;;  %v3202_v63 = vcvt.s32.f32 %v3200_v35  ;;  %v3247_v35 = vcvt.s32.f32 %v3245_v58 }
 0x5e8   : > { %2743 = vmin.xlane.f32.xlu0 %v2742_v60  ;;  %vm2711_vm15 = vcmp.eq.f32.partialorder %v5678_v30, %v5934_v53  ;;  %v2707_v60 = vcvt.s32.f32 %v2705_v23  ;;  %v6283_v30 = vld [vmem:[#allocation7_spill] sm:$0xff]  ;;  %v6286_v23 = vld [vmem:[#allocation37_spill] sm:$0xff] }
 0x5ea   : > { %2528 = vmin.xlane.f32.xlu1 %v2527_v40  ;;  %v2712_v46 = vsel %vm2711_vm15, %v2707_v60, inf  ;;  %v2860_v40 = vand.u32 65535, %v6282_v15 }
 0x5ec   : > { %v2862_v54 = vcvt.s32.f32 %v2860_v40 }
 0x5ed   : > { %v5941_v12 = vpop.xlane.xlu1 %3049  ;;  %v5943_v37 = vpop.xlane.xlu2 %2909 }
 0x5ee   : > { %vm3051_vm14 = vcmp.eq.f32.partialorder %v5696_v17, %v5941_v12 }
 0x5ef   : > { %v5947_v50 = vpop.xlane.xlu0 %2879  ;;  %v3052_v55 = vsel %vm3051_vm14, %v3047_v41, inf  ;;  %v2905_v41 = vand.u32 65535, %v6286_v23 }
 0x5f0   : > { %vm2881_vm13 = vcmp.eq.f32.partialorder %v5706_v43, %v5947_v50  ;;  %2898 = vmin.xlane.f32.xlu0 %v2897_v21  ;;  %v3032_v43 = vcvt.s32.f32 %v3030_v10  ;;  %v3230_v10 = vand.u32 65535, %v5769_v27 }
 0x5f1   : > { %v2882_v52 = vsel %vm2881_vm13, %v2877_v18, inf  ;;  %v3077_v18 = vcvt.s32.f32 %v3075_v62  ;;  %v2907_v15 = vcvt.s32.f32 %v2905_v41 }
 0x5f2   : > { %2883 = vmin.xlane.f32.xlu2 %v2882_v52  ;;  %2573 = vmin.xlane.f32.xlu1 %v2572_v2 }
 0x5f5   : > { %v5956_v59 = vpop.xlane.xlu1 %3204  ;;  %v5958_v33 = vpop.xlane.xlu2 %3064 }
 0x5f6   : > { %vm3206_vm2 = vcmp.eq.f32.partialorder %v6283_v30, %v5956_v59  ;;  %v6289_v30 = vld [vmem:[#allocation9_spill] sm:$0xff] }
 0x5f7   : > { %v5962_v42 = vpop.xlane.xlu0 %3034  ;;  %v3207_v21 = vsel %vm3206_vm2, %v3202_v63, inf  ;;  %v3400_v63 = vand.u32 65535, %v6289_v30 }
 0x5f8   : > { %vm3036_vm1 = vcmp.eq.f32.partialorder %v5736_v22, %v5962_v42  ;;  %3053 = vmin.xlane.f32.xlu0 %v3052_v55  ;;  %v6284_v22 = vld [vmem:[#allocation36_spill] sm:$0xff] }
 0x5f9   : > { %v3037_v17 = vsel %vm3036_vm1, %v3032_v43, inf  ;;  %vm2866_vm0 = vcmp.eq.f32.partialorder %v6284_v22, %v5930_v31  ;;  %v6287_v43 = vld [vmem:[#allocation8_spill] sm:$0xff]  ;;  %v3385_v22 = vand.u32 65535, %v5794_v20  ;;  %v3402_v58 = vcvt.s32.f32 %v3400_v63 }
 0x5fa   : > { %3038 = vmin.xlane.f32.xlu2 %v3037_v17  ;;  %2713 = vmin.xlane.f32.xlu1 %v2712_v46  ;;  %v2867_v2 = vsel %vm2866_vm0, %v2862_v54, inf  ;;  %v3232_v46 = vcvt.s32.f32 %v3230_v10  ;;  %v1711_v20 = vcvt.f32.s32 %v5805_v5 }
 0x5fd   : > { %v5971_v26 = vpop.xlane.xlu1 %3249  ;;  %v5973_v7 = vpop.xlane.xlu2 %3219 }
 0x5fe   : > { %vm3251_vm4 = vcmp.eq.f32.partialorder %v6287_v43, %v5971_v26 }
 0x5ff   : > { %v5977_v0 = vpop.xlane.xlu0 %3079  ;;  %v3252_v62 = vsel %vm3251_vm4, %v3247_v35, inf  ;;  %v1696_v35 = vcvt.f32.s32 %v5812_v36 }
 0x600   : > { %vm3081_vm3 = vcmp.eq.f32.partialorder %v5764_v32, %v5977_v0  ;;  %3208 = vmin.xlane.f32.xlu0 %v3207_v21  ;;  %v6288_v32 = vld [vmem:[#allocation38_spill] sm:$0xff] }
 0x601   : > { %v3082_v52 = vsel %vm3081_vm3, %v3077_v18, inf  ;;  %vm2911_vm5 = vcmp.eq.f32.partialorder %v6288_v32, %v5943_v37  ;;  %v6290_v18 = vld [vmem:[#allocation39_spill] sm:$0xff]  ;;  %v6292_v32 = vld [vmem:[#allocation40_spill] sm:$0xff]  ;;  %vm1744_vm3 = vcmask 0  }
 0x602   : > { %3083 = vmin.xlane.f32.xlu2 %v3082_v52  ;;  %2868 = vmin.xlane.f32.xlu1 %v2867_v2  ;;  %v2912_v40 = vsel %vm2911_vm5, %v2907_v15, inf  ;;  %v3060_v21 = vand.u32 65535, %v6290_v18  ;;  %v3387_v2 = vcvt.s32.f32 %v3385_v22  ;;  %v1712_v15 = vshll.u32 %v1711_v20, 16 }
 0x603   : > { %v1697_v22 = vshll.u32 %v1696_v35, 16 }
 0x604   : > { %v3062_v23 = vcvt.s32.f32 %v3060_v21 }
 0x605   : > { %v5986_v55 = vpop.xlane.xlu1 %3404  ;;  %v5988_v60 = vpop.xlane.xlu2 %3374 }
 0x606   : > { %vm3406_vm7 = vcmp.eq.f32.partialorder %v5780_v13, %v5986_v55  ;;  %v1726_v13 = vcvt.f32.s32 %v5748_v45 }
 0x607   : > { %v5992_v17 = vpop.xlane.xlu0 %3234  ;;  %v3407_v10 = vsel %vm3406_vm7, %v3402_v58, inf }
 0x608   : > { %vm3236_vm6 = vcmp.eq.f32.partialorder %v5788_v6, %v5992_v17  ;;  %3253 = vmin.xlane.f32.xlu0 %v3252_v62  ;;  %v6291_v6 = vld [vmem:[#allocation11_spill] sm:$0xff]  ;;  %v1681_v62 = vcvt.f32.s32 %v5719_v25 }
 0x609   : > { %v3237_v27 = vsel %vm3236_vm6, %v3232_v46, inf  ;;  %vm3066_vm8 = vcmp.eq.f32.partialorder %v6291_v6, %v5958_v33  ;;  %v3215_v46 = vand.u32 65535, %v6292_v32 }
 0x60a   : > { %3238 = vmin.xlane.f32.xlu2 %v3237_v27  ;;  %2913 = vmin.xlane.f32.xlu1 %v2912_v40  ;;  %v3067_v43 = vsel %vm3066_vm8, %v3062_v23, inf  ;;  %v1727_v27 = vshll.u32 %v1726_v13, 16  ;;  %v1682_v58 = vshll.u32 %v1681_v62, 16  ;;  %v6294_v23 = vld [vmem:[#allocation13_spill] sm:$0xff]  ;;  %v6296_v62 = vld [vmem:[#allocation10_spill] sm:$0xff] }
 0x60b   : > { %v3217_v21 = vcvt.s32.f32 %v3215_v46  ;;  %v1851_v25 = vcvt.f32.s32 %v6294_v23  ;;  %vm3376_vm13 = vcmp.eq.f32.partialorder %v6296_v62, %v5988_v60 }
 0x60d   : > { %v1679_v54 = vpop.xlane.xlu1 %1678  ;;  %v6001_v4 = vpop.xlane.xlu2 %3419  ;;  %v1852_v46 = vshll.u32 %v1851_v25, 16 }
 0x60e   : > { %v1680_v5 = vcvt.f32.s32 %v1679_v54  ;;  %v1866_v54 = vcvt.f32.s32 %v5828_v14 }
 0x60f   : > { %v6005_v52 = vpop.xlane.xlu0 %3389 }
 0x610   : > { %vm3391_vm9 = vcmp.eq.f32.partialorder %v5807_v56, %v6005_v52  ;;  %3408 = vmin.xlane.f32.xlu0 %v3407_v10  ;;  %v6293_v56 = vld [vmem:[#allocation12_spill] sm:$0xff]  ;;  %v1683_v20 = vadd.s32 %v1682_v58, %v1680_v5  ;;  %v1867_v5 = vshll.u32 %v1866_v54, 16 }
 0x611   : > { %v3392_v41 = vsel %vm3391_vm9, %v3387_v2, inf  ;;  %vm3221_vm10 = vcmp.eq.f32.partialorder %v6293_v56, %v5973_v7  ;;  %v6299_v54 = vld [vmem:[#allocation44_spill] sm:$0xff] }
 0x612   : > { %3393 = vmin.xlane.f32.xlu2 %v3392_v41  ;;  %3068 = vmin.xlane.f32.xlu1 %v3067_v43  ;;  %v3222_v10 = vsel %vm3221_vm10, %v3217_v21, inf  ;;  %v6295_v43 = vld [vmem:[#allocation42_spill] sm:$0xff]  ;;  %vm3421_vm2 = vcmp.eq.f32.partialorder %v6299_v54, %v6001_v4 }
 0x613   : > { %v3370_v32 = vand.u32 65535, %v6295_v43 }
 0x615   : > { %v1724_v40 = vpop.xlane.xlu1 %1723  ;;  %v1709_v30 = vpop.xlane.xlu2 %1708  ;;  %v3372_v56 = vcvt.s32.f32 %v3370_v32 }
 0x616   : > { %v1725_v63 = vcvt.f32.s32 %v1724_v40  ;;  %v1710_v45 = vcvt.f32.s32 %v1709_v30 }
 0x617   : > { %v1694_v18 = vpop.xlane.xlu0 %1693  ;;  %v3377_v58 = vsel %vm3376_vm13, %v3372_v56, inf  ;;  %v2036_v56 = vcvt.f32.s32 %v5844_v29 }
 0x618   : > { %v1728_v6 = vadd.s32 %v1727_v27, %v1725_v63  ;;  %v1695_v36 = vcvt.f32.s32 %v1694_v18  ;;  %v1713_v2 = vadd.s32 %v1712_v15, %v1710_v45  ;;  %v6297_v18 = vld [vmem:[#allocation45_spill] sm:$0xff] }
 0x619   : > { %v1881_v21 = vcvt.f32.s32 %v6297_v18 }
 0x61a   : > { %v1698_v13 = vadd.s32 %v1697_v22, %v1695_v36  ;;  %vm1731_vm11 = vcmp.lt.s32.totalorder %v1713_v2, %v1728_v6  ;;  %3223 = vmin.xlane.f32.xlu1 %v3222_v10  ;;  %v6298_v10 = vld [vmem:[#allocation43_spill] sm:$0xff] }
 0x61b   : > { %v1732_v41 = vsel %vm1731_vm11, %v1713_v2, %v1728_v6  ;;  %v1896_v6 = vcvt.f32.s32 %v5800_v44  ;;  %v3415_v23 = vand.u32 65535, %v6298_v10 }
 0x61c   : > { %vm1729_vm12 = vcmp.lt.s32.totalorder %v1683_v20, %v1698_v13 }
 0x61d   : > { %v1730_v35 = vsel %vm1729_vm12, %v1683_v20, %v1698_v13  ;;  %v1849_v40 = vpop.xlane.xlu1 %1848  ;;  %v1879_v14 = vpop.xlane.xlu2 %1878  ;;  %v1882_v13 = vshll.u32 %v1881_v21, 16  ;;  %v1897_v32 = vshll.u32 %v1896_v6, 16 }
 0x61e   : > { %vm1733_vm14 = vcmp.lt.s32.totalorder %v1730_v35, %v1732_v41  ;;  %v1850_v15 = vcvt.f32.s32 %v1849_v40  ;;  %v1880_v20 = vcvt.f32.s32 %v1879_v14  ;;  %v3417_v40 = vcvt.s32.f32 %v3415_v23 }
 0x61f   : > { %v1734_v27 = vsel %vm1733_vm14, %v1730_v35, %v1732_v41  ;;  %v1864_v30 = vpop.xlane.xlu0 %1863  ;;  %v2037_v14 = vshll.u32 %v2036_v56, 16  ;;  %v2051_v23 = vcvt.f32.s32 %v5841_v28 }
 0x620   : > { %v1735_v63 = vrot.slane %v1734_v27, 4  ;;  %v1853_v45 = vadd.s32 %v1852_v46, %v1850_v15  ;;  %v1865_v22 = vcvt.f32.s32 %v1864_v30  ;;  %v1883_v62 = vadd.s32 %v1882_v13, %v1880_v20 }
 0x621   : > { %v3422_v30 = vsel %vm3421_vm2, %v3417_v40, inf  ;;  %v2052_v28 = vshll.u32 %v2051_v23, 16 }
 0x622   : > { %vm1736_vm15 = vcmp.lt.s32.totalorder %v1734_v27, %v1735_v63  ;;  %v1868_v36 = vadd.s32 %v1867_v5, %v1865_v22  ;;  %3378 = vmin.xlane.f32.xlu1 %v3377_v58  ;;  %v2021_v5 = vcvt.f32.s32 %v5820_v51 }
 0x623   : > { %v1737_v2 = vsel %vm1736_vm15, %v1734_v27, %v1735_v63 }
 0x624   : > { %v1738_v25 = vrot.slane %v1737_v2, 2  ;;  %vm1899_vm1 = vcmp.lt.s32.totalorder %v1853_v45, %v1868_v36  ;;  %v2022_v58 = vshll.u32 %v2021_v5, 16 }
 0x625   : > { %v1900_v41 = vsel %vm1899_vm1, %v1853_v45, %v1868_v36  ;;  %v1894_v43 = vpop.xlane.xlu1 %1893  ;;  %v2049_v10 = vpop.xlane.xlu2 %2048 }
 0x626   : > { %vm1739_vm0 = vcmp.lt.s32.totalorder %v1737_v2, %v1738_v25  ;;  %v1895_v35 = vcvt.f32.s32 %v1894_v43 }
 0x627   : > { %v1740_v44 = vsel %vm1739_vm0, %v1737_v2, %v1738_v25  ;;  %v2034_v27 = vpop.xlane.xlu0 %2033  ;;  %v2066_v25 = vcvt.f32.s32 %v5835_v49 }
 0x628   : > { %v1741_v46 = vrot.slane %v1740_v44, 1  ;;  %v1898_v15 = vadd.s32 %v1897_v32, %v1895_v35  ;;  %v2035_v22 = vcvt.f32.s32 %v2034_v27 }
 0x629   : > { %v2067_v49 = vshll.u32 %v2066_v25, 16 }
 0x62a   : > { %vm1742_vm4 = vcmp.lt.s32.totalorder %v1740_v44, %v1741_v46  ;;  %vm1901_vm5 = vcmp.lt.s32.totalorder %v1883_v62, %v1898_v15  ;;  %3423 = vmin.xlane.f32.xlu1 %v3422_v30  ;;  %v2038_v29 = vadd.s32 %v2037_v14, %v2035_v22 }
 0x62b   : > { %v1743_v63 = vsel %vm1742_vm4, %v1740_v44, %v1741_v46  ;;  %v1902_v45 = vsel %vm1901_vm5, %v1883_v62, %v1898_v15 }
 0x62c   : > { %1745 = vst.msk [vmem:[%s6030_s20] sm:$0x1] %vm1744_vm3, %v1743_v63  ;;  %vm1903_vm6 = vcmp.lt.s32.totalorder %v1900_v41, %v1902_v45 }
 0x62d   : > { %v1904_v18 = vsel %vm1903_vm6, %v1900_v41, %v1902_v45  ;;  %v2019_v21 = vpop.xlane.xlu1 %2018  ;;  %v2050_v41 = vcvt.f32.s32 %v2049_v10 }
 0x62e   : > { %v1905_v6 = vrot.slane %v1904_v18, 4  ;;  %v2020_v36 = vcvt.f32.s32 %v2019_v21 }
 0x62f   : > { %v2204_v44 = vpop.xlane.xlu0 %2203 }
 0x630   : > { %vm1906_vm7 = vcmp.lt.s32.totalorder %v1904_v18, %v1905_v6  ;;  %v2023_v51 = vadd.s32 %v2022_v58, %v2020_v36 }
 0x631   : > { %v1907_v2 = vsel %vm1906_vm7, %v1904_v18, %v1905_v6 }
 0x632   : > { %v1908_v20 = vrot.slane %v1907_v2, 2  ;;  %vm2069_vm8 = vcmp.lt.s32.totalorder %v2023_v51, %v2038_v29 }
 0x633   : > { %v2070_v13 = vsel %vm2069_vm8, %v2023_v51, %v2038_v29 }
 0x634   : > { %vm1909_vm9 = vcmp.lt.s32.totalorder %v1907_v2, %v1908_v20 }
 0x635   : > { %v1910_v43 = vsel %vm1909_vm9, %v1907_v2, %v1908_v20  ;;  %v2064_v32 = vpop.xlane.xlu1 %2063 }
 0x636   : > { %v1911_v54 = vrot.slane %v1910_v43, 1  ;;  %v2065_v35 = vcvt.f32.s32 %v2064_v32 }
 0x637   : > { %4120 = shalt.err (!%p4117_p3)
}
 0x638   : > { %s4158_s29 = smov 128   ;;  %s4159_s0 = smov 8   ;;  %vm1912_vm10 = vcmp.lt.s32.totalorder %v1910_v43, %v1911_v54  ;;  %v2053_v40 = vadd.s32 %v2052_v28, %v2050_v41  ;;  %v2068_v46 = vadd.s32 %v2067_v49, %v2065_v35  ;;  %v2191_v15 = vcvt.f32.s32 %v5850_v47  ;;  %v2219_v6 = vpop.xlane.xlu2 %2218  ;;  %v2374_v47 = vpop.xlane.xlu0 %2373  ;;  %v6300_v29 = vld [vmem:[#allocation15_spill] sm:$0xff] }
 0x639   : > { %3960 = dma.vmem_to_hbm [thread:$0]  (%p4263_p5), %s6043_s26, 5632, %s3471_s15, %s3447_s25, %s4158_s29, %s4158_s29, %s4159_s0   ;;  %v1913_v62 = vsel %vm1912_vm10, %v1910_v43, %v1911_v54  ;;  %v2206_v27 = vcvt.f32.s32 %v5859_v16  ;;  %v2205_v56 = vcvt.f32.s32 %v2204_v44  ;;  %v2221_v16 = vcvt.f32.s32 %v6300_v29 }
 0x63a   : > { %3764 = vst.msk [vmem:[%s6030_s20 + $0x1] sm:$0x1] %vm1744_vm3, %v1913_v62  ;;  %vm2071_vm11 = vcmp.lt.s32.totalorder %v2053_v40, %v2068_v46  ;;  %v2192_v45 = vshll.u32 %v2191_v15, 16  ;;  %v2236_v51 = vcvt.f32.s32 %v5865_v34  ;;  %v2220_v23 = vcvt.f32.s32 %v2219_v6 }
 0x63b   : > { %v2072_v30 = vsel %vm2071_vm11, %v2053_v40, %v2068_v46  ;;  %v2207_v22 = vshll.u32 %v2206_v27, 16  ;;  %v2361_v35 = vcvt.f32.s32 %v5880_v48  ;;  %v2376_v34 = vcvt.f32.s32 %v5874_v11 }
 0x63c   : > { %vm2073_vm12 = vcmp.lt.s32.totalorder %v2070_v13, %v2072_v30  ;;  %v2237_v41 = vshll.u32 %v2236_v51, 16  ;;  %v2375_v62 = vcvt.f32.s32 %v2374_v47  ;;  %v2391_v11 = vcvt.f32.s32 %v5872_v9 }
 0x63d   : > { %v2074_v5 = vsel %vm2073_vm12, %v2070_v13, %v2072_v30  ;;  %v2189_v63 = vpop.xlane.xlu1 %2188  ;;  %v2208_v14 = vadd.s32 %v2207_v22, %v2205_v56  ;;  %v2222_v13 = vshll.u32 %v2221_v16, 16  ;;  %v2362_v30 = vshll.u32 %v2361_v35, 16 }
 0x63e   : > { %v2075_v18 = vrot.slane %v2074_v5, 4  ;;  %v2190_v21 = vcvt.f32.s32 %v2189_v63  ;;  %v2377_v56 = vshll.u32 %v2376_v34, 16  ;;  %v2392_v16 = vshll.u32 %v2391_v11, 16 }
 0x63f   : > { %v2223_v28 = vadd.s32 %v2222_v13, %v2220_v23  ;;  %v2746_v23 = vcvt.f32.s32 %v5912_v39  ;;  %v2731_v9 = vcvt.f32.s32 %v5914_v38  ;;  %v2531_v13 = vcvt.f32.s32 %v5902_v8 }
 0x640   : > { %vm2076_vm13 = vcmp.lt.s32.totalorder %v2074_v5, %v2075_v18  ;;  %v2193_v58 = vadd.s32 %v2192_v45, %v2190_v21  ;;  %v2389_v44 = vpop.xlane.xlu2 %2388  ;;  %v2544_v40 = vpop.xlane.xlu0 %2543  ;;  %v2378_v45 = vadd.s32 %v2377_v56, %v2375_v62 }
 0x641   : > { %v2077_v36 = vsel %vm2076_vm13, %v2074_v5, %v2075_v18  ;;  %v2406_v18 = vcvt.f32.s32 %v5895_v61  ;;  %v2390_v6 = vcvt.f32.s32 %v2389_v44  ;;  %v2545_v35 = vcvt.f32.s32 %v2544_v40 }
 0x642   : > { %v2078_v2 = vrot.slane %v2077_v36, 2  ;;  %vm2239_vm14 = vcmp.lt.s32.totalorder %v2193_v58, %v2208_v14  ;;  %v2532_v34 = vshll.u32 %v2531_v13, 16  ;;  %v2576_v40 = vcvt.f32.s32 %v5907_v19 }
 0x643   : > { %v2240_v10 = vsel %vm2239_vm14, %v2193_v58, %v2208_v14  ;;  %v2407_v51 = vshll.u32 %v2406_v18, 16 }
 0x644   : > { %vm2079_vm15 = vcmp.lt.s32.totalorder %v2077_v36, %v2078_v2 }
 0x645   : > { %v2080_v25 = vsel %vm2079_vm15, %v2077_v36, %v2078_v2  ;;  %v2234_v20 = vpop.xlane.xlu1 %2233 }
 0x646   : > { %v2081_v43 = vrot.slane %v2080_v25, 1  ;;  %v2235_v32 = vcvt.f32.s32 %v2234_v20  ;;  %v2546_v20 = vcvt.f32.s32 %v5888_v1 }
 0x648   : > { %vm2082_vm1 = vcmp.lt.s32.totalorder %v2080_v25, %v2081_v43  ;;  %v2238_v49 = vadd.s32 %v2237_v41, %v2235_v32  ;;  %v2559_v36 = vpop.xlane.xlu2 %2558  ;;  %v2747_v32 = vshll.u32 %v2746_v23, 16  ;;  %v2547_v38 = vshll.u32 %v2546_v20, 16 }
 0x649   : > { %v2083_v54 = vsel %vm2082_vm1, %v2080_v25, %v2081_v43  ;;  %v2393_v25 = vadd.s32 %v2392_v16, %v2390_v6  ;;  %v2560_v18 = vcvt.f32.s32 %v2559_v36  ;;  %v3041_v36 = vcvt.f32.s32 %v5962_v42 }
 0x64a   : > { %3779 = vst.msk [vmem:[%s6030_s20 + $0x2] sm:$0x1] %vm1744_vm3, %v2083_v54  ;;  %vm2241_vm2 = vcmp.lt.s32.totalorder %v2223_v28, %v2238_v49  ;;  %v2732_v54 = vshll.u32 %v2731_v9, 16 }
 0x64b   : > { %v2242_v46 = vsel %vm2241_vm2, %v2223_v28, %v2238_v49 }
 0x64c   : > { %vm2243_vm0 = vcmp.lt.s32.totalorder %v2240_v10, %v2242_v46 }
 0x64d   : > { %v2244_v15 = vsel %vm2243_vm0, %v2240_v10, %v2242_v46  ;;  %v2359_v27 = vpop.xlane.xlu1 %2358 }
 0x64e   : > { %v2245_v5 = vrot.slane %v2244_v15, 4  ;;  %v2360_v63 = vcvt.f32.s32 %v2359_v27 }
 0x650   : > { %vm2246_vm4 = vcmp.lt.s32.totalorder %v2244_v15, %v2245_v5  ;;  %v2363_v22 = vadd.s32 %v2362_v30, %v2360_v63  ;;  %v2548_v30 = vadd.s32 %v2547_v38, %v2545_v35 }
 0x651   : > { %v2247_v48 = vsel %vm2246_vm4, %v2244_v15, %v2245_v5 }
 0x652   : > { %v2248_v21 = vrot.slane %v2247_v48, 2  ;;  %vm2409_vm5 = vcmp.lt.s32.totalorder %v2363_v22, %v2378_v45 }
 0x653   : > { %v2410_v14 = vsel %vm2409_vm5, %v2363_v22, %v2378_v45  ;;  %v2729_v58 = vpop.xlane.xlu0 %2728  ;;  %v2561_v45 = vcvt.f32.s32 %v5886_v3  ;;  %v3056_v3 = vcvt.f32.s32 %v5941_v12 }
 0x654   : > { %vm2249_vm6 = vcmp.lt.s32.totalorder %v2247_v48, %v2248_v21  ;;  %v2730_v43 = vcvt.f32.s32 %v2729_v58 }
 0x655   : > { %v2250_v47 = vsel %vm2249_vm6, %v2247_v48, %v2248_v21  ;;  %v2404_v29 = vpop.xlane.xlu1 %2403  ;;  %v2699_v44 = vpop.xlane.xlu2 %2698  ;;  %v2562_v6 = vshll.u32 %v2561_v45, 16 }
 0x656   : > { %v2251_v2 = vrot.slane %v2250_v47, 1  ;;  %v2405_v10 = vcvt.f32.s32 %v2404_v29  ;;  %v2733_v1 = vadd.s32 %v2732_v54, %v2730_v43  ;;  %v2700_v20 = vcvt.f32.s32 %v2699_v44 }
 0x657   : > { %v3042_v43 = vshll.u32 %v3041_v36, 16  ;;  %v2871_v44 = vcvt.f32.s32 %v5930_v31 }
 0x658   : > { %vm2252_vm7 = vcmp.lt.s32.totalorder %v2250_v47, %v2251_v2  ;;  %v2408_v61 = vadd.s32 %v2407_v51, %v2405_v10  ;;  %v2563_v51 = vadd.s32 %v2562_v6, %v2560_v18  ;;  %v2716_v10 = vcvt.f32.s32 %v5934_v53 }
 0x659   : > { %v2253_v41 = vsel %vm2252_vm7, %v2250_v47, %v2251_v2  ;;  %v2577_v47 = vshll.u32 %v2576_v40, 16  ;;  %v2701_v2 = vcvt.f32.s32 %v5920_v24  ;;  %v2901_v40 = vcvt.f32.s32 %v5928_v57 }
 0x65a   : > { %3794 = vst.msk [vmem:[%s6030_s20 + $0x3] sm:$0x1] %vm1744_vm3, %v2253_v41  ;;  %vm2411_vm8 = vcmp.lt.s32.totalorder %v2393_v25, %v2408_v61  ;;  %v2717_v41 = vshll.u32 %v2716_v10, 16  ;;  %v3256_v18 = vcvt.f32.s32 %v5971_v26  ;;  %v3241_v6 = vcvt.f32.s32 %v5992_v17 }
 0x65b   : > { %v2412_v28 = vsel %vm2411_vm8, %v2393_v25, %v2408_v61  ;;  %v2744_v49 = vpop.xlane.xlu0 %2743  ;;  %v3057_v61 = vshll.u32 %v3056_v3, 16  ;;  %v2702_v12 = vshll.u32 %v2701_v2, 16 }
 0x65c   : > { %vm2413_vm9 = vcmp.lt.s32.totalorder %v2410_v14, %v2412_v28  ;;  %v2745_v39 = vcvt.f32.s32 %v2744_v49  ;;  %v3242_v17 = vshll.u32 %v3241_v6, 16 }
 0x65d   : > { %v2414_v46 = vsel %vm2413_vm9, %v2410_v14, %v2412_v28  ;;  %v2529_v62 = vpop.xlane.xlu1 %2528  ;;  %v2703_v35 = vadd.s32 %v2702_v12, %v2700_v20 }
 0x65e   : > { %v2415_v15 = vrot.slane %v2414_v46, 4  ;;  %v2748_v8 = vadd.s32 %v2747_v32, %v2745_v39  ;;  %v2530_v27 = vcvt.f32.s32 %v2529_v62  ;;  %v2886_v62 = vcvt.f32.s32 %v5947_v50 }
 0x660   : > { %vm2416_vm10 = vcmp.lt.s32.totalorder %v2414_v46, %v2415_v15  ;;  %vm2751_vm11 = vcmp.lt.s32.totalorder %v2733_v1, %v2748_v8  ;;  %v2533_v56 = vadd.s32 %v2532_v34, %v2530_v27  ;;  %v2887_v50 = vshll.u32 %v2886_v62, 16 }
 0x661   : > { %v2417_v5 = vsel %vm2416_vm10, %v2414_v46, %v2415_v15  ;;  %v2752_v63 = vsel %vm2751_vm11, %v2733_v1, %v2748_v8 }
 0x662   : > { %v2418_v22 = vrot.slane %v2417_v5, 2  ;;  %vm2579_vm12 = vcmp.lt.s32.totalorder %v2533_v56, %v2548_v30 }
 0x663   : > { %v2580_v48 = vsel %vm2579_vm12, %v2533_v56, %v2548_v30  ;;  %v6078_v11 = vpop.xlane.xlu0 %2898 }
 0x664   : > { %vm2419_vm13 = vcmp.lt.s32.totalorder %v2417_v5, %v2418_v22 }
 0x665   : > { %v2420_v21 = vsel %vm2419_vm13, %v2417_v5, %v2418_v22  ;;  %v6080_v14 = vpop.xlane.xlu2 %2883  ;;  %v2574_v58 = vpop.xlane.xlu1 %2573 }
 0x666   : > { %v2421_v29 = vrot.slane %v2420_v21, 1  ;;  %v2575_v16 = vcvt.f32.s32 %v2574_v58  ;;  %v2885_v27 = vcvt.f32.s32 %v6080_v14  ;;  %v2916_v58 = vcvt.f32.s32 %v5943_v37 }
 0x667   : > { %v2902_v37 = vshll.u32 %v2901_v40, 16 }
 0x668   : > { %vm2422_vm14 = vcmp.lt.s32.totalorder %v2420_v21, %v2421_v29  ;;  %v2578_v19 = vadd.s32 %v2577_v47, %v2575_v16  ;;  %v2888_v14 = vadd.s32 %v2887_v50, %v2885_v27  ;;  %v3257_v16 = vshll.u32 %v3256_v18, 16 }
 0x669   : > { %v2423_v23 = vsel %vm2422_vm14, %v2420_v21, %v2421_v29  ;;  %v2917_v2 = vshll.u32 %v2916_v58, 16  ;;  %v3381_v50 = vcvt.f32.s32 %v5988_v60  ;;  %v3396_v58 = vcvt.f32.s32 %v6005_v52 }
 0x66a   : > { %3809 = vst.msk [vmem:[%s6030_s20 + $0x4] sm:$0x1] %vm1744_vm3, %v2423_v23  ;;  %vm2581_vm15 = vcmp.lt.s32.totalorder %v2563_v51, %v2578_v19 }
 0x66b   : > { %v2582_v9 = vsel %vm2581_vm15, %v2563_v51, %v2578_v19  ;;  %v3054_v25 = vpop.xlane.xlu0 %3053  ;;  %v2900_v51 = vcvt.f32.s32 %v6078_v11  ;;  %v3071_v11 = vcvt.f32.s32 %v5958_v33  ;;  %v3211_v33 = vcvt.f32.s32 %v5956_v59 }
 0x66c   : > { %vm2583_vm1 = vcmp.lt.s32.totalorder %v2580_v48, %v2582_v9  ;;  %v3055_v13 = vcvt.f32.s32 %v3054_v25 }
 0x66d   : > { %v2584_v32 = vsel %vm2583_vm1, %v2580_v48, %v2582_v9  ;;  %v3039_v28 = vpop.xlane.xlu2 %3038  ;;  %v2714_v24 = vpop.xlane.xlu1 %2713  ;;  %v2872_v48 = vshll.u32 %v2871_v44, 16  ;;  %v3226_v44 = vcvt.f32.s32 %v5973_v7 }
 0x66e   : > { %v2585_v49 = vrot.slane %v2584_v32, 4  ;;  %v3058_v53 = vadd.s32 %v3057_v61, %v3055_v13  ;;  %v3040_v54 = vcvt.f32.s32 %v3039_v28  ;;  %v2715_v42 = vcvt.f32.s32 %v2714_v24 }
 0x66f   : > { %v2903_v13 = vadd.s32 %v2902_v37, %v2900_v51  ;;  %v3227_v40 = vshll.u32 %v3226_v44, 16 }
 0x670   : > { %vm2586_vm2 = vcmp.lt.s32.totalorder %v2584_v32, %v2585_v49  ;;  %v3043_v39 = vadd.s32 %v3042_v43, %v3040_v54  ;;  %v2718_v38 = vadd.s32 %v2717_v41, %v2715_v42  ;;  %v3072_v42 = vshll.u32 %v3071_v11, 16 }
 0x671   : > { %v2587_v34 = vsel %vm2586_vm2, %v2584_v32, %v2585_v49  ;;  %v3086_v32 = vcvt.f32.s32 %v5977_v0 }
 0x672   : > { %v2588_v46 = vrot.slane %v2587_v34, 2  ;;  %vm3089_vm0 = vcmp.lt.s32.totalorder %v3043_v39, %v3058_v53  ;;  %vm2749_vm4 = vcmp.lt.s32.totalorder %v2703_v35, %v2718_v38 }
 0x673   : > { %v6090_v1 = vsel %vm3089_vm0, %v3043_v39, %v3058_v53  ;;  %v2750_v15 = vsel %vm2749_vm4, %v2703_v35, %v2718_v38  ;;  %v6092_v8 = vpop.xlane.xlu0 %3208  ;;  %v3087_v35 = vshll.u32 %v3086_v32, 16 }
 0x674   : > { %vm2589_vm5 = vcmp.lt.s32.totalorder %v2587_v34, %v2588_v46  ;;  %vm2753_vm6 = vcmp.lt.s32.totalorder %v2750_v15, %v2752_v63  ;;  %v3210_v27 = vcvt.f32.s32 %v6092_v8 }
 0x675   : > { %v2590_v30 = vsel %vm2589_vm5, %v2587_v34, %v2588_v46  ;;  %v2754_v56 = vsel %vm2753_vm6, %v2750_v15, %v2752_v63  ;;  %v3084_v5 = vpop.xlane.xlu2 %3083  ;;  %v2869_v45 = vpop.xlane.xlu1 %2868 }
 0x676   : > { %v2591_v22 = vrot.slane %v2590_v30, 1  ;;  %v2755_v31 = vrot.slane %v2754_v56, 4  ;;  %v2870_v21 = vcvt.f32.s32 %v2869_v45  ;;  %v3085_v49 = vcvt.f32.s32 %v3084_v5 }
 0x678   : > { %vm2592_vm7 = vcmp.lt.s32.totalorder %v2590_v30, %v2591_v22  ;;  %vm2756_vm8 = vcmp.lt.s32.totalorder %v2754_v56, %v2755_v31  ;;  %v2873_v29 = vadd.s32 %v2872_v48, %v2870_v21  ;;  %v3088_v34 = vadd.s32 %v3087_v35, %v3085_v49 }
 0x679   : > { %v2593_v63 = vsel %vm2592_vm7, %v2590_v30, %v2591_v22  ;;  %v2757_v47 = vsel %vm2756_vm8, %v2754_v56, %v2755_v31  ;;  %v3212_v30 = vshll.u32 %v3211_v33, 16 }
 0x67a   : > { %3824 = vst.msk [vmem:[%s6030_s20 + $0x5] sm:$0x1] %vm1744_vm3, %v2593_v63  ;;  %v2758_v57 = vrot.slane %v2757_v47, 2  ;;  %vm2919_vm9 = vcmp.lt.s32.totalorder %v2873_v29, %v2888_v14  ;;  %v3382_v63 = vshll.u32 %v3381_v50, 16 }
 0x67b   : > { %v3254_v3 = vpop.xlane.xlu0 %3253  ;;  %v2920_v26 = vsel %vm2919_vm9, %v2873_v29, %v2888_v14  ;;  %v3213_v48 = vadd.s32 %v3212_v30, %v3210_v27 }
 0x67c   : > { %vm2759_vm10 = vcmp.lt.s32.totalorder %v2757_v47, %v2758_v57  ;;  %v3255_v19 = vcvt.f32.s32 %v3254_v3 }
 0x67d   : > { %v2760_v10 = vsel %vm2759_vm10, %v2757_v47, %v2758_v57  ;;  %v3239_v36 = vpop.xlane.xlu2 %3238  ;;  %v2914_v23 = vpop.xlane.xlu1 %2913 }
 0x67e   : > { %v2761_v9 = vrot.slane %v2760_v10, 1  ;;  %v3258_v25 = vadd.s32 %v3257_v16, %v3255_v19  ;;  %v3240_v61 = vcvt.f32.s32 %v3239_v36  ;;  %v2915_v20 = vcvt.f32.s32 %v2914_v23 }
 0x67f   : > { %v3397_v16 = vshll.u32 %v3396_v58, 16 }
 0x680   : > { %vm2762_vm11 = vcmp.lt.s32.totalorder %v2760_v10, %v2761_v9  ;;  %v3243_v12 = vadd.s32 %v3242_v17, %v3240_v61  ;;  %v2918_v41 = vadd.s32 %v2917_v2, %v2915_v20  ;;  %v3411_v17 = vcvt.f32.s32 %v5986_v55 }
 0x681   : > { %v2763_v43 = vsel %vm2762_vm11, %v2760_v10, %v2761_v9  ;;  %v3426_v10 = vcvt.f32.s32 %v6001_v4 }
 0x682   : > { %3839 = vst.msk [vmem:[%s6030_s20 + $0x6] sm:$0x1] %vm1744_vm3, %v2763_v43  ;;  %vm3261_vm12 = vcmp.lt.s32.totalorder %v3243_v12, %v3258_v25  ;;  %vm2921_vm13 = vcmp.lt.s32.totalorder %v2903_v13, %v2918_v41  ;;  %v3412_v20 = vshll.u32 %v3411_v17, 16 }
 0x683   : > { %v3262_v28 = vsel %vm3261_vm12, %v3243_v12, %v3258_v25  ;;  %v2922_v24 = vsel %vm2921_vm13, %v2903_v13, %v2918_v41  ;;  %v3409_v19 = vpop.xlane.xlu0 %3408  ;;  %v3427_v13 = vshll.u32 %v3426_v10, 16 }
 0x684   : > { %vm2923_vm14 = vcmp.lt.s32.totalorder %v2920_v26, %v2922_v24  ;;  %v3410_v9 = vcvt.f32.s32 %v3409_v19 }
 0x685   : > { %v2924_v53 = vsel %vm2923_vm14, %v2920_v26, %v2922_v24  ;;  %v3069_v54 = vpop.xlane.xlu1 %3068  ;;  %v3394_v18 = vpop.xlane.xlu2 %3393 }
 0x686   : > { %v2925_v39 = vrot.slane %v2924_v53, 4  ;;  %v3070_v38 = vcvt.f32.s32 %v3069_v54  ;;  %v3395_v14 = vcvt.f32.s32 %v3394_v18  ;;  %v3413_v43 = vadd.s32 %v3412_v20, %v3410_v9 }
 0x688   : > { %vm2926_vm15 = vcmp.lt.s32.totalorder %v2924_v53, %v2925_v39  ;;  %v3073_v46 = vadd.s32 %v3072_v42, %v3070_v38  ;;  %v3398_v26 = vadd.s32 %v3397_v16, %v3395_v14 }
 0x689   : > { %v2927_v0 = vsel %vm2926_vm15, %v2924_v53, %v2925_v39 }
 0x68a   : > { %v2928_v62 = vrot.slane %v2927_v0, 2  ;;  %vm3091_vm1 = vcmp.lt.s32.totalorder %v3073_v46, %v3088_v34 }
 0x68b   : > { %v3092_v15 = vsel %vm3091_vm1, %v3073_v46, %v3088_v34 }
 0x68c   : > { %vm2929_vm2 = vcmp.lt.s32.totalorder %v2927_v0, %v2928_v62  ;;  %vm3093_vm0 = vcmp.lt.s32.totalorder %v6090_v1, %v3092_v15 }
 0x68d   : > { %v2930_v56 = vsel %vm2929_vm2, %v2927_v0, %v2928_v62  ;;  %v3094_v5 = vsel %vm3093_vm0, %v6090_v1, %v3092_v15  ;;  %v3224_v45 = vpop.xlane.xlu1 %3223 }
 0x68e   : > { %v2931_v22 = vrot.slane %v2930_v56, 1  ;;  %v3095_v59 = vrot.slane %v3094_v5, 4  ;;  %v3225_v31 = vcvt.f32.s32 %v3224_v45 }
 0x690   : > { %vm2932_vm4 = vcmp.lt.s32.totalorder %v2930_v56, %v2931_v22  ;;  %vm3096_vm5 = vcmp.lt.s32.totalorder %v3094_v5, %v3095_v59  ;;  %v3228_v7 = vadd.s32 %v3227_v40, %v3225_v31 }
 0x691   : > { %v2933_v8 = vsel %vm2932_vm4, %v2930_v56, %v2931_v22  ;;  %v3097_v21 = vsel %vm3096_vm5, %v3094_v5, %v3095_v59 }
 0x692   : > { %3854 = vst.msk [vmem:[%s6030_s20 + $0x7] sm:$0x1] %vm1744_vm3, %v2933_v8  ;;  %v3098_v6 = vrot.slane %v3097_v21, 2  ;;  %vm3259_vm6 = vcmp.lt.s32.totalorder %v3213_v48, %v3228_v7 }
 0x693   : > { %v3260_v1 = vsel %vm3259_vm6, %v3213_v48, %v3228_v7 }
 0x694   : > { %vm3099_vm7 = vcmp.lt.s32.totalorder %v3097_v21, %v3098_v6  ;;  %vm3263_vm8 = vcmp.lt.s32.totalorder %v3260_v1, %v3262_v28 }
 0x695   : > { %v3100_v47 = vsel %vm3099_vm7, %v3097_v21, %v3098_v6  ;;  %v3264_v29 = vsel %vm3263_vm8, %v3260_v1, %v3262_v28  ;;  %v3379_v57 = vpop.xlane.xlu1 %3378 }
 0x696   : > { %v3101_v60 = vrot.slane %v3100_v47, 1  ;;  %v3265_v3 = vrot.slane %v3264_v29, 4  ;;  %v3380_v51 = vcvt.f32.s32 %v3379_v57 }
 0x698   : > { %vm3102_vm9 = vcmp.lt.s32.totalorder %v3100_v47, %v3101_v60  ;;  %vm3266_vm10 = vcmp.lt.s32.totalorder %v3264_v29, %v3265_v3  ;;  %v3383_v52 = vadd.s32 %v3382_v63, %v3380_v51 }
 0x699   : > { %v3103_v37 = vsel %vm3102_vm9, %v3100_v47, %v3101_v60  ;;  %v3267_v2 = vsel %vm3266_vm10, %v3264_v29, %v3265_v3 }
 0x69a   : > { %3869 = vst.msk [vmem:[%s6030_s20 + $0x8] sm:$0x1] %vm1744_vm3, %v3103_v37  ;;  %v3268_v36 = vrot.slane %v3267_v2, 2  ;;  %vm3429_vm11 = vcmp.lt.s32.totalorder %v3383_v52, %v3398_v26 }
 0x69b   : > { %v3430_v23 = vsel %vm3429_vm11, %v3383_v52, %v3398_v26 }
 0x69c   : > { %vm3269_vm12 = vcmp.lt.s32.totalorder %v3267_v2, %v3268_v36 }
 0x69d   : > { %v3270_v25 = vsel %vm3269_vm12, %v3267_v2, %v3268_v36  ;;  %v3424_v61 = vpop.xlane.xlu1 %3423 }
 0x69e   : > { %v3271_v12 = vrot.slane %v3270_v25, 1  ;;  %v3425_v41 = vcvt.f32.s32 %v3424_v61 }
 0x6a0   : > { %vm3272_vm13 = vcmp.lt.s32.totalorder %v3270_v25, %v3271_v12  ;;  %v3428_v11 = vadd.s32 %v3427_v13, %v3425_v41 }
 0x6a1   : > { %v3273_v55 = vsel %vm3272_vm13, %v3270_v25, %v3271_v12 }
 0x6a2   : > { %3884 = vst.msk [vmem:[%s6030_s20 + $0x9] sm:$0x1] %vm1744_vm3, %v3273_v55  ;;  %vm3431_vm14 = vcmp.lt.s32.totalorder %v3413_v43, %v3428_v11 }
 0x6a3   : > { %v3432_v4 = vsel %vm3431_vm14, %v3413_v43, %v3428_v11 }
 0x6a4   : > { %vm3433_vm15 = vcmp.lt.s32.totalorder %v3430_v23, %v3432_v4 }
 0x6a5   : > { %v3434_v32 = vsel %vm3433_vm15, %v3430_v23, %v3432_v4 }
 0x6a6   : > { %v3435_v28 = vrot.slane %v3434_v32, 4 }
 0x6a8   : > { %vm3436_vm1 = vcmp.lt.s32.totalorder %v3434_v32, %v3435_v28 }
 0x6a9   : > { %v3437_v24 = vsel %vm3436_vm1, %v3434_v32, %v3435_v28 }
 0x6aa   : > { %v3438_v49 = vrot.slane %v3437_v24, 2 }
 0x6ac   : > { %vm3439_vm2 = vcmp.lt.s32.totalorder %v3437_v24, %v3438_v49 }
 0x6ad   : > { %v3440_v53 = vsel %vm3439_vm2, %v3437_v24, %v3438_v49 }
 0x6ae   : > { %v3441_v54 = vrot.slane %v3440_v53, 1 }
 0x6b0   : > { %vm3442_vm0 = vcmp.lt.s32.totalorder %v3440_v53, %v3441_v54 }
 0x6b1   : > { %v3443_v42 = vsel %vm3442_vm0, %v3440_v53, %v3441_v54 }
 0x6b2   : > { %3899 = vst.msk [vmem:[%s6030_s20 + $0xa] sm:$0x1] %vm1744_vm3, %v3443_v42 }
 0x6b3 PF: > { %p3966_p4 = scmp.ge.s32.totalorder %s4155_s24, 2  ;;  %s3491_s0 = sand.u32 1, %s4143_s21  }
 0x6b4   : > { %s3492_s13 = scalar_lea.sflag [#allocation3], %s3491_s0 }
 0x6b5   : > { %p3963_p5 = pnand %p3966_p4, %p4267_p6 }
 0x6b7   : > { %p3964_p7 = pneg %p3963_p5 }
 0x6b9   : > { %4138 = dma.done.wait (%p3964_p7), %s3492_s13, 5632  }
 0x6ba   : > { %4140 = vsyncadd (%p3964_p7), %s3492_s13, 4294961664  ;;  %s6301_s26 = sld [smem:[#allocation5_spill]]  ;;  %p23_p8 = scmp.ge.s32.totalorder %s4250_s27, 4  }
 0x6bb   : > { %s6302_s23 = sld [smem:[#allocation6_spill]]  ;;  %s6303_s21 = smov %s4147_s22 }
 0x6bc   : > { %s6305_s24 = smov %s4250_s27  ;;  %25 = sbr.rel (!%p23_p8) target bundleno = 5 (0x5), region = 139 }
 0x6c0   : > { %s6304_s22 = smov %s6301_s26 }
 0x6c1   :  { %3513 = vsyncpa [#allocation3], 1 }
 0x6c2   :  { %3515 = vsyncpa [#allocation3 + $0x1], 1 }

</bundles_post_ra>
